<compile_context>
chip_gen: v6e
topology: v6e:2x2x1
jax: 0.10.0
libtpu: 0.0.40
codegen_flags: <defaults>
</compile_context>

<pallas_src>
import jax
import jax.numpy as jnp
import numpy as np
from jax.experimental import pallas as pl
from jax.experimental.pallas import tpu as pltpu


def _round_up(x, m):
    return ((x + m - 1) // m) * m


_CL = 8  # interior (data) column start inside the padded scratch (sublane aligned)


def _pack_weight(w_hwio):
    """(3, 3, Cin, Cout) HWIO -> (3*Cin, 3*Cout) with
    packed[dy*C + ci, dx*C + co] = w[dy, dx, ci, co] (dy -> K, dx -> N)."""
    kh, kw, ci, co = w_hwio.shape
    return jnp.transpose(w_hwio, (0, 2, 1, 3)).reshape(kh * ci, kw * co)


def _make_fused_kernel(H, W, C, Hp, Wp):
    """Fused residual block kernel for one batch element (NHWC layout)."""
    M = H * Wp            # rows of the flattened (padded-width) conv output
    R = M + 16            # rows of the packed LHS / matmul result (8-aligned,
                          # covers the largest static shift CL + 1 + M)
    CL = _CL

    def conv3x3(pad_ref, wp_ref, b_ref):
        """3x3 'same' conv over the zero-haloed (Hp, Wp, C) VMEM buffer.

        One MXU matmul: dy folded into K via a lane-concat of three dy-shifted
        row views, dx folded into N via the packed (3C, 3C) weights.  The dx
        taps and the aligned interior offset (CL-1) are realized as static row
        slices of the matmul result, so the final (H, Wp)->(H, W) extraction
        starts at sublane 0.  Returns the (H, W, C) f32 result + bias.
        """
        big = pad_ref[...].reshape(Hp * Wp, C)        # layout-free merge (Wp % 8 == 0)
        lhs = jnp.concatenate(                         # dy -> K   (K = 3C)
            [big[0:R], big[Wp:Wp + R], big[2 * Wp:2 * Wp + R]], axis=1)
        z = jnp.dot(lhs, wp_ref[...], preferred_element_type=jnp.float32)
        acc = (z[CL - 1:CL - 1 + M, 0 * C:1 * C]       # dx -> N, shift = row slice
               + z[CL + 0:CL + 0 + M, 1 * C:2 * C]
               + z[CL + 1:CL + 1 + M, 2 * C:3 * C])
        out = acc.reshape(H, Wp, C)[:, :W, :]          # aligned extraction (col 0)
        return out + b_ref[0].astype(jnp.float32)

    def kernel(x_ref, w1_ref, b1_ref, w2_ref, b2_ref, o_ref,
               xpad_ref, hpad_ref):
        # Zero only the halo strips valid outputs actually read (rows 0 and
        # H+1, columns CL-1 and CL+W).  Much cheaper than memsetting the whole
        # padded buffers, and (unlike first-grid-step-only zeroing) correct
        # when the batch axis is split across TensorCores.
        zrow = jnp.zeros((1, Wp, C), xpad_ref.dtype)
        zcol = jnp.zeros((H, 1, C), xpad_ref.dtype)
        for ref in (xpad_ref, hpad_ref):
            ref[0:1, :, :] = zrow
            ref[H + 1:H + 2, :, :] = zrow
            ref[1:H + 1, CL - 1:CL, :] = zcol
            ref[1:H + 1, CL + W:CL + W + 1, :] = zcol

        # Sublane-aligned interior store of the input (column start CL == 8).
        xpad_ref[1:H + 1, CL:CL + W, :] = x_ref[0]

        # conv1 + bias + ReLU; the intermediate h never leaves VMEM.
        h = jnp.maximum(conv3x3(xpad_ref, w1_ref, b1_ref), 0.0)
        hpad_ref[1:H + 1, CL:CL + W, :] = h.astype(hpad_ref.dtype)

        # conv2 + bias + residual add in f32, single cast on writeback.
        y = conv3x3(hpad_ref, w2_ref, b2_ref) + x_ref[0].astype(jnp.float32)
        o_ref[...] = y[None].astype(o_ref.dtype)

    return kernel


def residual_block_db_nhwc(x_nhwc, w1_hwio, b1, w2_hwio, b2):
    """Fused residual block; NHWC in / NHWC out, weights in HWIO."""
    N, H, W, C = x_nhwc.shape
    Wp = _round_up(W + _CL + 1, 8)   # 8-col left halo + W data cols + 1 right halo
    Hp = H + 3                       # top halo + H rows + bottom halo + slack

    kernel = _make_fused_kernel(H, W, C, Hp, Wp)
    w1p = _pack_weight(w1_hwio)
    w2p = _pack_weight(w2_hwio)

    # Scoped-VMEM sizing: double-buffered in/out blocks, packed weights, the two
    # padded scratches and the in-kernel matmul temporaries, with headroom under
    # the physical capacity (64 MiB on v7x, 128 MiB on v5e/v6e).
    itemsize = jnp.dtype(x_nhwc.dtype).itemsize
    R = H * Wp + 16
    block_bytes = H * W * C * itemsize
    weight_bytes = 2 * (9 * C * C + C) * itemsize
    scratch_bytes = 2 * Hp * Wp * C * itemsize
    temp_bytes = R * 3 * C * (itemsize + 4) + (H * Wp * C + 2 * H * W * C) * 4
    footprint = 4 * block_bytes + 2 * weight_bytes + scratch_bytes + temp_bytes
    try:
        vmem_cap = pltpu.get_tpu_info().vmem_capacity_bytes
    except Exception:  # conservative fallback if the query is unavailable
        vmem_cap = 64 * 2**20
    vmem_limit = int(max(32 * 2**20, min(vmem_cap - 16 * 2**20, 2 * footprint)))

    return pl.pallas_call(
        kernel,
        out_shape=jax.ShapeDtypeStruct((N, H, W, C), x_nhwc.dtype),
        grid=(N,),
        in_specs=[
            pl.BlockSpec((1, H, W, C), lambda n: (n, 0, 0, 0)),
            pl.BlockSpec((3 * C, 3 * C), lambda n: (0, 0)),
            pl.BlockSpec((1, C), lambda n: (0, 0)),
            pl.BlockSpec((3 * C, 3 * C), lambda n: (0, 0)),
            pl.BlockSpec((1, C), lambda n: (0, 0)),
        ],
        out_specs=pl.BlockSpec((1, H, W, C), lambda n: (n, 0, 0, 0)),
        scratch_shapes=[
            pltpu.VMEM((Hp, Wp, C), x_nhwc.dtype),   # zero-haloed input
            pltpu.VMEM((Hp, Wp, C), x_nhwc.dtype),   # zero-haloed intermediate h
        ],
        compiler_params=pltpu.CompilerParams(
            dimension_semantics=("parallel",),
            vmem_limit_bytes=vmem_limit,
        ),
    )(x_nhwc, w1p, b1.reshape(1, C), w2p, b2.reshape(1, C))


def residual_block_db(x_nchw, params):
    """PyTorch-compatible entry point (NCHW in / NCHW out).

    The transposes are pure interface glue; an NHWC end-to-end model should
    call residual_block_db_nhwc directly and skip them.
    """
    w1, b1, w2, b2 = params
    x = jnp.transpose(x_nchw, (0, 2, 3, 1))                # NCHW -> NHWC
    y = residual_block_db_nhwc(x, w1, b1, w2, b2)
    return jnp.transpose(y, (0, 3, 1, 2))                  # NHWC -> NCHW


if __name__ == "__main__":
    N, C, H, W = 2, 4, 16, 16
    key = jax.random.PRNGKey(0)
    k1, k2, k3, k4, k5 = jax.random.split(key, 5)

    x = jax.random.normal(k1, (N, C, H, W), jnp.float32)

    # Deterministic parameter init (PyTorch Conv2d-style uniform bounds).
    fan_in = C * 3 * 3
    bound = 1.0 / np.sqrt(fan_in)
    w1_oihw = jax.random.uniform(k2, (C, C, 3, 3), jnp.float32, -bound, bound)
    b1 = jax.random.uniform(k3, (C,), jnp.float32, -bound, bound)
    w2_oihw = jax.random.uniform(k4, (C, C, 3, 3), jnp.float32, -bound, bound)
    b2 = jax.random.uniform(k5, (C,), jnp.float32, -bound, bound)

    # OIHW -> HWIO for the kernel (host-side, weights are tiny).
    w1 = jnp.transpose(w1_oihw, (2, 3, 1, 0))
    w2 = jnp.transpose(w2_oihw, (2, 3, 1, 0))

    out = jax.block_until_ready(residual_block_db(x, (w1, b1, w2, b2)))

    # Pure-JAX reference for correctness.
    def conv_ref(inp, w_oihw, b):
        y = jax.lax.conv_general_dilated(
            inp, w_oihw, window_strides=(1, 1), padding="SAME",
            dimension_numbers=("NCHW", "OIHW", "NCHW"))
        return y + b[None, :, None, None]

    ref = conv_ref(jnp.maximum(conv_ref(x, w1_oihw, b1), 0.0), w2_oihw, b2) + x

    assert out.shape == (N, C, H, W)
    np.testing.assert_allclose(np.asarray(out), np.asarray(ref),
                               rtol=1e-4, atol=1e-4)
    print("KERNEL_OK")
</pallas_src>

<mosaic_0001>
module attributes {stable_mosaic.version = 11 : i64} {
  func.func @kernel(%arg0: i32, %arg1: memref<1x16x16x4xf32, #tpu.memory_space<vmem>>, %arg2: memref<12x12xf32, #tpu.memory_space<vmem>>, %arg3: memref<1x4xf32, #tpu.memory_space<vmem>>, %arg4: memref<12x12xf32, #tpu.memory_space<vmem>>, %arg5: memref<1x4xf32, #tpu.memory_space<vmem>>, %arg6: memref<1x16x16x4xf32, #tpu.memory_space<vmem>>, %arg7: memref<19x32x4xf32, #tpu.memory_space<vmem>>, %arg8: memref<19x32x4xf32, #tpu.memory_space<vmem>>) attributes {dimension_semantics = [#tpu.dimension_semantics<parallel>], iteration_bounds = array<i64: 2>, scalar_prefetch = 0 : i64, scratch_operands = 2 : i64, tpu.core_type = #tpu.core_type<tc>, window_params = [{transform_indices = @transform_0, window_bounds = array<i64: 1, 16, 16, 4>}, {pipeline_mode = #tpu.pipeline_mode<synchronous>, transform_indices = @transform_1, window_bounds = array<i64: 12, 12>}, {pipeline_mode = #tpu.pipeline_mode<synchronous>, transform_indices = @transform_2, window_bounds = array<i64: 1, 4>}, {pipeline_mode = #tpu.pipeline_mode<synchronous>, transform_indices = @transform_3, window_bounds = array<i64: 12, 12>}, {pipeline_mode = #tpu.pipeline_mode<synchronous>, transform_indices = @transform_4, window_bounds = array<i64: 1, 4>}, {transform_indices = @transform_5, window_bounds = array<i64: 1, 16, 16, 4>}]} {
    %cst = arith.constant 0.000000e+00 : f32
    %0 = vector.broadcast %cst : f32 to vector<1x32x4xf32>
    %cst_0 = arith.constant 0.000000e+00 : f32
    %1 = vector.broadcast %cst_0 : f32 to vector<16x1x4xf32>
    %c0 = arith.constant 0 : index
    %c0_1 = arith.constant 0 : index
    %c0_2 = arith.constant 0 : index
    %2 = vector.load %arg7[%c0, %c0_1, %c0_2] : memref<19x32x4xf32, #tpu.memory_space<vmem>>, vector<1x32x4xf32>
    tpu.vector_store %arg7[%c0, %c0_1, %c0_2], %0 {strides = array<i32>} : memref<19x32x4xf32, #tpu.memory_space<vmem>>, vector<1x32x4xf32>,
    %c17 = arith.constant 17 : index
    %c0_3 = arith.constant 0 : index
    %c0_4 = arith.constant 0 : index
    %3 = vector.load %arg7[%c17, %c0_3, %c0_4] : memref<19x32x4xf32, #tpu.memory_space<vmem>>, vector<1x32x4xf32>
    tpu.vector_store %arg7[%c17, %c0_3, %c0_4], %0 {strides = array<i32>} : memref<19x32x4xf32, #tpu.memory_space<vmem>>, vector<1x32x4xf32>,
    %c1 = arith.constant 1 : index
    %c7 = arith.constant 7 : index
    %c0_5 = arith.constant 0 : index
    %4 = vector.load %arg7[%c1, %c7, %c0_5] : memref<19x32x4xf32, #tpu.memory_space<vmem>>, vector<16x1x4xf32>
    tpu.vector_store %arg7[%c1, %c7, %c0_5], %1 {strides = array<i32>} : memref<19x32x4xf32, #tpu.memory_space<vmem>>, vector<16x1x4xf32>,
    %c1_6 = arith.constant 1 : index
    %c24 = arith.constant 24 : index
    %c0_7 = arith.constant 0 : index
    %5 = vector.load %arg7[%c1_6, %c24, %c0_7] : memref<19x32x4xf32, #tpu.memory_space<vmem>>, vector<16x1x4xf32>
    tpu.vector_store %arg7[%c1_6, %c24, %c0_7], %1 {strides = array<i32>} : memref<19x32x4xf32, #tpu.memory_space<vmem>>, vector<16x1x4xf32>,
    %c0_8 = arith.constant 0 : index
    %c0_9 = arith.constant 0 : index
    %c0_10 = arith.constant 0 : index
    %6 = vector.load %arg8[%c0_8, %c0_9, %c0_10] : memref<19x32x4xf32, #tpu.memory_space<vmem>>, vector<1x32x4xf32>
    tpu.vector_store %arg8[%c0_8, %c0_9, %c0_10], %0 {strides = array<i32>} : memref<19x32x4xf32, #tpu.memory_space<vmem>>, vector<1x32x4xf32>,
    %c17_11 = arith.constant 17 : index
    %c0_12 = arith.constant 0 : index
    %c0_13 = arith.constant 0 : index
    %7 = vector.load %arg8[%c17_11, %c0_12, %c0_13] : memref<19x32x4xf32, #tpu.memory_space<vmem>>, vector<1x32x4xf32>
    tpu.vector_store %arg8[%c17_11, %c0_12, %c0_13], %0 {strides = array<i32>} : memref<19x32x4xf32, #tpu.memory_space<vmem>>, vector<1x32x4xf32>,
    %c1_14 = arith.constant 1 : index
    %c7_15 = arith.constant 7 : index
    %c0_16 = arith.constant 0 : index
    %8 = vector.load %arg8[%c1_14, %c7_15, %c0_16] : memref<19x32x4xf32, #tpu.memory_space<vmem>>, vector<16x1x4xf32>
    tpu.vector_store %arg8[%c1_14, %c7_15, %c0_16], %1 {strides = array<i32>} : memref<19x32x4xf32, #tpu.memory_space<vmem>>, vector<16x1x4xf32>,
    %c1_17 = arith.constant 1 : index
    %c24_18 = arith.constant 24 : index
    %c0_19 = arith.constant 0 : index
    %9 = vector.load %arg8[%c1_17, %c24_18, %c0_19] : memref<19x32x4xf32, #tpu.memory_space<vmem>>, vector<16x1x4xf32>
    tpu.vector_store %arg8[%c1_17, %c24_18, %c0_19], %1 {strides = array<i32>} : memref<19x32x4xf32, #tpu.memory_space<vmem>>, vector<16x1x4xf32>,
    %c0_20 = arith.constant 0 : index
    %c0_21 = arith.constant 0 : index
    %c0_22 = arith.constant 0 : index
    %c0_23 = arith.constant 0 : index
    %10 = vector.load %arg1[%c0_20, %c0_21, %c0_22, %c0_23] : memref<1x16x16x4xf32, #tpu.memory_space<vmem>>, vector<1x16x16x4xf32>
    %11 = vector.shape_cast %10 : vector<1x16x16x4xf32> to vector<16x16x4xf32>
    %c1_24 = arith.constant 1 : index
    %c8 = arith.constant 8 : index
    %c0_25 = arith.constant 0 : index
    %12 = vector.load %arg7[%c1_24, %c8, %c0_25] : memref<19x32x4xf32, #tpu.memory_space<vmem>>, vector<16x16x4xf32>
    tpu.vector_store %arg7[%c1_24, %c8, %c0_25], %11 {strides = array<i32>} : memref<19x32x4xf32, #tpu.memory_space<vmem>>, vector<16x16x4xf32>,
    %c0_26 = arith.constant 0 : index
    %c0_27 = arith.constant 0 : index
    %c0_28 = arith.constant 0 : index
    %13 = vector.load %arg7[%c0_26, %c0_27, %c0_28] : memref<19x32x4xf32, #tpu.memory_space<vmem>>, vector<19x32x4xf32>
    %14 = vector.shape_cast %13 : vector<19x32x4xf32> to vector<608x4xf32>
    %15 = vector.extract_strided_slice %14 {offsets = [0, 0], sizes = [528, 4], strides = [1, 1]} : vector<608x4xf32> to vector<528x4xf32>
    %16 = vector.extract_strided_slice %14 {offsets = [32, 0], sizes = [528, 4], strides = [1, 1]} : vector<608x4xf32> to vector<528x4xf32>
    %17 = vector.extract_strided_slice %14 {offsets = [64, 0], sizes = [528, 4], strides = [1, 1]} : vector<608x4xf32> to vector<528x4xf32>
    %18 = tpu.concatenate %15, %16, %17 in 1 : vector<528x4xf32>, vector<528x4xf32>, vector<528x4xf32> -> vector<528x12xf32>
    %c0_29 = arith.constant 0 : index
    %c0_30 = arith.constant 0 : index
    %19 = vector.load %arg2[%c0_29, %c0_30] : memref<12x12xf32, #tpu.memory_space<vmem>>, vector<12x12xf32>
    %cst_31 = arith.constant dense<0.000000e+00> : vector<528x12xf32>
    %20 = tpu.matmul %18, %19, %cst_31 {dimension_numbers = #tpu.dot_dimension_numbers<[1], [0], [0], [1], [0, 0, 1, 1], [], []>} : vector<528x12xf32>, vector<12x12xf32>, vector<528x12xf32> -> vector<528x12xf32>
    %21 = vector.extract_strided_slice %20 {offsets = [7, 0], sizes = [512, 4], strides = [1, 1]} : vector<528x12xf32> to vector<512x4xf32>
    %22 = vector.extract_strided_slice %20 {offsets = [8, 4], sizes = [512, 4], strides = [1, 1]} : vector<528x12xf32> to vector<512x4xf32>
    %23 = arith.addf %21, %22 : vector<512x4xf32>
    %24 = vector.extract_strided_slice %20 {offsets = [9, 8], sizes = [512, 4], strides = [1, 1]} : vector<528x12xf32> to vector<512x4xf32>
    %25 = arith.addf %23, %24 : vector<512x4xf32>
    %26 = vector.shape_cast %25 : vector<512x4xf32> to vector<16x32x4xf32>
    %27 = vector.extract_strided_slice %26 {offsets = [0, 0, 0], sizes = [16, 16, 4], strides = [1, 1, 1]} : vector<16x32x4xf32> to vector<16x16x4xf32>
    %c0_32 = arith.constant 0 : index
    %c0_33 = arith.constant 0 : index
    %28 = vector.load %arg3[%c0_32, %c0_33] : memref<1x4xf32, #tpu.memory_space<vmem>>, vector<1x4xf32>
    %29 = vector.shape_cast %28 : vector<1x4xf32> to vector<4xf32>
    %30 = vector.shape_cast %29 : vector<4xf32> to vector<1x1x4xf32>
    %31 = vector.broadcast %30 : vector<1x1x4xf32> to vector<16x16x4xf32>
    %32 = arith.addf %27, %31 : vector<16x16x4xf32>
    %cst_34 = arith.constant 0.000000e+00 : f32
    %33 = vector.broadcast %cst_34 : f32 to vector<16x16x4xf32>
    %34 = arith.maximumf %32, %33 : vector<16x16x4xf32>
    %c1_35 = arith.constant 1 : index
    %c8_36 = arith.constant 8 : index
    %c0_37 = arith.constant 0 : index
    %35 = vector.load %arg8[%c1_35, %c8_36, %c0_37] : memref<19x32x4xf32, #tpu.memory_space<vmem>>, vector<16x16x4xf32>
    tpu.vector_store %arg8[%c1_35, %c8_36, %c0_37], %34 {strides = array<i32>} : memref<19x32x4xf32, #tpu.memory_space<vmem>>, vector<16x16x4xf32>,
    %c0_38 = arith.constant 0 : index
    %c0_39 = arith.constant 0 : index
    %c0_40 = arith.constant 0 : index
    %36 = vector.load %arg8[%c0_38, %c0_39, %c0_40] : memref<19x32x4xf32, #tpu.memory_space<vmem>>, vector<19x32x4xf32>
    %37 = vector.shape_cast %36 : vector<19x32x4xf32> to vector<608x4xf32>
    %38 = vector.extract_strided_slice %37 {offsets = [0, 0], sizes = [528, 4], strides = [1, 1]} : vector<608x4xf32> to vector<528x4xf32>
    %39 = vector.extract_strided_slice %37 {offsets = [32, 0], sizes = [528, 4], strides = [1, 1]} : vector<608x4xf32> to vector<528x4xf32>
    %40 = vector.extract_strided_slice %37 {offsets = [64, 0], sizes = [528, 4], strides = [1, 1]} : vector<608x4xf32> to vector<528x4xf32>
    %41 = tpu.concatenate %38, %39, %40 in 1 : vector<528x4xf32>, vector<528x4xf32>, vector<528x4xf32> -> vector<528x12xf32>
    %c0_41 = arith.constant 0 : index
    %c0_42 = arith.constant 0 : index
    %42 = vector.load %arg4[%c0_41, %c0_42] : memref<12x12xf32, #tpu.memory_space<vmem>>, vector<12x12xf32>
    %cst_43 = arith.constant dense<0.000000e+00> : vector<528x12xf32>
    %43 = tpu.matmul %41, %42, %cst_43 {dimension_numbers = #tpu.dot_dimension_numbers<[1], [0], [0], [1], [0, 0, 1, 1], [], []>} : vector<528x12xf32>, vector<12x12xf32>, vector<528x12xf32> -> vector<528x12xf32>
    %44 = vector.extract_strided_slice %43 {offsets = [7, 0], sizes = [512, 4], strides = [1, 1]} : vector<528x12xf32> to vector<512x4xf32>
    %45 = vector.extract_strided_slice %43 {offsets = [8, 4], sizes = [512, 4], strides = [1, 1]} : vector<528x12xf32> to vector<512x4xf32>
    %46 = arith.addf %44, %45 : vector<512x4xf32>
    %47 = vector.extract_strided_slice %43 {offsets = [9, 8], sizes = [512, 4], strides = [1, 1]} : vector<528x12xf32> to vector<512x4xf32>
    %48 = arith.addf %46, %47 : vector<512x4xf32>
    %49 = vector.shape_cast %48 : vector<512x4xf32> to vector<16x32x4xf32>
    %50 = vector.extract_strided_slice %49 {offsets = [0, 0, 0], sizes = [16, 16, 4], strides = [1, 1, 1]} : vector<16x32x4xf32> to vector<16x16x4xf32>
    %c0_44 = arith.constant 0 : index
    %c0_45 = arith.constant 0 : index
    %51 = vector.load %arg5[%c0_44, %c0_45] : memref<1x4xf32, #tpu.memory_space<vmem>>, vector<1x4xf32>
    %52 = vector.shape_cast %51 : vector<1x4xf32> to vector<4xf32>
    %53 = vector.shape_cast %52 : vector<4xf32> to vector<1x1x4xf32>
    %54 = vector.broadcast %53 : vector<1x1x4xf32> to vector<16x16x4xf32>
    %55 = arith.addf %50, %54 : vector<16x16x4xf32>
    %c0_46 = arith.constant 0 : index
    %c0_47 = arith.constant 0 : index
    %c0_48 = arith.constant 0 : index
    %c0_49 = arith.constant 0 : index
    %56 = vector.load %arg1[%c0_46, %c0_47, %c0_48, %c0_49] : memref<1x16x16x4xf32, #tpu.memory_space<vmem>>, vector<1x16x16x4xf32>
    %57 = vector.shape_cast %56 : vector<1x16x16x4xf32> to vector<16x16x4xf32>
    %58 = arith.addf %55, %57 : vector<16x16x4xf32>
    %59 = vector.shape_cast %58 : vector<16x16x4xf32> to vector<1x16x16x4xf32>
    %c0_50 = arith.constant 0 : index
    %c0_51 = arith.constant 0 : index
    %c0_52 = arith.constant 0 : index
    %c0_53 = arith.constant 0 : index
    %60 = vector.load %arg6[%c0_50, %c0_51, %c0_52, %c0_53] : memref<1x16x16x4xf32, #tpu.memory_space<vmem>>, vector<1x16x16x4xf32>
    tpu.vector_store %arg6[%c0_50, %c0_51, %c0_52, %c0_53], %59 {strides = array<i32>} : memref<1x16x16x4xf32, #tpu.memory_space<vmem>>, vector<1x16x16x4xf32>,
    return
  }
  func.func @transform_0(%arg0: i32) -> (i32, i32, i32, i32) {
    %c0_i32 = arith.constant 0 : i32
    %c0_i32_0 = arith.constant 0 : i32
    %c0_i32_1 = arith.constant 0 : i32
    %c0_i32_2 = arith.constant 0 : i32
    return %arg0, %c0_i32, %c0_i32_0, %c0_i32_1 : i32, i32, i32, i32
  }
  func.func @transform_1(%arg0: i32) -> (i32, i32) {
    %c0_i32 = arith.constant 0 : i32
    %c0_i32_0 = arith.constant 0 : i32
    %c0_i32_1 = arith.constant 0 : i32
    return %c0_i32, %c0_i32_0 : i32, i32
  }
  func.func @transform_2(%arg0: i32) -> (i32, i32) {
    %c0_i32 = arith.constant 0 : i32
    %c0_i32_0 = arith.constant 0 : i32
    %c0_i32_1 = arith.constant 0 : i32
    return %c0_i32, %c0_i32_0 : i32, i32
  }
  func.func @transform_3(%arg0: i32) -> (i32, i32) {
    %c0_i32 = arith.constant 0 : i32
    %c0_i32_0 = arith.constant 0 : i32
    %c0_i32_1 = arith.constant 0 : i32
    return %c0_i32, %c0_i32_0 : i32, i32
  }
  func.func @transform_4(%arg0: i32) -> (i32, i32) {
    %c0_i32 = arith.constant 0 : i32
    %c0_i32_0 = arith.constant 0 : i32
    %c0_i32_1 = arith.constant 0 : i32
    return %c0_i32, %c0_i32_0 : i32, i32
  }
  func.func @transform_5(%arg0: i32) -> (i32, i32, i32, i32) {
    %c0_i32 = arith.constant 0 : i32
    %c0_i32_0 = arith.constant 0 : i32
    %c0_i32_1 = arith.constant 0 : i32
    %c0_i32_2 = arith.constant 0 : i32
    return %arg0, %c0_i32, %c0_i32_0, %c0_i32_1 : i32, i32, i32, i32
  }
}

</mosaic_0001>

<bundles_post_ra>
// kernel: tpu_custom_call.1
= control target key start
LH: loop header
LB: loop body
LE: loop exit
PB: predicated region body
PF: predicated region fallthrough
CT: control target
= control target key end

     0   :  { %s5413_s18 = smov 0   ;;  %s8305_s0 = inlined_call_operand.vmem [shape: f32[2,16,16,4], index: 0, kind: input, shape index: {}]   ;;  %s8306_s1 = inlined_call_operand.vmem [shape: f32[12,12], index: 1, kind: input, shape index: {}]   ;;  %s8307_s2 = inlined_call_operand.vmem [shape: f32[1,4], index: 2, kind: input, shape index: {}]   ;;  %s8308_s3 = inlined_call_operand.vmem [shape: f32[12,12], index: 3, kind: input, shape index: {}]   ;;  %s8309_s4 = inlined_call_operand.vmem [shape: f32[1,4], index: 4, kind: input, shape index: {}]   ;;  %s8310_s5 = inlined_call_operand.vmem [shape: f32[2,16,16,4], index: 5, kind: output, shape index: {}]  }
   0x1 LB: > { %s4864_s19 = sadd.s32 4294967295, %s5376_s18   ;;  %p4868_p0 = scmp.ge.s32.totalorder %s5376_s18, 1  ;;  %s5376_s18 = sphi %s5413_s18, %s15_s18  }
   0x2   : > { %p187_p1 = scmp.lt.s32.totalorder %s5376_s18, 3 }
   0x4   : > { %p188_p2 = pnand %p4868_p0, %p187_p1 }
   0x6   : > { %191 = sbr.rel (%p188_p2) target bundleno = 1374 (0x55e), region = 40 }
   0xb   : > { %vm236_vm0 = vcmask 24576   ;;  %p5423_p3 = scmp.lt.s32.totalorder %s4864_s19, 1  ;;  %vm225_vm1 = vcmask 31744   ;;  %v5378_v0 = vmov 0.0   ;;  %s5379_s25 = smov 4   ;;  %vm1249_vm2 = vcmask 1043456  }
   0xc   : > { %253 = vst.msk [vmem:[#allocation2 + $0x38] sm:$0x1] %vm236_vm0, %v5378_v0  ;;  %237 = vst.msk [vmem:[#allocation2 + $0x27] sm:$0x1] %vm236_vm0, %v5378_v0  ;;  %s5380_s30 = smov 8   ;;  %vm981_vm3 = vcmask 64512  }
   0xd   : > { %238 = vst.msk [vmem:[#allocation2 + $0x47] sm:$0x1] %vm236_vm0, %v5378_v0  ;;  %239 = vst.msk [vmem:[#allocation2 + $0x67] sm:$0x1] %vm236_vm0, %v5378_v0  ;;  %s8499_s19 = smov (!%p5423_p3, %s4864_s19), 1  ;;  %vm1050_vm4 = vcmask 97280  }
   0xe   : > { %240 = vst.msk [vmem:[#allocation2 + $0x87] sm:$0x1] %vm236_vm0, %v5378_v0  ;;  %241 = vst.msk [vmem:[#allocation2 + $0xa7] sm:$0x1] %vm236_vm0, %v5378_v0  ;;  %s5011_s21 = sshll.u32 %s8499_s19, 8  ;;  %s5381_s6 = smov 124  }
   0xf   : > { %242 = vst.msk [vmem:[#allocation2 + $0xc7] sm:$0x1] %vm236_vm0, %v5378_v0  ;;  %243 = vst.msk [vmem:[#allocation2 + $0xe7] sm:$0x1] %vm236_vm0, %v5378_v0  ;;  %s5599_s24 = scalar_lea.vmem %s8305_s0, %s5011_s21  ;;  %vm1709_vm5 = vcmask 1046528   ;;  %s5382_s7 = smov 120  }
  0x10   : > { %244 = vst.msk [vmem:[#allocation2 + $0x107] sm:$0x1] %vm236_vm0, %v5378_v0  ;;  %245 = vst.msk [vmem:[#allocation2 + $0x127] sm:$0x1] %vm236_vm0, %v5378_v0  ;;  %v312_v1 = vld [vmem:[%s5599_s24 + $0x8] sm:$0xff]  ;;  %v311_v2 = vld [vmem:[%s5599_s24] sm:$0xff]  ;;  %s7931_s23 = scalar_lea.vmem %s8310_s5, %s5011_s21 }
  0x11   : > { %246 = vst.msk [vmem:[#allocation2 + $0x147] sm:$0x1] %vm236_vm0, %v5378_v0  ;;  %247 = vst.msk [vmem:[#allocation2 + $0x167] sm:$0x1] %vm236_vm0, %v5378_v0  ;;  %v313_v3 = vld [vmem:[%s5599_s24 + $0x10] sm:$0xff]  ;;  %v314_v4 = vld [vmem:[%s5599_s24 + $0x18] sm:$0xff] }
  0x12   : > { %248 = vst.msk [vmem:[#allocation2 + $0x187] sm:$0x1] %vm236_vm0, %v5378_v0  ;;  %249 = vst.msk [vmem:[#allocation2 + $0x1a7] sm:$0x1] %vm236_vm0, %v5378_v0  ;;  %v315_v5 = vld [vmem:[%s5599_s24 + $0x20] sm:$0xff]  ;;  %v316_v6 = vld [vmem:[%s5599_s24 + $0x28] sm:$0xff] }
  0x13   : > { %250 = vst.msk [vmem:[#allocation2 + $0x1c7] sm:$0x1] %vm236_vm0, %v5378_v0  ;;  %251 = vst.msk [vmem:[#allocation2 + $0x1e7] sm:$0x1] %vm236_vm0, %v5378_v0  ;;  %v5610_v7 = vld [vmem:[#allocation2 + $0x38] sm:$0xff]  ;;  %v5612_v8 = vld [vmem:[#allocation2 + $0x20] sm:$0xff] }
  0x14   : > { %252 = vst.msk [vmem:[#allocation2 + $0x207] sm:$0x1] %vm236_vm0, %v5378_v0  ;;  %254 = vst.msk [vmem:[#allocation2 + $0x58] sm:$0x1] %vm236_vm0, %v5378_v0  ;;  %521 = vrot.lane.b32.xlu1 %v5610_v7, %s5379_s25  ;;  %515 = vrot.lane.b32.xlu0 %v5612_v8, %s5379_s25  ;;  %v5623_v10 = vld [vmem:[#allocation2 + $0x40] sm:$0xff]  ;;  %v317_v11 = vld [vmem:[%s5599_s24 + $0x30] sm:$0xff] }
  0x15   : > { %255 = vst.msk [vmem:[#allocation2 + $0x78] sm:$0x1] %vm236_vm0, %v5378_v0  ;;  %256 = vst.msk [vmem:[#allocation2 + $0x98] sm:$0x1] %vm236_vm0, %v5378_v0  ;;  %v318_v12 = vld [vmem:[%s5599_s24 + $0x38] sm:$0xff]  ;;  %v319_v13 = vld [vmem:[%s5599_s24 + $0x40] sm:$0xff] }
  0x16   : > { %257 = vst.msk [vmem:[#allocation2 + $0xb8] sm:$0x1] %vm236_vm0, %v5378_v0  ;;  %258 = vst.msk [vmem:[#allocation2 + $0xd8] sm:$0x1] %vm236_vm0, %v5378_v0  ;;  %v320_v14 = vld [vmem:[%s5599_s24 + $0x48] sm:$0xff]  ;;  %v321_v15 = vld [vmem:[%s5599_s24 + $0x50] sm:$0xff] }
  0x17   : > { %259 = vst.msk [vmem:[#allocation2 + $0xf8] sm:$0x1] %vm236_vm0, %v5378_v0  ;;  %260 = vst.msk [vmem:[#allocation2 + $0x118] sm:$0x1] %vm236_vm0, %v5378_v0  ;;  %v322_v16 = vld [vmem:[%s5599_s24 + $0x58] sm:$0xff]  ;;  %v323_v19 = vld [vmem:[%s5599_s24 + $0x60] sm:$0xff] }
  0x18   : > { %261 = vst.msk [vmem:[#allocation2 + $0x138] sm:$0x1] %vm236_vm0, %v5378_v0  ;;  %262 = vst.msk [vmem:[#allocation2 + $0x158] sm:$0x1] %vm236_vm0, %v5378_v0  ;;  %523 = vrot.lane.b32.xlu0 %v5623_v10, %s5379_s25  ;;  %v324_v20 = vld [vmem:[%s5599_s24 + $0x68] sm:$0xff]  ;;  %v325_v21 = vld [vmem:[%s5599_s24 + $0x70] sm:$0xff] }
  0x19   : > { %263 = vst.msk [vmem:[#allocation2 + $0x178] sm:$0x1] %vm236_vm0, %v5378_v0  ;;  %264 = vst.msk [vmem:[#allocation2 + $0x198] sm:$0x1] %vm236_vm0, %v5378_v0  ;;  %v326_v24 = vld [vmem:[%s5599_s24 + $0x78] sm:$0xff]  ;;  %v327_v25 = vld [vmem:[%s5599_s24 + $0x80] sm:$0xff] }
  0x1a   : > { %265 = vst.msk [vmem:[#allocation2 + $0x1b8] sm:$0x1] %vm236_vm0, %v5378_v0  ;;  %266 = vst.msk [vmem:[#allocation2 + $0x1d8] sm:$0x1] %vm236_vm0, %v5378_v0  ;;  %v328_v26 = vld [vmem:[%s5599_s24 + $0x88] sm:$0xff]  ;;  %v5670_v28 = vld [vmem:[#allocation2 + $0x60] sm:$0xff] }
  0x1b   : > { %267 = vst.msk [vmem:[#allocation2 + $0x1f8] sm:$0x1] %vm236_vm0, %v5378_v0  ;;  %268 = vst.msk [vmem:[#allocation2 + $0x218] sm:$0x1] %vm236_vm0, %v5378_v0  ;;  %v5621_v9 = vld [vmem:[#allocation2 + $0x58] sm:$0xff]  ;;  %v329_v29 = vld [vmem:[%s5599_s24 + $0x90] sm:$0xff] }
  0x1c   : > { %279 = vst.msk [vmem:[#allocation3 + $0x27] sm:$0x1] %vm236_vm0, %v5378_v0  ;;  %280 = vst.msk [vmem:[#allocation3 + $0x47] sm:$0x1] %vm236_vm0, %v5378_v0  ;;  %529 = vrot.lane.b32.xlu1 %v5621_v9, %s5379_s25  ;;  %v330_v30 = vld [vmem:[%s5599_s24 + $0x98] sm:$0xff]  ;;  %v331_v31 = vld [vmem:[%s5599_s24 + $0xa0] sm:$0xff] }
  0x1d   : > { %281 = vst.msk [vmem:[#allocation3 + $0x67] sm:$0x1] %vm236_vm0, %v5378_v0  ;;  %282 = vst.msk [vmem:[#allocation3 + $0x87] sm:$0x1] %vm236_vm0, %v5378_v0  ;;  %v332_v32 = vld [vmem:[%s5599_s24 + $0xa8] sm:$0xff]  ;;  %v333_v33 = vld [vmem:[%s5599_s24 + $0xb0] sm:$0xff] }
  0x1e   : > { %283 = vst.msk [vmem:[#allocation3 + $0xa7] sm:$0x1] %vm236_vm0, %v5378_v0  ;;  %284 = vst.msk [vmem:[#allocation3 + $0xc7] sm:$0x1] %vm236_vm0, %v5378_v0  ;;  %v5686_v34 = vld [vmem:[#allocation2 + $0x78] sm:$0xff]  ;;  %v335_v37 = vld [vmem:[%s5599_s24 + $0xc0] sm:$0xff] }
  0x1f   : > { %285 = vst.msk [vmem:[#allocation3 + $0xe7] sm:$0x1] %vm236_vm0, %v5378_v0  ;;  %286 = vst.msk [vmem:[#allocation3 + $0x107] sm:$0x1] %vm236_vm0, %v5378_v0  ;;  %v334_v36 = vld [vmem:[%s5599_s24 + $0xb8] sm:$0xff]  ;;  %v336_v38 = vld [vmem:[%s5599_s24 + $0xc8] sm:$0xff] }
  0x20   : > { %287 = vst.msk [vmem:[#allocation3 + $0x127] sm:$0x1] %vm236_vm0, %v5378_v0  ;;  %288 = vst.msk [vmem:[#allocation3 + $0x147] sm:$0x1] %vm236_vm0, %v5378_v0  ;;  %v337_v39 = vld [vmem:[%s5599_s24 + $0xd0] sm:$0xff]  ;;  %v5704_v41 = vld [vmem:[#allocation2 + $0x80] sm:$0xff] }
  0x21   : > { %289 = vst.msk [vmem:[#allocation3 + $0x167] sm:$0x1] %vm236_vm0, %v5378_v0  ;;  %290 = vst.msk [vmem:[#allocation3 + $0x187] sm:$0x1] %vm236_vm0, %v5378_v0  ;;  %v338_v42 = vld [vmem:[%s5599_s24 + $0xd8] sm:$0xff]  ;;  %v339_v43 = vld [vmem:[%s5599_s24 + $0xe0] sm:$0xff] }
  0x22   : > { %291 = vst.msk [vmem:[#allocation3 + $0x1a7] sm:$0x1] %vm236_vm0, %v5378_v0  ;;  %292 = vst.msk [vmem:[#allocation3 + $0x1c7] sm:$0x1] %vm236_vm0, %v5378_v0  ;;  %v5715_v44 = vld [vmem:[#allocation2 + $0x98] sm:$0xff]  ;;  %v5725_v47 = vld [vmem:[#allocation2 + $0xa0] sm:$0xff] }
  0x23   : > { %293 = vst.msk [vmem:[#allocation3 + $0x1e7] sm:$0x1] %vm236_vm0, %v5378_v0  ;;  %294 = vst.msk [vmem:[#allocation3 + $0x207] sm:$0x1] %vm236_vm0, %v5378_v0  ;;  %v5731_v48 = vld [vmem:[#allocation2 + $0xb8] sm:$0xff]  ;;  %v5741_v51 = vld [vmem:[#allocation2 + $0xc0] sm:$0xff] }
  0x24   : > { %295 = vst.msk [vmem:[#allocation3 + $0x38] sm:$0x1] %vm236_vm0, %v5378_v0  ;;  %296 = vst.msk [vmem:[#allocation3 + $0x58] sm:$0x1] %vm236_vm0, %v5378_v0  ;;  %v5747_v52 = vld [vmem:[#allocation2 + $0xd8] sm:$0xff]  ;;  %v5757_v55 = vld [vmem:[#allocation2 + $0xe0] sm:$0xff] }
  0x25   : > { %297 = vst.msk [vmem:[#allocation3 + $0x78] sm:$0x1] %vm236_vm0, %v5378_v0  ;;  %298 = vst.msk [vmem:[#allocation3 + $0x98] sm:$0x1] %vm236_vm0, %v5378_v0  ;;  %v5763_v56 = vld [vmem:[#allocation2 + $0xf8] sm:$0xff]  ;;  %v5773_v59 = vld [vmem:[#allocation2 + $0x100] sm:$0xff] }
  0x26   : > { %299 = vst.msk [vmem:[#allocation3 + $0xb8] sm:$0x1] %vm236_vm0, %v5378_v0  ;;  %300 = vst.msk [vmem:[#allocation3 + $0xd8] sm:$0x1] %vm236_vm0, %v5378_v0  ;;  %v5779_v60 = vld [vmem:[#allocation2 + $0x118] sm:$0xff]  ;;  %v5789_v63 = vld [vmem:[#allocation2 + $0x120] sm:$0xff] }
  0x27   : > { %301 = vst.msk [vmem:[#allocation3 + $0xf8] sm:$0x1] %vm236_vm0, %v5378_v0  ;;  %302 = vst.msk [vmem:[#allocation3 + $0x118] sm:$0x1] %vm236_vm0, %v5378_v0  ;;  %vm2012_vm6 = vcmask 1045504   ;;  %vm2363_vm7 = vcmask 1040384  }
  0x28   : > { %303 = vst.msk [vmem:[#allocation3 + $0x138] sm:$0x1] %vm236_vm0, %v5378_v0  ;;  %304 = vst.msk [vmem:[#allocation3 + $0x158] sm:$0x1] %vm236_vm0, %v5378_v0 }
  0x29   : > { %305 = vst.msk [vmem:[#allocation3 + $0x178] sm:$0x1] %vm236_vm0, %v5378_v0  ;;  %306 = vst.msk [vmem:[#allocation3 + $0x198] sm:$0x1] %vm236_vm0, %v5378_v0 }
  0x2a   : > { %307 = vst.msk [vmem:[#allocation3 + $0x1b8] sm:$0x1] %vm236_vm0, %v5378_v0  ;;  %308 = vst.msk [vmem:[#allocation3 + $0x1d8] sm:$0x1] %vm236_vm0, %v5378_v0 }
  0x2b   : > { %309 = vst.msk [vmem:[#allocation3 + $0x1f8] sm:$0x1] %vm236_vm0, %v5378_v0  ;;  %310 = vst.msk [vmem:[#allocation3 + $0x218] sm:$0x1] %vm236_vm0, %v5378_v0 }
  0x2c   : > { %226 = vst.msk [vmem:[#allocation2] sm:$0xff] %vm225_vm1, %v5378_v0  ;;  %227 = vst.msk [vmem:[#allocation2 + $0x8] sm:$0xff] %vm225_vm1, %v5378_v0 }
  0x2d   : > { %228 = vst.msk [vmem:[#allocation2 + $0x10] sm:$0xff] %vm225_vm1, %v5378_v0  ;;  %229 = vst.msk [vmem:[#allocation2 + $0x18] sm:$0xff] %vm225_vm1, %v5378_v0 }
  0x2e   : > { %231 = vst.msk [vmem:[#allocation2 + $0x220] sm:$0xff] %vm225_vm1, %v5378_v0  ;;  %232 = vst.msk [vmem:[#allocation2 + $0x228] sm:$0xff] %vm225_vm1, %v5378_v0 }
  0x2f   : > { %233 = vst.msk [vmem:[#allocation2 + $0x230] sm:$0xff] %vm225_vm1, %v5378_v0  ;;  %234 = vst.msk [vmem:[#allocation2 + $0x238] sm:$0xff] %vm225_vm1, %v5378_v0 }
  0x30   : > { %269 = vst.msk [vmem:[#allocation3] sm:$0xff] %vm225_vm1, %v5378_v0  ;;  %270 = vst.msk [vmem:[#allocation3 + $0x8] sm:$0xff] %vm225_vm1, %v5378_v0 }
  0x31   : > { %271 = vst.msk [vmem:[#allocation3 + $0x10] sm:$0xff] %vm225_vm1, %v5378_v0  ;;  %272 = vst.msk [vmem:[#allocation3 + $0x18] sm:$0xff] %vm225_vm1, %v5378_v0 }
  0x32   : > { %274 = vst.msk [vmem:[#allocation3 + $0x220] sm:$0xff] %vm225_vm1, %v5378_v0  ;;  %275 = vst.msk [vmem:[#allocation3 + $0x228] sm:$0xff] %vm225_vm1, %v5378_v0 }
  0x33   : > { %276 = vst.msk [vmem:[#allocation3 + $0x230] sm:$0xff] %vm225_vm1, %v5378_v0  ;;  %277 = vst.msk [vmem:[#allocation3 + $0x238] sm:$0xff] %vm225_vm1, %v5378_v0  ;;  %v5795_v0 = vld [vmem:[#allocation2 + $0x138] sm:$0xff] }
  0x34   : > { %344 = vst.msk [vmem:[#allocation2 + $0x30] sm:$0xff] %vm225_vm1, %v312_v1  ;;  %343 = vst.msk [vmem:[#allocation2 + $0x28] sm:$0xff] %vm225_vm1, %v311_v2 }
  0x35   : > { %345 = vst.msk [vmem:[#allocation2 + $0x48] sm:$0xff] %vm225_vm1, %v313_v3  ;;  %346 = vst.msk [vmem:[#allocation2 + $0x50] sm:$0xff] %vm225_vm1, %v314_v4  ;;  %v5805_v3 = vld [vmem:[#allocation2 + $0x140] sm:$0xff]  ;;  %v5811_v4 = vld [vmem:[#allocation2 + $0x158] sm:$0xff] }
  0x36   : > { %347 = vst.msk [vmem:[#allocation2 + $0x68] sm:$0xff] %vm225_vm1, %v315_v5  ;;  %348 = vst.msk [vmem:[#allocation2 + $0x70] sm:$0xff] %vm225_vm1, %v316_v6 }
  0x37   : > { %8366 = vst [vmem:[#allocation4_spill] sm:$0xff] %v5621_v9  ;;  %8367 = vst [vmem:[#allocation5_spill] sm:$0xff] %v5623_v10 }
  0x38   : > { %349 = vst.msk [vmem:[#allocation2 + $0x88] sm:$0xff] %vm225_vm1, %v317_v11  ;;  %350 = vst.msk [vmem:[#allocation2 + $0x90] sm:$0xff] %vm225_vm1, %v318_v12  ;;  %v5821_v11 = vld [vmem:[#allocation2 + $0x160] sm:$0xff]  ;;  %v5827_v12 = vld [vmem:[#allocation2 + $0x178] sm:$0xff] }
  0x39   : > { %351 = vst.msk [vmem:[#allocation2 + $0xa8] sm:$0xff] %vm225_vm1, %v319_v13  ;;  %352 = vst.msk [vmem:[#allocation2 + $0xb0] sm:$0xff] %vm225_vm1, %v320_v14 }
  0x3a   : > { %353 = vst.msk [vmem:[#allocation2 + $0xc8] sm:$0xff] %vm225_vm1, %v321_v15  ;;  %354 = vst.msk [vmem:[#allocation2 + $0xd0] sm:$0xff] %vm225_vm1, %v322_v16  ;;  %v5837_v15 = vld [vmem:[#allocation2 + $0x180] sm:$0xff]  ;;  %v340_v16 = vld [vmem:[%s5599_s24 + $0xe8] sm:$0xff] }
  0x3b   : > { %v5640_v17 = vld [vmem:[#allocation2 + $0x30] sm:$0xff]  ;;  %v5642_v18 = vld [vmem:[#allocation2 + $0x28] sm:$0xff]  ;;  %355 = vst.msk [vmem:[#allocation2 + $0xe8] sm:$0xff] %vm225_vm1, %v323_v19  ;;  %356 = vst.msk [vmem:[#allocation2 + $0xf0] sm:$0xff] %vm225_vm1, %v324_v20 }
  0x3c   : > { %519 = vrot.lane.b32.xlu1 %v5640_v17, %s5379_s25  ;;  %517 = vrot.lane.b32.xlu0 %v5642_v18, %s5379_s25  ;;  %v5653_v22 = vld [vmem:[#allocation2 + $0x48] sm:$0xff]  ;;  %v5655_v23 = vld [vmem:[#allocation2 + $0x50] sm:$0xff]  ;;  %357 = vst.msk [vmem:[#allocation2 + $0x108] sm:$0xff] %vm225_vm1, %v325_v21  ;;  %358 = vst.msk [vmem:[#allocation2 + $0x110] sm:$0xff] %vm225_vm1, %v326_v24 }
  0x3d   : > { %8368 = vst [vmem:[#allocation6_spill] sm:$0xff] %v5653_v22  ;;  %8369 = vst [vmem:[#allocation7_spill] sm:$0xff] %v5655_v23  ;;  %v5668_v27 = vld [vmem:[#allocation2 + $0x68] sm:$0xff]  ;;  %v5688_v35 = vld [vmem:[#allocation2 + $0x70] sm:$0xff] }
  0x3e   : > { %359 = vst.msk [vmem:[#allocation2 + $0x128] sm:$0xff] %vm225_vm1, %v327_v25  ;;  %8370 = vst [vmem:[#allocation8_spill] sm:$0xff] %v5668_v27  ;;  %v5845_v19 = vld [vmem:[#allocation2 + $0x198] sm:$0xff]  ;;  %v341_v21 = vld [vmem:[%s5599_s24 + $0xf0] sm:$0xff] }
  0x3f   : > { %8371 = vst [vmem:[#allocation9_spill] sm:$0xff] %v5670_v28  ;;  %360 = vst.msk [vmem:[#allocation2 + $0x130] sm:$0xff] %vm225_vm1, %v328_v26  ;;  %v5702_v40 = vld [vmem:[#allocation2 + $0x88] sm:$0xff]  ;;  %v5717_v45 = vld [vmem:[#allocation2 + $0x90] sm:$0xff] }
  0x40   : > { %525 = vrot.lane.b32.xlu1 %v5653_v22, %s5379_s25  ;;  %527 = vrot.lane.b32.xlu0 %v5655_v23, %s5379_s25  ;;  %361 = vst.msk [vmem:[#allocation2 + $0x148] sm:$0xff] %vm225_vm1, %v329_v29  ;;  %362 = vst.msk [vmem:[#allocation2 + $0x150] sm:$0xff] %vm225_vm1, %v330_v30  ;;  %v5723_v46 = vld [vmem:[#allocation2 + $0xa8] sm:$0xff]  ;;  %v5733_v49 = vld [vmem:[#allocation2 + $0xb0] sm:$0xff] }
  0x41   : > { %363 = vst.msk [vmem:[#allocation2 + $0x168] sm:$0xff] %vm225_vm1, %v331_v31  ;;  %364 = vst.msk [vmem:[#allocation2 + $0x170] sm:$0xff] %vm225_vm1, %v332_v32  ;;  %v5739_v50 = vld [vmem:[#allocation2 + $0xc8] sm:$0xff]  ;;  %v5749_v53 = vld [vmem:[#allocation2 + $0xd0] sm:$0xff] }
  0x42   : > { %8372 = vst [vmem:[#allocation10_spill] sm:$0xff] %v5686_v34  ;;  %8373 = vst [vmem:[#allocation11_spill] sm:$0xff] %v5688_v35  ;;  %v5755_v54 = vld [vmem:[#allocation2 + $0xe8] sm:$0xff]  ;;  %v5765_v57 = vld [vmem:[#allocation2 + $0xf0] sm:$0xff] }
  0x43   : > { %365 = vst.msk [vmem:[#allocation2 + $0x188] sm:$0xff] %vm225_vm1, %v333_v33  ;;  %366 = vst.msk [vmem:[#allocation2 + $0x190] sm:$0xff] %vm225_vm1, %v334_v36  ;;  %v5771_v58 = vld [vmem:[#allocation2 + $0x108] sm:$0xff]  ;;  %v5781_v61 = vld [vmem:[#allocation2 + $0x110] sm:$0xff] }
  0x44   : > { %533 = vrot.lane.b32.xlu1 %v5668_v27, %s5379_s25  ;;  %531 = vrot.lane.b32.xlu0 %v5670_v28, %s5379_s25  ;;  %367 = vst.msk [vmem:[#allocation2 + $0x1a8] sm:$0xff] %vm225_vm1, %v335_v37  ;;  %368 = vst.msk [vmem:[#allocation2 + $0x1b0] sm:$0xff] %vm225_vm1, %v336_v38  ;;  %v5857_v25 = vld [vmem:[#allocation2 + $0x1a0] sm:$0xff]  ;;  %v5863_v26 = vld [vmem:[#allocation2 + $0x1b8] sm:$0xff] }
  0x45   : > { %8374 = vst [vmem:[#allocation12_spill] sm:$0xff] %v5702_v40  ;;  %8375 = vst [vmem:[#allocation13_spill] sm:$0xff] %v5704_v41  ;;  %v5787_v62 = vld [vmem:[#allocation2 + $0x128] sm:$0xff]  ;;  %v342_v30 = vld [vmem:[%s5599_s24 + $0xf8] sm:$0xff] }
  0x46   : > { %369 = vst.msk [vmem:[#allocation2 + $0x1c8] sm:$0xff] %vm225_vm1, %v337_v39  ;;  %370 = vst.msk [vmem:[#allocation2 + $0x1d0] sm:$0xff] %vm225_vm1, %v338_v42  ;;  %v5797_v1 = vld [vmem:[#allocation2 + $0x130] sm:$0xff]  ;;  %v1049_v31 = vld [vmem:[%s8306_s1 + $0x8] sm:$0xf] }
  0x47   : > { %371 = vst.msk [vmem:[#allocation2 + $0x1e8] sm:$0xff] %vm225_vm1, %v339_v43  ;;  %8376 = vst [vmem:[#allocation14_spill] sm:$0xff] %v5715_v44  ;;  %v5803_v2 = vld [vmem:[#allocation2 + $0x148] sm:$0xff]  ;;  %v5813_v5 = vld [vmem:[#allocation2 + $0x150] sm:$0xff]  ;;  %5149 = vmatprep.subr.msk.mxu0 %vm1249_vm2, %v1049_v31 }
  0x48   : > { %537 = vrot.lane.b32.xlu1 %v5686_v34, %s5379_s25  ;;  %535 = vrot.lane.b32.xlu0 %v5688_v35, %s5379_s25  ;;  %8377 = vst [vmem:[#allocation15_spill] sm:$0xff] %v5717_v45  ;;  %8378 = vst [vmem:[#allocation16_spill] sm:$0xff] %v5723_v46  ;;  %v5819_v6 = vld [vmem:[#allocation2 + $0x168] sm:$0xff]  ;;  %v5829_v13 = vld [vmem:[#allocation2 + $0x170] sm:$0xff] }
  0x49   : > { %8379 = vst [vmem:[#allocation17_spill] sm:$0xff] %v5725_v47  ;;  %8380 = vst [vmem:[#allocation18_spill] sm:$0xff] %v5731_v48  ;;  %v5878_v33 = vld [vmem:[#allocation2 + $0x1c0] sm:$0xff]  ;;  %5150 = vmatpush3.msk.msra.mxu0 %vm1249_vm2, %v1049_v31  ;;  %v5889_v37 = vld [vmem:[#allocation2 + $0x1d8] sm:$0xff] }
  0x4a   : > { %8381 = vst [vmem:[#allocation19_spill] sm:$0xff] %v5733_v49  ;;  %8382 = vst [vmem:[#allocation20_spill] sm:$0xff] %v5739_v50  ;;  %v5835_v14 = vld [vmem:[#allocation2 + $0x188] sm:$0xff]  ;;  %v5847_v20 = vld [vmem:[#allocation2 + $0x190] sm:$0xff] }
  0x4b   : > { %8383 = vst [vmem:[#allocation21_spill] sm:$0xff] %v5741_v51  ;;  %8384 = vst [vmem:[#allocation22_spill] sm:$0xff] %v5747_v52  ;;  %v5855_v24 = vld [vmem:[#allocation2 + $0x1a8] sm:$0xff]  ;;  %v5865_v29 = vld [vmem:[#allocation2 + $0x1b0] sm:$0xff] }
  0x4c   : > { %541 = vrot.lane.b32.xlu1 %v5702_v40, %s5379_s25  ;;  %539 = vrot.lane.b32.xlu0 %v5704_v41, %s5379_s25  ;;  %8385 = vst [vmem:[#allocation23_spill] sm:$0xff] %v5749_v53  ;;  %8386 = vst [vmem:[#allocation24_spill] sm:$0xff] %v5755_v54  ;;  %v1048_v36 = vld [vmem:[%s8306_s1] sm:$0xff] }
  0x4d   : > { %8387 = vst [vmem:[#allocation25_spill] sm:$0xff] %v5757_v55  ;;  %8388 = vst [vmem:[#allocation26_spill] sm:$0xff] %v5763_v56  ;;  %v5876_v32 = vld [vmem:[#allocation2 + $0x1c8] sm:$0xff]  ;;  %5151 = vmatprep.subr.mxu0 %v1048_v36  ;;  %v5891_v38 = vld [vmem:[#allocation2 + $0x1d0] sm:$0xff] }
  0x4e   : > { %8389 = vst [vmem:[#allocation27_spill] sm:$0xff] %v5765_v57  ;;  %8390 = vst [vmem:[#allocation28_spill] sm:$0xff] %v5771_v58  ;;  %5152 = vmatpush3.msra.mxu0 %v1048_v36  ;;  %v5897_v39 = vld [vmem:[#allocation2 + $0x1e8] sm:$0xff]  ;;  %v5899_v42 = vld [vmem:[#allocation2 + $0x1e0] sm:$0xff] }
  0x4f   : > { %8391 = vst [vmem:[#allocation29_spill] sm:$0xff] %v5773_v59  ;;  %8392 = vst [vmem:[#allocation30_spill] sm:$0xff] %v5779_v60 }
  0x50   : > { %545 = vrot.lane.b32.xlu1 %v5715_v44, %s5379_s25  ;;  %543 = vrot.lane.b32.xlu0 %v5717_v45, %s5379_s25  ;;  %8393 = vst [vmem:[#allocation31_spill] sm:$0xff] %v5781_v61  ;;  %8394 = vst [vmem:[#allocation32_spill] sm:$0xff] %v5787_v62 }
  0x51   : > { %8395 = vst [vmem:[#allocation33_spill] sm:$0xff] %v5789_v63  ;;  %8396 = vst [vmem:[#allocation34_spill] sm:$0xff] %v5795_v0 }
  0x52   : > { %8397 = vst [vmem:[#allocation35_spill] sm:$0xff] %v5797_v1  ;;  %8398 = vst [vmem:[#allocation36_spill] sm:$0xff] %v5803_v2 }
  0x53   : > { %8399 = vst [vmem:[#allocation37_spill] sm:$0xff] %v5805_v3  ;;  %8400 = vst [vmem:[#allocation38_spill] sm:$0xff] %v5811_v4 }
  0x54   : > { %549 = vrot.lane.b32.xlu1 %v5723_v46, %s5379_s25  ;;  %547 = vrot.lane.b32.xlu0 %v5725_v47, %s5379_s25  ;;  %8401 = vst [vmem:[#allocation39_spill] sm:$0xff] %v5813_v5  ;;  %8402 = vst [vmem:[#allocation40_spill] sm:$0xff] %v5819_v6 }
  0x55   : > { %8403 = vst [vmem:[#allocation41_spill] sm:$0xff] %v5821_v11  ;;  %8404 = vst [vmem:[#allocation42_spill] sm:$0xff] %v5827_v12 }
  0x56   : > { %8405 = vst [vmem:[#allocation43_spill] sm:$0xff] %v5829_v13  ;;  %8406 = vst [vmem:[#allocation44_spill] sm:$0xff] %v5835_v14 }
  0x57   : > { %8407 = vst [vmem:[#allocation45_spill] sm:$0xff] %v5837_v15  ;;  %372 = vst.msk [vmem:[#allocation2 + $0x1f0] sm:$0xff] %vm225_vm1, %v340_v16 }
  0x58   : > { %553 = vrot.lane.b32.xlu1 %v5731_v48, %s5379_s25  ;;  %551 = vrot.lane.b32.xlu0 %v5733_v49, %s5379_s25  ;;  %8408 = vst [vmem:[#allocation46_spill] sm:$0xff] %v5845_v19  ;;  %8409 = vst [vmem:[#allocation47_spill] sm:$0xff] %v5847_v20 }
  0x59   : > { %373 = vst.msk [vmem:[#allocation2 + $0x208] sm:$0xff] %vm225_vm1, %v341_v21  ;;  %8410 = vst [vmem:[#allocation48_spill] sm:$0xff] %v5855_v24 }
  0x5a   : > { %8411 = vst [vmem:[#allocation49_spill] sm:$0xff] %v5857_v25  ;;  %8412 = vst [vmem:[#allocation50_spill] sm:$0xff] %v5863_v26 }
  0x5b   : > { %8413 = vst [vmem:[#allocation51_spill] sm:$0xff] %v5865_v29  ;;  %374 = vst.msk [vmem:[#allocation2 + $0x210] sm:$0xff] %vm225_vm1, %v342_v30 }
  0x5c   : > { %557 = vrot.lane.b32.xlu1 %v5739_v50, %s5379_s25  ;;  %555 = vrot.lane.b32.xlu0 %v5741_v51, %s5379_s25  ;;  %8414 = vst [vmem:[#allocation52_spill] sm:$0xff] %v5876_v32  ;;  %8415 = vst [vmem:[#allocation53_spill] sm:$0xff] %v5878_v33 }
  0x5d   : > { %8416 = vst [vmem:[#allocation54_spill] sm:$0xff] %v5889_v37  ;;  %8417 = vst [vmem:[#allocation55_spill] sm:$0xff] %v5891_v38 }
  0x5e   : > { %8418 = vst [vmem:[#allocation56_spill] sm:$0xff] %v5897_v39  ;;  %8419 = vst [vmem:[#allocation57_spill] sm:$0xff] %v5899_v42 }
  0x60   : > { %561 = vrot.lane.b32.xlu1 %v5747_v52, %s5379_s25  ;;  %559 = vrot.lane.b32.xlu0 %v5749_v53, %s5379_s25 }
  0x64   : > { %565 = vrot.lane.b32.xlu1 %v5755_v54, %s5379_s25  ;;  %563 = vrot.lane.b32.xlu0 %v5757_v55, %s5379_s25 }
  0x68   : > { %569 = vrot.lane.b32.xlu1 %v5763_v56, %s5379_s25  ;;  %567 = vrot.lane.b32.xlu0 %v5765_v57, %s5379_s25 }
  0x6c   : > { %573 = vrot.lane.b32.xlu1 %v5771_v58, %s5379_s25  ;;  %571 = vrot.lane.b32.xlu0 %v5773_v59, %s5379_s25 }
  0x70   : > { %577 = vrot.lane.b32.xlu1 %v5779_v60, %s5379_s25  ;;  %575 = vrot.lane.b32.xlu0 %v5781_v61, %s5379_s25 }
  0x74   : > { %581 = vrot.lane.b32.xlu1 %v5787_v62, %s5379_s25  ;;  %579 = vrot.lane.b32.xlu0 %v5789_v63, %s5379_s25 }
  0x78   : > { %585 = vrot.lane.b32.xlu1 %v5795_v0, %s5379_s25  ;;  %583 = vrot.lane.b32.xlu0 %v5797_v1, %s5379_s25 }
  0x7c   : > { %589 = vrot.lane.b32.xlu1 %v5803_v2, %s5379_s25  ;;  %587 = vrot.lane.b32.xlu0 %v5805_v3, %s5379_s25 }
  0x80   : > { %593 = vrot.lane.b32.xlu1 %v5811_v4, %s5379_s25  ;;  %591 = vrot.lane.b32.xlu0 %v5813_v5, %s5379_s25 }
  0x84   : > { %597 = vrot.lane.b32.xlu1 %v5819_v6, %s5379_s25  ;;  %595 = vrot.lane.b32.xlu0 %v5821_v11, %s5379_s25 }
  0x86   : > { %v5905_v43 = vpop.permute.xlu1 %521  ;;  %v5907_v16 = vpop.permute.xlu0 %515 }
  0x88   : > { %601 = vrot.lane.b32.xlu1 %v5827_v12, %s5379_s25  ;;  %599 = vrot.lane.b32.xlu0 %v5829_v13, %s5379_s25 }
  0x8a   : > { %v5915_v30 = vpop.permute.xlu0 %523 }
  0x8c   : > { %605 = vrot.lane.b32.xlu1 %v5835_v14, %s5379_s25  ;;  %603 = vrot.lane.b32.xlu0 %v5837_v15, %s5379_s25 }
  0x8e   : > { %v5913_v21 = vpop.permute.xlu1 %529 }
  0x90   : > { %609 = vrot.lane.b32.xlu1 %v5845_v19, %s5379_s25  ;;  %607 = vrot.lane.b32.xlu0 %v5847_v20, %s5379_s25 }
  0x94   : > { %613 = vrot.lane.b32.xlu1 %v5855_v24, %s5379_s25  ;;  %611 = vrot.lane.b32.xlu0 %v5857_v25, %s5379_s25 }
  0x98   : > { %617 = vrot.lane.b32.xlu1 %v5863_v26, %s5379_s25  ;;  %615 = vrot.lane.b32.xlu0 %v5865_v29, %s5379_s25 }
  0x9c   : > { %621 = vrot.lane.b32.xlu1 %v5876_v32, %s5379_s25  ;;  %619 = vrot.lane.b32.xlu0 %v5878_v33, %s5379_s25 }
  0xa0   : > { %625 = vrot.lane.b32.xlu1 %v5889_v37, %s5379_s25  ;;  %623 = vrot.lane.b32.xlu0 %v5891_v38, %s5379_s25 }
  0xa4   : > { %629 = vrot.lane.b32.xlu1 %v5897_v39, %s5379_s25  ;;  %627 = vrot.lane.b32.xlu0 %v5899_v42, %s5379_s25 }
  0xa8   : > { %719 = vrot.lane.b32.xlu1 %v5653_v22, %s5380_s30  ;;  %717 = vrot.lane.b32.xlu0 %v5623_v10, %s5380_s30 }
  0xac   : > { %723 = vrot.lane.b32.xlu1 %v5621_v9, %s5380_s30  ;;  %721 = vrot.lane.b32.xlu0 %v5655_v23, %s5380_s30 }
  0xae   : > { %v5921_v31 = vpop.permute.xlu1 %519  ;;  %v5923_v36 = vpop.permute.xlu0 %517 }
  0xb0   : > { %727 = vrot.lane.b32.xlu1 %v5668_v27, %s5380_s30  ;;  %725 = vrot.lane.b32.xlu0 %v5670_v28, %s5380_s30 }
  0xb2   : > { %v5929_v10 = vpop.permute.xlu1 %525  ;;  %v5931_v22 = vpop.permute.xlu0 %527 }
  0xb4   : > { %731 = vrot.lane.b32.xlu1 %v5686_v34, %s5380_s30  ;;  %729 = vrot.lane.b32.xlu0 %v5688_v35, %s5380_s30 }
  0xb6   : > { %v5937_v23 = vpop.permute.xlu1 %533  ;;  %v5939_v9 = vpop.permute.xlu0 %531 }
  0xb8   : > { %735 = vrot.lane.b32.xlu1 %v5702_v40, %s5380_s30  ;;  %733 = vrot.lane.b32.xlu0 %v5704_v41, %s5380_s30 }
  0xba   : > { %v5945_v28 = vpop.permute.xlu1 %537  ;;  %v5947_v27 = vpop.permute.xlu0 %535 }
  0xbc   : > { %739 = vrot.lane.b32.xlu1 %v5715_v44, %s5380_s30  ;;  %737 = vrot.lane.b32.xlu0 %v5717_v45, %s5380_s30 }
  0xbe   : > { %v5953_v35 = vpop.permute.xlu1 %541  ;;  %v5955_v34 = vpop.permute.xlu0 %539 }
  0xc0   : > { %743 = vrot.lane.b32.xlu1 %v5723_v46, %s5380_s30  ;;  %741 = vrot.lane.b32.xlu0 %v5725_v47, %s5380_s30 }
  0xc2   : > { %v5961_v41 = vpop.permute.xlu1 %545  ;;  %v5963_v40 = vpop.permute.xlu0 %543 }
  0xc4   : > { %747 = vrot.lane.b32.xlu1 %v5731_v48, %s5380_s30  ;;  %745 = vrot.lane.b32.xlu0 %v5733_v49, %s5380_s30 }
  0xc6   : > { %v5969_v45 = vpop.permute.xlu1 %549  ;;  %v5971_v44 = vpop.permute.xlu0 %547 }
  0xc8   : > { %751 = vrot.lane.b32.xlu1 %v5739_v50, %s5380_s30  ;;  %749 = vrot.lane.b32.xlu0 %v5741_v51, %s5380_s30 }
  0xca   : > { %v5977_v47 = vpop.permute.xlu1 %553  ;;  %v5979_v46 = vpop.permute.xlu0 %551 }
  0xcc   : > { %755 = vrot.lane.b32.xlu1 %v5747_v52, %s5380_s30  ;;  %753 = vrot.lane.b32.xlu0 %v5749_v53, %s5380_s30 }
  0xce   : > { %v5985_v49 = vpop.permute.xlu1 %557  ;;  %v5987_v48 = vpop.permute.xlu0 %555 }
  0xd0   : > { %759 = vrot.lane.b32.xlu1 %v5755_v54, %s5380_s30  ;;  %757 = vrot.lane.b32.xlu0 %v5757_v55, %s5380_s30 }
  0xd2   : > { %v5993_v51 = vpop.permute.xlu1 %561  ;;  %v5995_v50 = vpop.permute.xlu0 %559 }
  0xd4   : > { %763 = vrot.lane.b32.xlu1 %v5763_v56, %s5380_s30  ;;  %761 = vrot.lane.b32.xlu0 %v5765_v57, %s5380_s30 }
  0xd6   : > { %v6001_v53 = vpop.permute.xlu1 %565  ;;  %v6003_v52 = vpop.permute.xlu0 %563 }
  0xd8   : > { %767 = vrot.lane.b32.xlu1 %v5771_v58, %s5380_s30  ;;  %765 = vrot.lane.b32.xlu0 %v5773_v59, %s5380_s30 }
  0xda   : > { %v6009_v55 = vpop.permute.xlu1 %569  ;;  %v6011_v54 = vpop.permute.xlu0 %567 }
  0xdc   : > { %771 = vrot.lane.b32.xlu1 %v5779_v60, %s5380_s30  ;;  %769 = vrot.lane.b32.xlu0 %v5781_v61, %s5380_s30 }
  0xde   : > { %v6017_v57 = vpop.permute.xlu1 %573  ;;  %v6019_v56 = vpop.permute.xlu0 %571 }
  0xe0   : > { %775 = vrot.lane.b32.xlu1 %v5787_v62, %s5380_s30  ;;  %773 = vrot.lane.b32.xlu0 %v5789_v63, %s5380_s30 }
  0xe2   : > { %v6025_v59 = vpop.permute.xlu1 %577  ;;  %v6027_v58 = vpop.permute.xlu0 %575 }
  0xe4   : > { %779 = vrot.lane.b32.xlu1 %v5795_v0, %s5380_s30  ;;  %777 = vrot.lane.b32.xlu0 %v5797_v1, %s5380_s30 }
  0xe6   : > { %v6033_v61 = vpop.permute.xlu1 %581  ;;  %v6035_v60 = vpop.permute.xlu0 %579 }
  0xe8   : > { %783 = vrot.lane.b32.xlu1 %v5803_v2, %s5380_s30  ;;  %781 = vrot.lane.b32.xlu0 %v5805_v3, %s5380_s30 }
  0xea   : > { %v6041_v63 = vpop.permute.xlu1 %585  ;;  %v6043_v62 = vpop.permute.xlu0 %583 }
  0xec   : > { %787 = vrot.lane.b32.xlu1 %v5811_v4, %s5380_s30  ;;  %785 = vrot.lane.b32.xlu0 %v5813_v5, %s5380_s30 }
  0xee   : > { %v6049_v1 = vpop.permute.xlu1 %589  ;;  %v6051_v0 = vpop.permute.xlu0 %587 }
  0xf0   : > { %791 = vrot.lane.b32.xlu1 %v5819_v6, %s5380_s30  ;;  %789 = vrot.lane.b32.xlu0 %v5821_v11, %s5380_s30 }
  0xf2   : > { %v6057_v3 = vpop.permute.xlu1 %593  ;;  %v6059_v2 = vpop.permute.xlu0 %591 }
  0xf4   : > { %795 = vrot.lane.b32.xlu1 %v5827_v12, %s5380_s30  ;;  %793 = vrot.lane.b32.xlu0 %v5829_v13, %s5380_s30 }
  0xf6   : > { %v6065_v5 = vpop.permute.xlu1 %597  ;;  %v6067_v4 = vpop.permute.xlu0 %595 }
  0xf8   : > { %799 = vrot.lane.b32.xlu1 %v5835_v14, %s5380_s30  ;;  %797 = vrot.lane.b32.xlu0 %v5837_v15, %s5380_s30 }
  0xfa   : > { %v6073_v11 = vpop.permute.xlu1 %601  ;;  %v6075_v6 = vpop.permute.xlu0 %599 }
  0xfc   : > { %803 = vrot.lane.b32.xlu1 %v5845_v19, %s5380_s30  ;;  %801 = vrot.lane.b32.xlu0 %v5847_v20, %s5380_s30 }
  0xfe   : > { %v6081_v13 = vpop.permute.xlu1 %605  ;;  %v6083_v12 = vpop.permute.xlu0 %603 }
 0x100   : > { %807 = vrot.lane.b32.xlu1 %v5855_v24, %s5380_s30  ;;  %805 = vrot.lane.b32.xlu0 %v5857_v25, %s5380_s30 }
 0x102   : > { %v6089_v15 = vpop.permute.xlu1 %609  ;;  %v6091_v14 = vpop.permute.xlu0 %607 }
 0x103   : > { %8420 = vst [vmem:[#allocation58_spill] sm:$0xff] %v6089_v15  ;;  %8421 = vst [vmem:[#allocation59_spill] sm:$0xff] %v6091_v14 }
 0x104   : > { %811 = vrot.lane.b32.xlu1 %v5863_v26, %s5380_s30  ;;  %809 = vrot.lane.b32.xlu0 %v5865_v29, %s5380_s30 }
 0x106   : > { %v6097_v20 = vpop.permute.xlu1 %613  ;;  %v6099_v19 = vpop.permute.xlu0 %611 }
 0x107   : > { %8422 = vst [vmem:[#allocation60_spill] sm:$0xff] %v6097_v20  ;;  %8423 = vst [vmem:[#allocation61_spill] sm:$0xff] %v6099_v19  ;;  %v378_v20 = vld [vmem:[#allocation2 + $0x18] sm:$0xff] }
 0x108   : > { %815 = vrot.lane.b32.xlu1 %v5876_v32, %s5380_s30  ;;  %813 = vrot.lane.b32.xlu0 %v5878_v33, %s5380_s30  ;;  %v6121_v33 = vld [vmem:[#allocation2 + $0x1f8] sm:$0xff]  ;;  %v6123_v32 = vld [vmem:[#allocation2 + $0x1f0] sm:$0xff] }
 0x10a   : > { %v6105_v25 = vpop.permute.xlu1 %617  ;;  %v6107_v24 = vpop.permute.xlu0 %615 }
 0x10b   : > { %8424 = vst [vmem:[#allocation62_spill] sm:$0xff] %v6105_v25  ;;  %8425 = vst [vmem:[#allocation63_spill] sm:$0xff] %v6107_v24  ;;  %v376_v25 = vld [vmem:[#allocation2 + $0x8] sm:$0xff] }
 0x10c   : > { %819 = vrot.lane.b32.xlu1 %v5889_v37, %s5380_s30  ;;  %817 = vrot.lane.b32.xlu0 %v5891_v38, %s5380_s30  ;;  %v6133_v38 = vld [vmem:[#allocation2 + $0x208] sm:$0xff] }
 0x10e   : > { %v6113_v29 = vpop.permute.xlu1 %621  ;;  %v6115_v26 = vpop.permute.xlu0 %619 }
 0x10f   : > { %8426 = vst [vmem:[#allocation64_spill] sm:$0xff] %v6113_v29  ;;  %8427 = vst [vmem:[#allocation65_spill] sm:$0xff] %v6115_v26  ;;  %v375_v29 = vld [vmem:[#allocation2] sm:$0xff] }
 0x110   : > { %823 = vrot.lane.b32.xlu1 %v5897_v39, %s5380_s30  ;;  %821 = vrot.lane.b32.xlu0 %v5899_v42, %s5380_s30  ;;  %v6135_v39 = vld [vmem:[#allocation2 + $0x200] sm:$0xff] }
 0x112   : > { %v6125_v24 = vpop.permute.xlu1 %625  ;;  %v6127_v37 = vpop.permute.xlu0 %623 }
 0x113   : > { %8428 = vst [vmem:[#allocation66_spill] sm:$0xff] %v6125_v24  ;;  %8429 = vst [vmem:[#allocation67_spill] sm:$0xff] %v6127_v37  ;;  %v915_v37 = vsel %vm225_vm1, %v375_v29, %v5907_v16  ;;  %v916_v24 = vsel %vm225_vm1, %v376_v25, %v5923_v36  ;;  %v441_v29 = vld [vmem:[#allocation2 + $0x210] sm:$0xff]  ;;  %v918_v25 = vsel %vm225_vm1, %v378_v20, %v5905_v43 }
 0x114   : > { %827 = vrot.lane.b32.xlu1 %v6121_v33, %s5380_s30  ;;  %825 = vrot.lane.b32.xlu0 %v6123_v32, %s5380_s30 }
 0x116   : > { %v6137_v26 = vpop.permute.xlu1 %629  ;;  %v6139_v42 = vpop.permute.xlu0 %627 }
 0x117   : > { %8430 = vst [vmem:[#allocation68_spill] sm:$0xff] %v6137_v26  ;;  %8431 = vst [vmem:[#allocation69_spill] sm:$0xff] %v6139_v42  ;;  %v377_v42 = vld [vmem:[#allocation2 + $0x10] sm:$0xff] }
 0x118   : > { %831 = vrot.lane.b32.xlu1 %v6133_v38, %s5380_s30  ;;  %829 = vrot.lane.b32.xlu0 %v6135_v39, %s5380_s30  ;;  %v917_v16 = vsel %vm225_vm1, %v377_v42, %v5921_v31 }
 0x11a   : > { %v720_v19 = vpop.permute.xlu1 %719  ;;  %v718_v26 = vpop.permute.xlu0 %717 }
 0x11b   : > { %v983_v14 = vsel %vm981_vm3, %v916_v24, %v720_v19  ;;  %v982_v15 = vsel %vm981_vm3, %v915_v37, %v718_v26  ;;  %v442_v26 = vld [vmem:[#allocation2 + $0x218] sm:$0xff] }
 0x11c   : > { %631 = vrot.lane.b32.xlu0 %v6123_v32, %s5379_s25  ;;  %5153 = vmatprep.mubr.msk.f32.mxu0 %vm1050_vm4, %v982_v15  ;;  %v920_v15 = vsel %vm225_vm1, %v5642_v18, %v5929_v10  ;;  %v922_v10 = vsel %vm225_vm1, %v5610_v7, %v5913_v21  ;;  %v921_v18 = vsel %vm225_vm1, %v5640_v17, %v5931_v22  ;;  %v8432_v7 = vld [vmem:[#allocation6_spill] sm:$0xff]  ;;  %v8433_v17 = vld [vmem:[#allocation5_spill] sm:$0xff] }
 0x11d   : > { %633 = vrot.lane.b32.xlu1 %v6121_v33, %s5379_s25  ;;  %5154 = vmatmul.mubr.msk.f32.vlgmr.msra.gmra.mxu0 %vm1050_vm4, %v983_v14  ;;  %v919_v14 = vsel %vm225_vm1, %v5612_v8, %v5915_v30  ;;  %v443_v8 = vld [vmem:[#allocation2 + $0x220] sm:$0xff]  ;;  %v924_v21 = vsel %vm225_vm1, %v8432_v7, %v5937_v23  ;;  %v923_v22 = vsel %vm225_vm1, %v8433_v17, %v5939_v9  ;;  %v8435_v9 = vld [vmem:[#allocation7_spill] sm:$0xff] }
 0x11e   : > { %v724_v19 = vpop.permute.xlu1 %723  ;;  %v722_v24 = vpop.permute.xlu0 %721  ;;  %v8434_v23 = vld [vmem:[#allocation4_spill] sm:$0xff] }
 0x11f   : > { %v985_v37 = vsel %vm981_vm3, %v918_v25, %v724_v19  ;;  %v984_v36 = vsel %vm981_vm3, %v917_v16, %v722_v24  ;;  %v444_v16 = vld [vmem:[#allocation2 + $0x228] sm:$0xff]  ;;  %v447_v17 = vld [vmem:[#allocation2 + $0x240] sm:$0xff] }
 0x120   : > { %833 = vrot.lane.b32.xlu0 %v441_v29, %s5380_s30  ;;  %5156 = vmatprep.mubr.msk.f32.mxu0 %vm1050_vm4, %v984_v36 }
 0x121   : > { %835 = vrot.lane.b32.xlu1 %v442_v26, %s5380_s30  ;;  %5157 = vmatmul.mubr.msk.f32.gmra.mxu0 %vm1050_vm4, %v985_v37 }
 0x122   : > { %v728_v20 = vpop.permute.xlu1 %727  ;;  %v726_v42 = vpop.permute.xlu0 %725 }
 0x123   : > { %v987_v43 = vsel %vm981_vm3, %v920_v15, %v728_v20  ;;  %v986_v31 = vsel %vm981_vm3, %v919_v14, %v726_v42  ;;  %v445_v20 = vld [vmem:[#allocation2 + $0x230] sm:$0xff]  ;;  %v926_v42 = vsel %vm225_vm1, %v8434_v23, %v5945_v28  ;;  %v8436_v28 = vld [vmem:[#allocation8_spill] sm:$0xff] }
 0x124   : > { %5159 = vmatprep.mubr.msk.f32.mxu0 %vm1050_vm4, %v986_v31  ;;  %635 = vrot.lane.b32.xlu0 %v6135_v39, %s5379_s25 }
 0x125   : > { %5160 = vmatmul.mubr.msk.f32.gmra.mxu0 %vm1050_vm4, %v987_v43  ;;  %637 = vrot.lane.b32.xlu1 %v6133_v38, %s5379_s25  ;;  %v925_v43 = vsel %vm225_vm1, %v8435_v9, %v5947_v27  ;;  %v8437_v27 = vld [vmem:[#allocation9_spill] sm:$0xff] }
 0x126   : > { %v732_v30 = vpop.permute.xlu1 %731  ;;  %v730_v25 = vpop.permute.xlu0 %729 }
 0x127   : > { %v989_v19 = vsel %vm981_vm3, %v922_v10, %v732_v30  ;;  %v988_v24 = vsel %vm981_vm3, %v921_v18, %v730_v25  ;;  %v446_v18 = vld [vmem:[#allocation2 + $0x238] sm:$0xff]  ;;  %v927_v25 = vsel %vm225_vm1, %v8437_v27, %v5955_v34 }
 0x128   : > { %5162 = vmatprep.mubr.msk.f32.mxu0 %vm1050_vm4, %v988_v24  ;;  %837 = vrot.lane.b32.xlu0 %v443_v8, %s5380_s30  ;;  %v8439_v34 = vld [vmem:[#allocation11_spill] sm:$0xff] }
 0x129   : > { %5163 = vmatmul.mubr.msk.f32.gmra.mxu0 %vm1050_vm4, %v989_v19  ;;  %839 = vrot.lane.b32.xlu1 %v444_v16, %s5380_s30 }
 0x12a   : > { %v736_v37 = vpop.permute.xlu1 %735  ;;  %v734_v36 = vpop.permute.xlu0 %733 }
 0x12b   : > { %v991_v14 = vsel %vm981_vm3, %v924_v21, %v736_v37  ;;  %v990_v15 = vsel %vm981_vm3, %v923_v22, %v734_v36  ;;  %v929_v37 = vsel %vm225_vm1, %v8439_v34, %v5963_v40 }
 0x12c   : > { %5165 = vmatprep.mubr.msk.f32.mxu0 %vm1050_vm4, %v990_v15  ;;  %639 = vrot.lane.b32.xlu0 %v441_v29, %s5379_s25 }
 0x12d   : > { %5166 = vmatmul.mubr.msk.f32.gmra.mxu0 %vm1050_vm4, %v991_v14  ;;  %641 = vrot.lane.b32.xlu1 %v442_v26, %s5379_s25  ;;  %v928_v26 = vsel %vm225_vm1, %v8436_v28, %v5953_v35  ;;  %v8438_v35 = vld [vmem:[#allocation10_spill] sm:$0xff] }
 0x12e   : > { %v740_v31 = vpop.permute.xlu1 %739  ;;  %v738_v10 = vpop.permute.xlu0 %737  ;;  %v930_v22 = vsel %vm225_vm1, %v8438_v35, %v5961_v41 }
 0x12f   : > { %v993_v30 = vsel %vm981_vm3, %v926_v42, %v740_v31  ;;  %v992_v29 = vsel %vm981_vm3, %v925_v43, %v738_v10  ;;  %v8442_v31 = vld [vmem:[#allocation14_spill] sm:$0xff] }
 0x130   : > { %5168 = vmatprep.mubr.msk.f32.mxu0 %vm1050_vm4, %v992_v29  ;;  %841 = vrot.lane.b32.xlu0 %v445_v20, %s5380_s30  ;;  %v934_v10 = vsel %vm225_vm1, %v8442_v31, %v5977_v47  ;;  %v8445_v47 = vld [vmem:[#allocation17_spill] sm:$0xff]  ;;  %v8452_v31 = vld [vmem:[#allocation24_spill] sm:$0xff] }
 0x131   : > { %5169 = vmatmul.mubr.msk.f32.gmra.mxu0 %vm1050_vm4, %v993_v30  ;;  %843 = vrot.lane.b32.xlu1 %v446_v18, %s5380_s30 }
 0x132   : > { %v744_v19 = vpop.permute.xlu1 %743  ;;  %v742_v24 = vpop.permute.xlu0 %741 }
 0x133   : > { %v995_v7 = vsel %vm981_vm3, %v928_v26, %v744_v19  ;;  %v994_v21 = vsel %vm981_vm3, %v927_v25, %v742_v24  ;;  %v8444_v26 = vld [vmem:[#allocation16_spill] sm:$0xff]  ;;  %v935_v25 = vsel %vm225_vm1, %v8445_v47, %v5987_v48 }
 0x134   : > { %5171 = vmatprep.mubr.msk.f32.mxu0 %vm1050_vm4, %v994_v21  ;;  %643 = vrot.lane.b32.xlu0 %v443_v8, %s5379_s25  ;;  %v8440_v8 = vld [vmem:[#allocation12_spill] sm:$0xff]  ;;  %v936_v27 = vsel %vm225_vm1, %v8444_v26, %v5985_v49  ;;  %v8446_v21 = vld [vmem:[#allocation18_spill] sm:$0xff]  ;;  %v8447_v49 = vld [vmem:[#allocation19_spill] sm:$0xff] }
 0x135   : > { %5172 = vmatmul.mubr.msk.f32.gmra.mxu0 %vm1050_vm4, %v995_v7  ;;  %645 = vrot.lane.b32.xlu1 %v444_v16, %s5379_s25  ;;  %v932_v41 = vsel %vm225_vm1, %v8440_v8, %v5969_v45  ;;  %v8441_v16 = vld [vmem:[#allocation13_spill] sm:$0xff]  ;;  %v8443_v45 = vld [vmem:[#allocation15_spill] sm:$0xff]  ;;  %v937_v35 = vsel %vm225_vm1, %v8447_v49, %v5995_v50 }
 0x136   : > { %v748_v36 = vpop.permute.xlu1 %747  ;;  %v746_v14 = vpop.permute.xlu0 %745  ;;  %v931_v40 = vsel %vm225_vm1, %v8441_v16, %v5971_v44  ;;  %v933_v18 = vsel %vm225_vm1, %v8443_v45, %v5979_v46  ;;  %v8450_v16 = vld [vmem:[#allocation22_spill] sm:$0xff]  ;;  %v448_v49 = vld [vmem:[#allocation2 + $0x248] sm:$0xff] }
 0x137   : > { %v997_v15 = vsel %vm981_vm3, %v930_v22, %v748_v36  ;;  %v996_v20 = vsel %vm981_vm3, %v929_v37, %v746_v14  ;;  %v8448_v36 = vld [vmem:[#allocation20_spill] sm:$0xff] }
 0x138   : > { %5174 = vmatprep.mubr.msk.f32.mxu0 %vm1050_vm4, %v996_v20  ;;  %845 = vrot.lane.b32.xlu0 %v447_v17, %s5380_s30  ;;  %v938_v17 = vsel %vm225_vm1, %v8446_v21, %v5993_v51  ;;  %v940_v14 = vsel %vm225_vm1, %v8448_v36, %v6001_v53  ;;  %v8449_v51 = vld [vmem:[#allocation21_spill] sm:$0xff]  ;;  %v8451_v53 = vld [vmem:[#allocation23_spill] sm:$0xff] }
 0x139   : > { %5175 = vmatmul.mubr.msk.f32.gmra.mxu0 %vm1050_vm4, %v997_v15  ;;  %v939_v15 = vsel %vm225_vm1, %v8449_v51, %v6003_v52  ;;  %847 = vrot.lane.b32.xlu1 %v448_v49, %s5380_s30  ;;  %v8461_v51 = vld [vmem:[#allocation33_spill] sm:$0xff]  ;;  %v8475_v49 = vld [vmem:[#allocation44_spill] sm:$0xff] }
 0x13a   : > { %v752_v23 = vpop.permute.xlu1 %751  ;;  %v750_v42 = vpop.permute.xlu0 %749 }
 0x13b   : > { %v999_v9 = vsel %vm981_vm3, %v932_v41, %v752_v23  ;;  %v998_v43 = vsel %vm981_vm3, %v931_v40, %v750_v42  ;;  %v942_v40 = vsel %vm225_vm1, %v8450_v16, %v6009_v55  ;;  %v941_v23 = vsel %vm225_vm1, %v8451_v53, %v6011_v54  ;;  %v8453_v55 = vld [vmem:[#allocation25_spill] sm:$0xff] }
 0x13c   : > { %5177 = vmatprep.mubr.msk.f32.mxu0 %vm1050_vm4, %v998_v43  ;;  %v943_v45 = vsel %vm225_vm1, %v8453_v55, %v6019_v56 }
 0x13d   : > { %5178 = vmatmul.mubr.msk.f32.gmra.mxu0 %vm1050_vm4, %v999_v9 }
 0x13e   : > { %v756_v30 = vpop.permute.xlu1 %755  ;;  %v754_v44 = vpop.permute.xlu0 %753 }
 0x13f   : > { %v1001_v29 = vsel %vm981_vm3, %v934_v10, %v756_v30  ;;  %v1000_v28 = vsel %vm981_vm3, %v933_v18, %v754_v44  ;;  %v944_v10 = vsel %vm225_vm1, %v8452_v31, %v6017_v57  ;;  %v8455_v57 = vld [vmem:[#allocation27_spill] sm:$0xff] }
 0x140   : > { %5180 = vmatprep.mubr.msk.f32.mxu0 %vm1050_vm4, %v1000_v28  ;;  %v945_v26 = vsel %vm225_vm1, %v8455_v57, %v6027_v58 }
 0x141   : > { %5181 = vmatmul.mubr.msk.f32.gmra.mxu0 %vm1050_vm4, %v1001_v29  ;;  %v8454_v29 = vld [vmem:[#allocation26_spill] sm:$0xff] }
 0x142   : > { %v760_v19 = vpop.permute.xlu1 %759  ;;  %v758_v46 = vpop.permute.xlu0 %757  ;;  %v946_v28 = vsel %vm225_vm1, %v8454_v29, %v6025_v59  ;;  %v8457_v59 = vld [vmem:[#allocation29_spill] sm:$0xff] }
 0x143   : > { %v1003_v24 = vsel %vm981_vm3, %v936_v27, %v760_v19  ;;  %v1002_v7 = vsel %vm981_vm3, %v935_v25, %v758_v46  ;;  %v8456_v19 = vld [vmem:[#allocation28_spill] sm:$0xff] }
 0x144   : > { %5183 = vmatprep.mubr.msk.f32.mxu0 %vm1050_vm4, %v1002_v7  ;;  %v948_v46 = vsel %vm225_vm1, %v8456_v19, %v6033_v61  ;;  %v8459_v61 = vld [vmem:[#allocation31_spill] sm:$0xff]  ;;  %v8471_v19 = vld [vmem:[#allocation42_spill] sm:$0xff] }
 0x145   : > { %5184 = vmatmul.mubr.msk.f32.gmra.mxu0 %vm1050_vm4, %v1003_v24  ;;  %v947_v24 = vsel %vm225_vm1, %v8457_v59, %v6035_v60  ;;  %v8472_v59 = vld [vmem:[#allocation59_spill] sm:$0xff] }
 0x146   : > { %v764_v22 = vpop.permute.xlu1 %763  ;;  %v762_v48 = vpop.permute.xlu0 %761 }
 0x147   : > { %v1005_v34 = vsel %vm981_vm3, %v938_v17, %v764_v22  ;;  %v1004_v37 = vsel %vm981_vm3, %v937_v35, %v762_v48  ;;  %v8458_v35 = vld [vmem:[#allocation30_spill] sm:$0xff]  ;;  %v949_v48 = vsel %vm225_vm1, %v8459_v61, %v6043_v62  ;;  %v951_v62 = vsel %vm225_vm1, %v8461_v51, %v6051_v0  ;;  %v8477_v61 = vld [vmem:[#allocation45_spill] sm:$0xff] }
 0x148   : > { %5186 = vmatprep.mubr.msk.f32.mxu0 %vm1050_vm4, %v1004_v37  ;;  %v950_v22 = vsel %vm225_vm1, %v8458_v35, %v6041_v63 }
 0x149   : > { %5187 = vmatmul.mubr.msk.f32.gmra.mxu0 %vm1050_vm4, %v1005_v34 }
 0x14a   : > { %v768_v20 = vpop.permute.xlu1 %767  ;;  %v766_v50 = vpop.permute.xlu0 %765 }
 0x14b   : > { %v1007_v8 = vsel %vm981_vm3, %v940_v14, %v768_v20  ;;  %v1006_v41 = vsel %vm981_vm3, %v939_v15, %v766_v50  ;;  %v8460_v14 = vld [vmem:[#allocation32_spill] sm:$0xff] }
 0x14c   : > { %5189 = vmatprep.mubr.msk.f32.mxu0 %vm1050_vm4, %v1006_v41  ;;  %v952_v63 = vsel %vm225_vm1, %v8460_v14, %v6049_v1  ;;  %v8462_v41 = vld [vmem:[#allocation34_spill] sm:$0xff]  ;;  %v8463_v1 = vld [vmem:[#allocation35_spill] sm:$0xff] }
 0x14d   : > { %5190 = vmatmul.mubr.msk.f32.gmra.mxu0 %vm1050_vm4, %v1007_v8  ;;  %v954_v16 = vsel %vm225_vm1, %v8462_v41, %v6057_v3  ;;  %v8465_v3 = vld [vmem:[#allocation37_spill] sm:$0xff]  ;;  %v8478_v14 = vld [vmem:[#allocation62_spill] sm:$0xff] }
 0x14e   : > { %v772_v42 = vpop.permute.xlu1 %771  ;;  %v770_v52 = vpop.permute.xlu0 %769 }
 0x14f   : > { %v1009_v9 = vsel %vm981_vm3, %v942_v40, %v772_v42  ;;  %v1008_v43 = vsel %vm981_vm3, %v941_v23, %v770_v52  ;;  %v953_v40 = vsel %vm225_vm1, %v8463_v1, %v6059_v2  ;;  %v8464_v52 = vld [vmem:[#allocation36_spill] sm:$0xff] }
 0x150   : > { %5192 = vmatprep.mubr.msk.f32.mxu0 %vm1050_vm4, %v1008_v43  ;;  %v955_v43 = vsel %vm225_vm1, %v8465_v3, %v6067_v4  ;;  %v8482_v1 = vld [vmem:[#allocation64_spill] sm:$0xff] }
 0x151   : > { %5193 = vmatmul.mubr.msk.f32.gmra.mxu0 %vm1050_vm4, %v1009_v9  ;;  %v956_v9 = vsel %vm225_vm1, %v8464_v52, %v6065_v5  ;;  %v8467_v5 = vld [vmem:[#allocation39_spill] sm:$0xff] }
 0x152   : > { %v776_v18 = vpop.permute.xlu1 %775  ;;  %v774_v54 = vpop.permute.xlu0 %773 }
 0x153   : > { %v1011_v30 = vsel %vm981_vm3, %v944_v10, %v776_v18  ;;  %v1010_v44 = vsel %vm981_vm3, %v943_v45, %v774_v54  ;;  %v8466_v45 = vld [vmem:[#allocation38_spill] sm:$0xff]  ;;  %v957_v54 = vsel %vm225_vm1, %v8467_v5, %v6075_v6 }
 0x154   : > { %5195 = vmatprep.mubr.msk.f32.mxu0 %vm1050_vm4, %v1010_v44  ;;  %v958_v18 = vsel %vm225_vm1, %v8466_v45, %v6073_v11  ;;  %v8469_v11 = vld [vmem:[#allocation41_spill] sm:$0xff]  ;;  %v8489_v45 = vld [vmem:[#allocation51_spill] sm:$0xff] }
 0x155   : > { %5196 = vmatmul.mubr.msk.f32.gmra.mxu0 %vm1050_vm4, %v1011_v30 }
 0x156   : > { %v780_v27 = vpop.permute.xlu1 %779  ;;  %v778_v56 = vpop.permute.xlu0 %777 }
 0x157   : > { %v1013_v47 = vsel %vm981_vm3, %v946_v28, %v780_v27  ;;  %v1012_v25 = vsel %vm981_vm3, %v945_v26, %v778_v56  ;;  %v8468_v28 = vld [vmem:[#allocation40_spill] sm:$0xff]  ;;  %v959_v26 = vsel %vm225_vm1, %v8469_v11, %v6083_v12  ;;  %v8493_v11 = vld [vmem:[#allocation53_spill] sm:$0xff] }
 0x158   : > { %5198 = vmatprep.mubr.msk.f32.mxu0 %vm1050_vm4, %v1012_v25  ;;  %v960_v57 = vsel %vm225_vm1, %v8468_v28, %v6081_v13  ;;  %v8470_v25 = vld [vmem:[#allocation58_spill] sm:$0xff]  ;;  %v8473_v13 = vld [vmem:[#allocation43_spill] sm:$0xff] }
 0x159   : > { %5199 = vmatmul.mubr.msk.f32.gmra.mxu0 %vm1050_vm4, %v1013_v47 }
 0x15a   : > { %v784_v7 = vpop.permute.xlu1 %783  ;;  %v782_v58 = vpop.permute.xlu0 %781 }
 0x15b   : > { %v1015_v21 = vsel %vm981_vm3, %v948_v46, %v784_v7  ;;  %v1014_v17 = vsel %vm981_vm3, %v947_v24, %v782_v58  ;;  %v962_v46 = vsel %vm225_vm1, %v8471_v19, %v8470_v25  ;;  %v961_v24 = vsel %vm225_vm1, %v8473_v13, %v8472_v59  ;;  %v8495_v13 = vld [vmem:[#allocation54_spill] sm:$0xff] }
 0x15c   : > { %5201 = vmatprep.mubr.msk.f32.mxu0 %vm1050_vm4, %v1014_v17  ;;  %v8474_v17 = vld [vmem:[#allocation60_spill] sm:$0xff] }
 0x15d   : > { %5202 = vmatmul.mubr.msk.f32.gmra.mxu0 %vm1050_vm4, %v1015_v21  ;;  %v964_v35 = vsel %vm225_vm1, %v8475_v49, %v8474_v17 }
 0x15e   : > { %v788_v60 = vpop.permute.xlu1 %787  ;;  %v786_v34 = vpop.permute.xlu0 %785 }
 0x15f   : > { %v1017_v37 = vsel %vm981_vm3, %v950_v22, %v788_v60  ;;  %v1016_v36 = vsel %vm981_vm3, %v949_v48, %v786_v34  ;;  %v8476_v22 = vld [vmem:[#allocation61_spill] sm:$0xff] }
 0x160   : > { %5204 = vmatprep.mubr.msk.f32.mxu0 %vm1050_vm4, %v1016_v36  ;;  %v963_v48 = vsel %vm225_vm1, %v8477_v61, %v8476_v22  ;;  %v8497_v61 = vld [vmem:[#allocation56_spill] sm:$0xff] }
 0x161   : > { %5205 = vmatmul.mubr.msk.f32.gmra.mxu0 %vm1050_vm4, %v1017_v37 }
 0x162   : > { %v792_v15 = vpop.permute.xlu1 %791  ;;  %v790_v20 = vpop.permute.xlu0 %789 }
 0x163   : > { %v1019_v50 = vsel %vm981_vm3, %v952_v63, %v792_v15  ;;  %v1018_v8 = vsel %vm981_vm3, %v951_v62, %v790_v20  ;;  %v8479_v63 = vld [vmem:[#allocation46_spill] sm:$0xff]  ;;  %v8480_v62 = vld [vmem:[#allocation63_spill] sm:$0xff] }
 0x164   : > { %5207 = vmatprep.mubr.msk.f32.mxu0 %vm1050_vm4, %v1018_v8  ;;  %v966_v51 = vsel %vm225_vm1, %v8479_v63, %v8478_v14  ;;  %v8481_v15 = vld [vmem:[#allocation47_spill] sm:$0xff] }
 0x165   : > { %5208 = vmatmul.mubr.msk.f32.gmra.mxu0 %vm1050_vm4, %v1019_v50  ;;  %v965_v20 = vsel %vm225_vm1, %v8481_v15, %v8480_v62 }
 0x166   : > { %v796_v53 = vpop.permute.xlu1 %795  ;;  %v794_v0 = vpop.permute.xlu0 %793 }
 0x167   : > { %v1021_v23 = vsel %vm981_vm3, %v954_v16, %v796_v53  ;;  %v1020_v42 = vsel %vm981_vm3, %v953_v40, %v794_v0  ;;  %v8483_v40 = vld [vmem:[#allocation48_spill] sm:$0xff]  ;;  %v8484_v0 = vld [vmem:[#allocation65_spill] sm:$0xff] }
 0x168   : > { %5210 = vmatprep.mubr.msk.f32.mxu0 %vm1050_vm4, %v1020_v42  ;;  %v968_v53 = vsel %vm225_vm1, %v8483_v40, %v8482_v1 }
 0x169   : > { %5211 = vmatmul.mubr.msk.f32.gmra.mxu0 %vm1050_vm4, %v1021_v23  ;;  %v8485_v23 = vld [vmem:[#allocation49_spill] sm:$0xff] }
 0x16a   : > { %v800_v31 = vpop.permute.xlu1 %799  ;;  %v798_v2 = vpop.permute.xlu0 %797  ;;  %v967_v42 = vsel %vm225_vm1, %v8485_v23, %v8484_v0 }
 0x16b   : > { %v1023_v10 = vsel %vm981_vm3, %v956_v9, %v800_v31  ;;  %v1022_v55 = vsel %vm981_vm3, %v955_v43, %v798_v2  ;;  %v8486_v31 = vld [vmem:[#allocation66_spill] sm:$0xff] }
 0x16c   : > { %5213 = vmatprep.mubr.msk.f32.mxu0 %vm1050_vm4, %v1022_v55  ;;  %v8487_v2 = vld [vmem:[#allocation50_spill] sm:$0xff]  ;;  %v8488_v55 = vld [vmem:[#allocation67_spill] sm:$0xff] }
 0x16d   : > { %5214 = vmatmul.mubr.msk.f32.gmra.mxu0 %vm1050_vm4, %v1023_v10  ;;  %v970_v10 = vsel %vm225_vm1, %v8487_v2, %v8486_v31 }
 0x16e   : > { %v804_v30 = vpop.permute.xlu1 %803  ;;  %v802_v4 = vpop.permute.xlu0 %801 }
 0x16f   : > { %v1025_v44 = vsel %vm981_vm3, %v958_v18, %v804_v30  ;;  %v1024_v29 = vsel %vm981_vm3, %v957_v54, %v802_v4  ;;  %v969_v18 = vsel %vm225_vm1, %v8489_v45, %v8488_v55 }
 0x170   : > { %5216 = vmatprep.mubr.msk.f32.mxu0 %vm1050_vm4, %v1024_v29  ;;  %v8491_v29 = vld [vmem:[#allocation52_spill] sm:$0xff] }
 0x171   : > { %5217 = vmatmul.mubr.msk.f32.gmra.mxu0 %vm1050_vm4, %v1025_v44  ;;  %v8490_v44 = vld [vmem:[#allocation68_spill] sm:$0xff] }
 0x172   : > { %v808_v27 = vpop.permute.xlu1 %807  ;;  %v806_v6 = vpop.permute.xlu0 %805  ;;  %v972_v28 = vsel %vm225_vm1, %v8491_v29, %v8490_v44 }
 0x173   : > { %v1027_v56 = vsel %vm981_vm3, %v960_v57, %v808_v27  ;;  %v1026_v47 = vsel %vm981_vm3, %v959_v26, %v806_v6  ;;  %v8492_v57 = vld [vmem:[#allocation69_spill] sm:$0xff] }
 0x174   : > { %5219 = vmatprep.mubr.msk.f32.mxu0 %vm1050_vm4, %v1026_v47  ;;  %v971_v26 = vsel %vm225_vm1, %v8493_v11, %v8492_v57 }
 0x175   : > { %5220 = vmatmul.mubr.msk.f32.gmra.mxu0 %vm1050_vm4, %v1027_v56 }
 0x176   : > { %v812_v7 = vpop.permute.xlu1 %811  ;;  %v810_v12 = vpop.permute.xlu0 %809 }
 0x177   : > { %v1029_v58 = vsel %vm981_vm3, %v962_v46, %v812_v7  ;;  %v1028_v21 = vsel %vm981_vm3, %v961_v24, %v810_v12  ;;  %v8494_v46 = vld [vmem:[#allocation55_spill] sm:$0xff] }
 0x178   : > { %5222 = vmatprep.mubr.msk.f32.mxu0 %vm1050_vm4, %v1028_v21 }
 0x179   : > { %5223 = vmatmul.mubr.msk.f32.gmra.mxu0 %vm1050_vm4, %v1029_v58 }
 0x17a   : > { %v816_v60 = vpop.permute.xlu1 %815  ;;  %v814_v34 = vpop.permute.xlu0 %813 }
 0x17b   : > { %v1031_v37 = vsel %vm981_vm3, %v964_v35, %v816_v60  ;;  %v1030_v36 = vsel %vm981_vm3, %v963_v48, %v814_v34  ;;  %v8496_v35 = vld [vmem:[#allocation57_spill] sm:$0xff] }
 0x17c   : > { %5225 = vmatprep.mubr.msk.f32.mxu0 %vm1050_vm4, %v1030_v36 }
 0x17d   : > { %5226 = vmatmul.mubr.msk.f32.gmra.mxu0 %vm1050_vm4, %v1031_v37 }
 0x17e   : > { %v820_v50 = vpop.permute.xlu1 %819  ;;  %v818_v8 = vpop.permute.xlu0 %817 }
 0x17f   : > { %v1033_v41 = vsel %vm981_vm3, %v966_v51, %v820_v50  ;;  %v1032_v16 = vsel %vm981_vm3, %v965_v20, %v818_v8 }
 0x180   : > { %5228 = vmatprep.mubr.msk.f32.mxu0 %vm1050_vm4, %v1032_v16 }
 0x181   : > { %5229 = vmatmul.mubr.msk.f32.gmra.mxu0 %vm1050_vm4, %v1033_v41 }
 0x182   : > { %v824_v52 = vpop.permute.xlu1 %823  ;;  %v822_v9 = vpop.permute.xlu0 %821 }
 0x183   : > { %v1035_v3 = vsel %vm981_vm3, %v968_v53, %v824_v52  ;;  %v1034_v43 = vsel %vm981_vm3, %v967_v42, %v822_v9 }
 0x184   : > { %5231 = vmatprep.mubr.msk.f32.mxu0 %vm1050_vm4, %v1034_v43 }
 0x185   : > { %5232 = vmatmul.mubr.msk.f32.gmra.mxu0 %vm1050_vm4, %v1035_v3 }
 0x186   : > { %v828_v5 = vpop.permute.xlu1 %827  ;;  %v826_v54 = vpop.permute.xlu0 %825 }
 0x187   : > { %v1037_v30 = vsel %vm981_vm3, %v970_v10, %v828_v5  ;;  %v1036_v4 = vsel %vm981_vm3, %v969_v18, %v826_v54 }
 0x188   : > { %5234 = vmatprep.mubr.msk.f32.mxu0 %vm1050_vm4, %v1036_v4 }
 0x189   : > { %5235 = vmatmul.mubr.msk.f32.gmra.mxu0 %vm1050_vm4, %v1037_v30 }
 0x18a   : > { %v832_v27 = vpop.permute.xlu1 %831  ;;  %v830_v6 = vpop.permute.xlu0 %829 }
 0x18b   : > { %v1039_v56 = vsel %vm981_vm3, %v972_v28, %v832_v27  ;;  %v1038_v47 = vsel %vm981_vm3, %v971_v26, %v830_v6 }
 0x18c   : > { %5237 = vmatprep.mubr.msk.f32.mxu0 %vm1050_vm4, %v1038_v47 }
 0x18d   : > { %5238 = vmatmul.mubr.msk.f32.gmra.mxu0 %vm1050_vm4, %v1039_v56 }
 0x18e   : > { %v632_v25 = vpop.permute.xlu0 %631 }
 0x18f   : > { %v634_v19 = vpop.permute.xlu1 %633  ;;  %v973_v59 = vsel %vm225_vm1, %v8494_v46, %v632_v25 }
 0x190   : > { %v974_v24 = vsel %vm225_vm1, %v8495_v13, %v634_v19 }
 0x192   : > { %v834_v7 = vpop.permute.xlu0 %833 }
 0x193   : > { %v1040_v12 = vsel %vm981_vm3, %v973_v59, %v834_v7  ;;  %v836_v58 = vpop.permute.xlu1 %835 }
 0x194   : > { %v1041_v21 = vsel %vm981_vm3, %v974_v24, %v836_v58  ;;  %5240 = vmatprep.mubr.msk.f32.mxu0 %vm1050_vm4, %v1040_v12 }
 0x195   : > { %5241 = vmatmul.mubr.msk.f32.gmra.mxu0 %vm1050_vm4, %v1041_v21 }
 0x196   : > { %v636_v17 = vpop.permute.xlu0 %635 }
 0x197   : > { %v638_v49 = vpop.permute.xlu1 %637  ;;  %v975_v22 = vsel %vm225_vm1, %v8496_v35, %v636_v17 }
 0x198   : > { %v976_v48 = vsel %vm225_vm1, %v8497_v61, %v638_v49 }
 0x19a   : > { %v838_v60 = vpop.permute.xlu0 %837 }
 0x19b   : > { %v1042_v34 = vsel %vm981_vm3, %v975_v22, %v838_v60  ;;  %v840_v37 = vpop.permute.xlu1 %839 }
 0x19c   : > { %v1043_v36 = vsel %vm981_vm3, %v976_v48, %v840_v37  ;;  %5243 = vmatprep.mubr.msk.f32.mxu0 %vm1050_vm4, %v1042_v34 }
 0x19d   : > { %5244 = vmatmul.mubr.msk.f32.gmra.mxu0 %vm1050_vm4, %v1043_v36 }
 0x19e   : > { %v640_v14 = vpop.permute.xlu0 %639 }
 0x19f   : > { %v642_v63 = vpop.permute.xlu1 %641  ;;  %v977_v51 = vsel %vm225_vm1, %v6123_v32, %v640_v14 }
 0x1a0   : > { %v978_v62 = vsel %vm225_vm1, %v6121_v33, %v642_v63 }
 0x1a2   : > { %v842_v15 = vpop.permute.xlu0 %841 }
 0x1a3   : > { %v1044_v20 = vsel %vm981_vm3, %v977_v51, %v842_v15  ;;  %v844_v50 = vpop.permute.xlu1 %843 }
 0x1a4   : > { %v1045_v8 = vsel %vm981_vm3, %v978_v62, %v844_v50  ;;  %5246 = vmatprep.mubr.msk.f32.mxu0 %vm1050_vm4, %v1044_v20 }
 0x1a5   : > { %5247 = vmatmul.mubr.msk.f32.gmra.mxu0 %vm1050_vm4, %v1045_v8 }
 0x1a6   : > { %v644_v41 = vpop.permute.xlu0 %643 }
 0x1a7   : > { %v979_v16 = vsel %vm225_vm1, %v6135_v39, %v644_v41  ;;  %v646_v1 = vpop.permute.xlu1 %645 }
 0x1a8   : > { %v980_v32 = vsel %vm225_vm1, %v6133_v38, %v646_v1 }
 0x1aa   : > { %v846_v40 = vpop.permute.xlu0 %845 }
 0x1ab   : > { %v1046_v33 = vsel %vm981_vm3, %v979_v16, %v846_v40  ;;  %v848_v53 = vpop.permute.xlu1 %847 }
 0x1ac   : > { %5249 = vmatprep.mubr.msk.f32.mxu0 %vm1050_vm4, %v1046_v33  ;;  %v1047_v0 = vsel %vm981_vm3, %v980_v32, %v848_v53 }
 0x1ad   : > { %5250 = vmatmul.mubr.msk.f32.gmra.mxu0 %vm1050_vm4, %v1047_v0 }
 0x1dd   : > { %v6483_v23 = vpop.f32.mrf.mxu0 }
 0x1de   : > { %v1710_v42 = vrot.slane %v6483_v23, 1  ;;  %v2013_v39 = vrot.slane %v6483_v23, 2 }
 0x1df   : > { %v6486_v52 = vpop.f32.mrf.mxu0 }
 0x1e0   : > { %1820 = vrot.lane.b32.xlu0 %v1710_v42, %s5381_s6 }
 0x1e1   : > { %v5158_v38 = vpop.f32.mrf.mxu0 }
 0x1e2   : > { %v1713_v3 = vrot.slane %v5158_v38, 1  ;;  %v2016_v18 = vrot.slane %v5158_v38, 2 }
 0x1e3   : > { %v6490_v9 = vpop.f32.mrf.mxu0 }
 0x1e4   : > { %v1711_v43 = vrot.slane %v6490_v9, 1  ;;  %2123 = vrot.lane.b32.xlu0 %v2013_v39, %s5382_s7  ;;  %v2014_v2 = vrot.slane %v6490_v9, 2 }
 0x1e5   : > { %v6494_v31 = vpop.f32.mrf.mxu0 }
 0x1e6   : > { %v1712_v10 = vsel %vm1709_vm5, %v1710_v42, %v1711_v43  ;;  %v1714_v55 = vsel %vm1709_vm5, %v1711_v43, %v1713_v3  ;;  %v2015_v30 = vsel %vm2012_vm6, %v2013_v39, %v2014_v2  ;;  %v2017_v44 = vsel %vm2012_vm6, %v2014_v2, %v2016_v18 }
 0x1e7   : > { %1822 = vrot.lane.b32.xlu1 %v1712_v10, %s5381_s6  ;;  %v6500_v45 = vpop.f32.mrf.mxu0  ;;  %v1716_v29 = vrot.slane %v6494_v31, 1  ;;  %v2019_v47 = vrot.slane %v6494_v31, 2 }
 0x1e8   : > { %1824 = vrot.lane.b32.xlu0 %v1714_v55, %s5381_s6  ;;  %v1715_v54 = vrot.slane %v6500_v45, 1  ;;  %v2018_v11 = vrot.slane %v6500_v45, 2 }
 0x1e9   : > { %v5164_v5 = vpop.f32.mrf.mxu0 }
 0x1ea   : > { %v1717_v26 = vsel %vm1709_vm5, %v1715_v54, %v1716_v29  ;;  %v2020_v19 = vsel %vm2012_vm6, %v2018_v11, %v2019_v47  ;;  %v1720_v24 = vrot.slane %v5164_v5, 1  ;;  %v2023_v35 = vrot.slane %v5164_v5, 2 }
 0x1eb   : > { %2125 = vrot.lane.b32.xlu1 %v2015_v30, %s5382_s7  ;;  %v6506_v4 = vpop.f32.mrf.mxu0 }
 0x1ec   : > { %v1718_v28 = vrot.slane %v6506_v4, 1  ;;  %2127 = vrot.lane.b32.xlu0 %v2017_v44, %s5382_s7  ;;  %v2021_v6 = vrot.slane %v6506_v4, 2 }
 0x1ed   : > { %v6512_v57 = vpop.f32.mrf.mxu0 }
 0x1ee   : > { %v1719_v27 = vsel %vm1709_vm5, %v1716_v29, %v1718_v28  ;;  %v2022_v13 = vsel %vm2012_vm6, %v2019_v47, %v2021_v6  ;;  %v1723_v7 = vrot.slane %v6512_v57, 1  ;;  %v1721_v58 = vsel %vm1709_vm5, %v1718_v28, %v1720_v24 }
 0x1ef   : > { %1826 = vrot.lane.b32.xlu1 %v1717_v26, %s5381_s6  ;;  %v6519_v56 = vpop.f32.mrf.mxu0  ;;  %v2026_v22 = vrot.slane %v6512_v57, 2  ;;  %v2024_v60 = vsel %vm2012_vm6, %v2021_v6, %v2023_v35 }
 0x1f0   : > { %1828 = vrot.lane.b32.xlu0 %v1719_v27, %s5381_s6  ;;  %v1722_v46 = vrot.slane %v6519_v56, 1  ;;  %v2025_v21 = vrot.slane %v6519_v56, 2 }
 0x1f1   : > { %v5170_v25 = vpop.f32.mrf.mxu0 }
 0x1f2   : > { %v1724_v49 = vsel %vm1709_vm5, %v1722_v46, %v1723_v7  ;;  %v2027_v37 = vsel %vm2012_vm6, %v2025_v21, %v2026_v22  ;;  %v1727_v36 = vrot.slane %v5170_v25, 1  ;;  %v2030_v20 = vrot.slane %v5170_v25, 2 }
 0x1f3   : > { %2129 = vrot.lane.b32.xlu1 %v2020_v19, %s5382_s7  ;;  %v6526_v59 = vpop.f32.mrf.mxu0 }
 0x1f4   : > { %2131 = vrot.lane.b32.xlu0 %v2022_v13, %s5382_s7  ;;  %v1725_v48 = vrot.slane %v6526_v59, 1  ;;  %v2028_v63 = vrot.slane %v6526_v59, 2 }
 0x1f5   : > { %v6531_v12 = vpop.f32.mrf.mxu0 }
 0x1f6   : > { %v1726_v51 = vsel %vm1709_vm5, %v1723_v7, %v1725_v48  ;;  %v1728_v15 = vsel %vm1709_vm5, %v1725_v48, %v1727_v36  ;;  %v2029_v41 = vsel %vm2012_vm6, %v2026_v22, %v2028_v63  ;;  %v2031_v32 = vsel %vm2012_vm6, %v2028_v63, %v2030_v20 }
 0x1f7   : > { %1830 = vrot.lane.b32.xlu1 %v1721_v58, %s5381_s6  ;;  %v6536_v17 = vpop.f32.mrf.mxu0  ;;  %v1730_v40 = vrot.slane %v6531_v12, 1  ;;  %v2033_v3 = vrot.slane %v6531_v12, 2 }
 0x1f8   : > { %1832 = vrot.lane.b32.xlu0 %v1724_v49, %s5381_s6  ;;  %v1729_v8 = vrot.slane %v6536_v17, 1  ;;  %v2032_v53 = vrot.slane %v6536_v17, 2 }
 0x1f9   : > { %v5176_v61 = vpop.f32.mrf.mxu0 }
 0x1fa   : > { %v1731_v0 = vsel %vm1709_vm5, %v1729_v8, %v1730_v40  ;;  %v2034_v2 = vsel %vm2012_vm6, %v2032_v53, %v2033_v3  ;;  %v1734_v5 = vrot.slane %v5176_v61, 1  ;;  %v2037_v26 = vrot.slane %v5176_v61, 2 }
 0x1fb   : > { %2133 = vrot.lane.b32.xlu1 %v2024_v60, %s5382_s7  ;;  %v6544_v34 = vpop.f32.mrf.mxu0 }
 0x1fc   : > { %2135 = vrot.lane.b32.xlu0 %v2027_v37, %s5382_s7  ;;  %v1732_v16 = vrot.slane %v6544_v34, 1  ;;  %v2035_v42 = vrot.slane %v6544_v34, 2 }
 0x1fd   : > { %v6548_v14 = vpop.f32.mrf.mxu0 }
 0x1fe   : > { %v1733_v39 = vsel %vm1709_vm5, %v1730_v40, %v1732_v16  ;;  %v2036_v18 = vsel %vm2012_vm6, %v2033_v3, %v2035_v42  ;;  %v1737_v54 = vrot.slane %v6548_v14, 1  ;;  %v1735_v44 = vsel %vm1709_vm5, %v1732_v16, %v1734_v5 }
 0x1ff   : > { %1834 = vrot.lane.b32.xlu1 %v1726_v51, %s5381_s6  ;;  %v6553_v62 = vpop.f32.mrf.mxu0  ;;  %v2040_v27 = vrot.slane %v6548_v14, 2  ;;  %v2038_v25 = vsel %vm2012_vm6, %v2035_v42, %v2037_v26 }
 0x200   : > { %1836 = vrot.lane.b32.xlu0 %v1728_v15, %s5381_s6  ;;  %v1736_v10 = vrot.slane %v6553_v62, 1  ;;  %v2039_v29 = vrot.slane %v6553_v62, 2 }
 0x201   : > { %v5182_v50 = vpop.f32.mrf.mxu0 }
 0x202   : > { %v1738_v11 = vsel %vm1709_vm5, %v1736_v10, %v1737_v54  ;;  %v2041_v46 = vsel %vm2012_vm6, %v2039_v29, %v2040_v27  ;;  %v1741_v13 = vrot.slane %v5182_v50, 1  ;;  %v2044_v35 = vrot.slane %v5182_v50, 2 }
 0x203   : > { %2137 = vrot.lane.b32.xlu1 %v2029_v41, %s5382_s7  ;;  %v6561_v1 = vpop.f32.mrf.mxu0 }
 0x204   : > { %2139 = vrot.lane.b32.xlu0 %v2031_v32, %s5382_s7  ;;  %v1739_v47 = vrot.slane %v6561_v1, 1  ;;  %v2042_v7 = vrot.slane %v6561_v1, 2 }
 0x205   : > { %v6566_v33 = vpop.f32.mrf.mxu0 }
 0x206   : > { %v1740_v58 = vsel %vm1709_vm5, %v1737_v54, %v1739_v47  ;;  %v1742_v49 = vsel %vm1709_vm5, %v1739_v47, %v1741_v13  ;;  %v2043_v48 = vsel %vm2012_vm6, %v2040_v27, %v2042_v7  ;;  %v2045_v36 = vsel %vm2012_vm6, %v2042_v7, %v2044_v35 }
 0x207   : > { %1838 = vrot.lane.b32.xlu1 %v1731_v0, %s5381_s6  ;;  %v6572_v38 = vpop.f32.mrf.mxu0  ;;  %v1744_v63 = vrot.slane %v6566_v33, 1  ;;  %v2047_v16 = vrot.slane %v6566_v33, 2 }
 0x208   : > { %1840 = vrot.lane.b32.xlu0 %v1733_v39, %s5381_s6  ;;  %v1743_v61 = vrot.slane %v6572_v38, 1  ;;  %v2046_v15 = vrot.slane %v6572_v38, 2 }
 0x209   : > { %v6577_v43 = vpop.f32.mrf.mxu0 }
 0x20a   : > { %v1745_v20 = vsel %vm1709_vm5, %v1743_v61, %v1744_v63  ;;  %v2048_v40 = vsel %vm2012_vm6, %v2046_v15, %v2047_v16  ;;  %v1748_v42 = vrot.slane %v6577_v43, 1  ;;  %v2051_v5 = vrot.slane %v6577_v43, 2 }
 0x20b   : > { %2141 = vrot.lane.b32.xlu1 %v2034_v2, %s5382_s7  ;;  %v6582_v55 = vpop.f32.mrf.mxu0 }
 0x20c   : > { %2143 = vrot.lane.b32.xlu0 %v2036_v18, %s5382_s7  ;;  %v1746_v60 = vrot.slane %v6582_v55, 1  ;;  %v2049_v50 = vrot.slane %v6582_v55, 2 }
 0x20d   : > { %v6587_v30 = vpop.f32.mrf.mxu0 }
 0x20e   : > { %v1747_v41 = vsel %vm1709_vm5, %v1744_v63, %v1746_v60  ;;  %v2050_v0 = vsel %vm2012_vm6, %v2047_v16, %v2049_v50  ;;  %v1751_v3 = vrot.slane %v6587_v30, 1  ;;  %v1749_v2 = vsel %vm1709_vm5, %v1746_v60, %v1748_v42 }
 0x20f   : > { %1842 = vrot.lane.b32.xlu1 %v1735_v44, %s5381_s6  ;;  %v6592_v28 = vpop.f32.mrf.mxu0  ;;  %v2054_v44 = vrot.slane %v6587_v30, 2 }
 0x210   : > { %1844 = vrot.lane.b32.xlu0 %v1738_v11, %s5381_s6  ;;  %v1750_v53 = vrot.slane %v6592_v28, 1  ;;  %v2053_v10 = vrot.slane %v6592_v28, 2  ;;  %v2052_v11 = vsel %vm2012_vm6, %v2049_v50, %v2051_v5 }
 0x211   : > { %v6597_v6 = vpop.f32.mrf.mxu0 }
 0x212   : > { %v1752_v18 = vsel %vm1709_vm5, %v1750_v53, %v1751_v3  ;;  %v2055_v26 = vsel %vm2012_vm6, %v2053_v10, %v2054_v44  ;;  %v1755_v43 = vrot.slane %v6597_v6, 1  ;;  %v2058_v7 = vrot.slane %v6597_v6, 2 }
 0x213   : > { %2145 = vrot.lane.b32.xlu1 %v2038_v25, %s5382_s7  ;;  %v6602_v19 = vpop.f32.mrf.mxu0 }
 0x214   : > { %2147 = vrot.lane.b32.xlu0 %v2041_v46, %s5382_s7  ;;  %v1753_v29 = vrot.slane %v6602_v19, 1  ;;  %v2056_v47 = vrot.slane %v6602_v19, 2 }
 0x215   : > { %v6606_v24 = vpop.f32.mrf.mxu0 }
 0x216   : > { %v1754_v25 = vsel %vm1709_vm5, %v1751_v3, %v1753_v29  ;;  %v1756_v46 = vsel %vm1709_vm5, %v1753_v29, %v1755_v43  ;;  %v2059_v61 = vsel %vm2012_vm6, %v2056_v47, %v2058_v7 }
 0x217   : > { %1846 = vrot.lane.b32.xlu1 %v1740_v58, %s5381_s6  ;;  %v6611_v21 = vpop.f32.mrf.mxu0 }
 0x218   : > { %1848 = vrot.lane.b32.xlu0 %v1742_v49, %s5381_s6  ;;  %v1757_v58 = vrot.slane %v6611_v21, 1  ;;  %v2057_v49 = vsel %vm2012_vm6, %v2054_v44, %v2056_v47 }
 0x219   : > { %v6615_v22 = vpop.f32.mrf.mxu0 }
 0x21a   : > { %v1762_v53 = vrot.slane %v6615_v22, 1 }
 0x21b   : > { %2149 = vrot.lane.b32.xlu1 %v2043_v48, %s5382_s7  ;;  %v6621_v37 = vpop.f32.mrf.mxu0  ;;  %v1758_v48 = vrot.slane %v6606_v24, 1 }
 0x21c   : > { %2151 = vrot.lane.b32.xlu0 %v2045_v36, %s5382_s7  ;;  %v1760_v35 = vrot.slane %v6621_v37, 1  ;;  %v2060_v36 = vrot.slane %v6611_v21, 2  ;;  %v2063_v63 = vrot.slane %v6621_v37, 2 }
 0x21d   : > { %v6626_v51 = vpop.f32.mrf.mxu0  ;;  %v1759_v6 = vsel %vm1709_vm5, %v1757_v58, %v1758_v48 }
 0x21e   : > { %v1761_v15 = vsel %vm1709_vm5, %v1758_v48, %v1760_v35  ;;  %v1765_v42 = vrot.slane %v6626_v51, 1  ;;  %v1763_v3 = vsel %vm1709_vm5, %v1760_v35, %v1762_v53  ;;  %v2068_v44 = vrot.slane %v6626_v51, 2 }
 0x21f   : > { %1850 = vrot.lane.b32.xlu1 %v1745_v20, %s5381_s6  ;;  %v6632_v8 = vpop.f32.mrf.mxu0  ;;  %v2061_v20 = vrot.slane %v6606_v24, 2 }
 0x220   : > { %1852 = vrot.lane.b32.xlu0 %v1747_v41, %s5381_s6  ;;  %v1764_v16 = vrot.slane %v6632_v8, 1 }
 0x221   : > { %v6637_v32 = vpop.f32.mrf.mxu0  ;;  %v2062_v41 = vsel %vm2012_vm6, %v2060_v36, %v2061_v20 }
 0x222   : > { %v1766_v10 = vsel %vm1709_vm5, %v1764_v16, %v1765_v42  ;;  %v2072_v58 = vrot.slane %v6637_v32, 2 }
 0x223   : > { %2153 = vrot.lane.b32.xlu1 %v2048_v40, %s5382_s7  ;;  %v6644_v39 = vpop.f32.mrf.mxu0  ;;  %v2064_v40 = vsel %vm2012_vm6, %v2061_v20, %v2063_v63 }
 0x224   : > { %2155 = vrot.lane.b32.xlu0 %v2050_v0, %s5382_s7  ;;  %v1767_v29 = vrot.slane %v6644_v39, 1  ;;  %v2070_v47 = vrot.slane %v6644_v39, 2 }
 0x225   : > { %v6653_v54 = vpop.f32.mrf.mxu0 }
 0x226   : > { %v2071_v35 = vsel %vm2012_vm6, %v2068_v44, %v2070_v47  ;;  %v2073_v48 = vsel %vm2012_vm6, %v2070_v47, %v2072_v58  ;;  %v1772_v36 = vrot.slane %v6653_v54, 1 }
 0x227   : > { %1854 = vrot.lane.b32.xlu1 %v1749_v2, %s5381_s6  ;;  %v6661_v27 = vpop.f32.mrf.mxu0  ;;  %v2067_v2 = vrot.slane %v6632_v8, 2 }
 0x228   : > { %1856 = vrot.lane.b32.xlu0 %v1752_v18, %s5381_s6  ;;  %v2065_v18 = vrot.slane %v6615_v22, 2  ;;  %v1769_v22 = vrot.slane %v6637_v32, 1 }
 0x229   : > { %v6669_v13 = vpop.f32.mrf.mxu0 }
 0x22b   : > { %2157 = vrot.lane.b32.xlu1 %v2052_v11, %s5382_s7  ;;  %v6679_v60 = vpop.f32.mrf.mxu0  ;;  %v2066_v11 = vsel %vm2012_vm6, %v2063_v63, %v2065_v18  ;;  %v2074_v63 = vrot.slane %v6661_v27, 2 }
 0x22c   : > { %2159 = vrot.lane.b32.xlu0 %v2055_v26, %s5382_s7  ;;  %v2069_v26 = vsel %vm2012_vm6, %v2067_v2, %v2068_v44  ;;  %v1776_v2 = vrot.slane %v6669_v13, 1 }
 0x22d   : > { %v6688_v50 = vpop.f32.mrf.mxu0 }
 0x22e   : > { %v1779_v18 = vrot.slane %v6688_v50, 1 }
 0x22f   : > { %1858 = vrot.lane.b32.xlu1 %v1754_v25, %s5381_s6  ;;  %v6696_v0 = vpop.f32.mrf.mxu0  ;;  %v1768_v25 = vsel %vm1709_vm5, %v1765_v42, %v1767_v29 }
 0x230   : > { %1860 = vrot.lane.b32.xlu0 %v1756_v46, %s5381_s6  ;;  %v1770_v46 = vsel %vm1709_vm5, %v1767_v29, %v1769_v22  ;;  %v1778_v42 = vrot.slane %v6696_v0, 1  ;;  %v2079_v22 = vrot.slane %v6669_v13, 2 }
 0x231   : > { %v6705_v5 = vpop.f32.mrf.mxu0 }
 0x233   : > { %2161 = vrot.lane.b32.xlu1 %v2057_v49, %s5382_s7  ;;  %v6713_v43 = vpop.f32.mrf.mxu0  ;;  %v1771_v49 = vrot.slane %v6661_v27, 1 }
 0x234   : > { %2163 = vrot.lane.b32.xlu0 %v2059_v61, %s5382_s7  ;;  %v1774_v61 = vrot.slane %v6679_v60, 1  ;;  %v1781_v58 = vrot.slane %v6713_v43, 1 }
 0x235   : > { %v6721_v7 = vpop.f32.mrf.mxu0  ;;  %v1773_v32 = vsel %vm1709_vm5, %v1771_v49, %v1772_v36 }
 0x236   : > { %v1775_v20 = vsel %vm1709_vm5, %v1772_v36, %v1774_v61  ;;  %v1777_v29 = vsel %vm1709_vm5, %v1774_v61, %v1776_v2 }
 0x237   : > { %1862 = vrot.lane.b32.xlu1 %v1759_v6, %s5381_s6  ;;  %v6731_v6 = vpop.f32.mrf.mxu0 }
 0x238   : > { %1864 = vrot.lane.b32.xlu0 %v1761_v15, %s5381_s6  ;;  %v2077_v15 = vrot.slane %v6679_v60, 2 }
 0x239   : > { %v6740_v16 = vpop.f32.mrf.mxu0 }
 0x23a   : > { %v2080_v61 = vsel %vm2012_vm6, %v2077_v15, %v2079_v22 }
 0x23b   : > { %2165 = vrot.lane.b32.xlu1 %v2062_v41, %s5382_s7  ;;  %v2075_v41 = vrot.slane %v6653_v54, 2 }
 0x23c   : > { %2167 = vrot.lane.b32.xlu0 %v2064_v40, %s5382_s7 }
 0x23d   : > { %v2076_v53 = vsel %vm2012_vm6, %v2074_v63, %v2075_v41 }
 0x23f   : > { %1866 = vrot.lane.b32.xlu1 %v1763_v3, %s5381_s6  ;;  %v2078_v3 = vsel %vm2012_vm6, %v2075_v41, %v2077_v15 }
 0x240   : > { %1868 = vrot.lane.b32.xlu0 %v1766_v10, %s5381_s6  ;;  %v6748_v10 = vpop.f32.mrf.mxu0 }
 0x242   : > { %v6757_v47 = vpop.f32.mrf.mxu0 }
 0x243   : > { %2169 = vrot.lane.b32.xlu1 %v2066_v11, %s5382_s7  ;;  %v2081_v11 = vrot.slane %v6696_v0, 2 }
 0x244   : > { %2171 = vrot.lane.b32.xlu0 %v2069_v26, %s5382_s7  ;;  %v1780_v26 = vsel %vm1709_vm5, %v1778_v42, %v1779_v18  ;;  %v6766_v36 = vpop.f32.mrf.mxu0 }
 0x247   : > { %1870 = vrot.lane.b32.xlu1 %v1768_v25, %s5381_s6  ;;  %v2082_v25 = vrot.slane %v6688_v50, 2 }
 0x248   : > { %1872 = vrot.lane.b32.xlu0 %v1770_v46, %s5381_s6 }
 0x24b   : > { %2173 = vrot.lane.b32.xlu1 %v2071_v35, %s5382_s7 }
 0x24c   : > { %2175 = vrot.lane.b32.xlu0 %v2073_v48, %s5382_s7  ;;  %v2083_v48 = vsel %vm2012_vm6, %v2081_v11, %v2082_v25 }
 0x24f   : > { %1874 = vrot.lane.b32.xlu1 %v1773_v32, %s5381_s6  ;;  %v1783_v32 = vrot.slane %v6705_v5, 1 }
 0x250   : > { %1876 = vrot.lane.b32.xlu0 %v1775_v20, %s5381_s6 }
 0x252   : > { %v1821_v40 = vpop.permute.xlu0 %1820 }
 0x253   : > { %2177 = vrot.lane.b32.xlu1 %v2076_v53, %s5382_s7  ;;  %v1964_v49 = vadd.f32 %v1821_v40, %v6486_v52  ;;  %v2084_v52 = vrot.slane %v6713_v43, 2  ;;  %v1782_v53 = vsel %vm1709_vm5, %v1779_v18, %v1781_v58 }
 0x254   : > { %2179 = vrot.lane.b32.xlu0 %v2078_v3, %s5382_s7  ;;  %v1784_v3 = vsel %vm1709_vm5, %v1781_v58, %v1783_v32 }
 0x255   : > { %v2085_v58 = vsel %vm2012_vm6, %v2082_v25, %v2084_v52 }
 0x256   : > { %v2124_v44 = vpop.permute.xlu0 %2123 }
 0x257   : > { %1878 = vrot.lane.b32.xlu1 %v1777_v29, %s5381_s6  ;;  %v2267_v13 = vadd.f32 %v2124_v44, %v1964_v49  ;;  %v2086_v29 = vrot.slane %v6705_v5, 2  ;;  %v1788_v49 = vrot.slane %v6748_v10, 1  ;;  %v1786_v5 = vrot.slane %v6721_v7, 1 }
 0x258   : > { %1880 = vrot.lane.b32.xlu0 %v1780_v26, %s5381_s6  ;;  %v1785_v26 = vrot.slane %v6731_v6, 1 }
 0x259   : > { %v1823_v46 = vpop.permute.xlu1 %1822  ;;  %v2364_v2 = vrot.slane %v2267_v13, 7 }
 0x25a   : > { %v1825_v35 = vpop.permute.xlu0 %1824  ;;  %v1965_v63 = vadd.f32 %v6483_v23, %v1823_v46  ;;  %v6776_v23 = vpop.f32.mrf.mxu0 }
 0x25b   : > { %2181 = vrot.lane.b32.xlu1 %v2080_v61, %s5382_s7  ;;  %v1966_v20 = vadd.f32 %v1825_v35, %v6490_v9  ;;  %v6781_v9 = vld [vmem:[%s8307_s2] ss:$0 sm:$0xff] }
 0x25c   : > { %2183 = vrot.lane.b32.xlu0 %v2083_v48, %s5382_s7  ;;  %v2087_v48 = vsel %vm2012_vm6, %v2084_v52, %v2086_v29  ;;  %v6794_v13 = vpop.f32.mrf.mxu0  ;;  %v1787_v52 = vsel %vm1709_vm5, %v1785_v26, %v1786_v5 }
 0x25d   : > { %v2126_v41 = vpop.permute.xlu1 %2125 }
 0x25e   : > { %v2268_v40 = vadd.f32 %v2126_v41, %v1965_v63  ;;  %v2128_v15 = vpop.permute.xlu0 %2127 }
 0x25f   : > { %v2269_v42 = vadd.f32 %v2128_v15, %v1966_v20  ;;  %1882 = vrot.lane.b32.xlu1 %v1782_v53, %s5381_s6 }
 0x260   : > { %v2365_v44 = vrot.slane %v2268_v40, 7  ;;  %1884 = vrot.lane.b32.xlu0 %v1784_v3, %s5381_s6  ;;  %v2088_v40 = vrot.slane %v6731_v6, 2  ;;  %v2091_v3 = vrot.slane %v6748_v10, 2 }
 0x261   : > { %v2367_v18 = vrot.slane %v2269_v42, 7  ;;  %v1827_v11 = vpop.permute.xlu1 %1826 }
 0x262   : > { %v2366_v22 = vsel %vm2363_vm7, %v2364_v2, %v2365_v44  ;;  %v1829_v46 = vpop.permute.xlu0 %1828  ;;  %v1967_v32 = vadd.f32 %v1827_v11, %v6500_v45  ;;  %v1789_v45 = vsel %vm1709_vm5, %v1786_v5, %v1788_v49 }
 0x263   : > { %v2483_v35 = vadd.f32 %v6781_v9, %v2366_v22  ;;  %v2368_v61 = vsel %vm2363_vm7, %v2365_v44, %v2367_v18  ;;  %2185 = vrot.lane.b32.xlu1 %v2085_v58, %s5382_s7  ;;  %v1968_v20 = vadd.f32 %v6494_v31, %v1829_v46  ;;  %v2089_v44 = vrot.slane %v6721_v7, 2  ;;  %v6807_v31 = vpop.f32.mrf.mxu0 }
 0x264   : > { %v2484_v63 = vadd.f32 %v6781_v9, %v2368_v61  ;;  %2187 = vrot.lane.b32.xlu0 %v2087_v48, %s5382_s7  ;;  %v1792_v46 = vrot.slane %v6766_v36, 1  ;;  %v1790_v61 = vrot.slane %v6740_v16, 1 }
 0x265   : > { %v2515_v25 = vmax.f32 %v2483_v35, 0.0  ;;  %v2130_v41 = vpop.permute.xlu1 %2129  ;;  %v2090_v22 = vsel %vm2012_vm6, %v2088_v40, %v2089_v44  ;;  %v2092_v35 = vsel %vm2012_vm6, %v2089_v44, %v2091_v3  ;;  %v6817_v48 = vpop.f32.mrf.mxu0 }
 0x266   : > { %v2516_v15 = vmax.f32 %v2484_v63, 0.0  ;;  %v2270_v53 = vadd.f32 %v2130_v41, %v1967_v32  ;;  %v2132_v42 = vpop.permute.xlu0 %2131  ;;  %v1793_v32 = vrot.slane %v6757_v47, 1 }
 0x267   : > { %2547 = vst.msk [vmem:[#allocation3 + $0x28] sm:$0xff] %vm225_vm1, %v2515_v25  ;;  %v2271_v2 = vadd.f32 %v2132_v42, %v1968_v20  ;;  %1886 = vrot.lane.b32.xlu1 %v1787_v52, %s5381_s6  ;;  %v2093_v52 = vrot.slane %v6740_v16, 2 }
 0x268   : > { %2548 = vst.msk [vmem:[#allocation3 + $0x30] sm:$0xff] %vm225_vm1, %v2516_v15  ;;  %v2369_v29 = vrot.slane %v2270_v53, 7  ;;  %1888 = vrot.lane.b32.xlu0 %v1789_v45, %s5381_s6  ;;  %v1791_v15 = vsel %vm1709_vm5, %v1788_v49, %v1790_v61  ;;  %v2095_v53 = vrot.slane %v6766_v36, 2  ;;  %v1794_v42 = vsel %vm1709_vm5, %v1792_v46, %v1793_v32 }
 0x269   : > { %v2370_v18 = vrot.slane %v2271_v2, 7  ;;  %v1831_v11 = vpop.permute.xlu1 %1830  ;;  %v6828_v2 = vpop.f32.mrf.mxu0  ;;  %v2096_v45 = vrot.slane %v6757_v47, 2  ;;  %v1795_v49 = vrot.slane %v6794_v13, 1  ;;  %v2094_v46 = vsel %vm2012_vm6, %v2091_v3, %v2093_v52 }
 0x26a   : > { %v1833_v26 = vpop.permute.xlu0 %1832  ;;  %v1969_v63 = vadd.f32 %v1831_v11, %v6506_v4  ;;  %v2098_v3 = vrot.slane %v6794_v13, 2 }
 0x26b   : > { %v2371_v58 = vsel %vm2363_vm7, %v2369_v29, %v2370_v18  ;;  %2189 = vrot.lane.b32.xlu1 %v2090_v22, %s5382_s7  ;;  %v1970_v29 = vadd.f32 %v1833_v26, %v6519_v56  ;;  %v1797_v56 = vrot.slane %v6776_v23, 1 }
 0x26c   : > { %v2485_v5 = vadd.f32 %v6781_v9, %v2371_v58  ;;  %2191 = vrot.lane.b32.xlu0 %v2092_v35, %s5382_s7  ;;  %v2097_v58 = vsel %vm2012_vm6, %v2095_v53, %v2096_v45  ;;  %v6840_v35 = vpop.f32.mrf.mxu0 }
 0x26d   : > { %v2134_v25 = vpop.permute.xlu1 %2133 }
 0x26e   : > { %v2517_v20 = vmax.f32 %v2485_v5, 0.0  ;;  %v2272_v41 = vadd.f32 %v2134_v25, %v1969_v63  ;;  %v2136_v40 = vpop.permute.xlu0 %2135 }
 0x26f   : > { %1890 = vrot.lane.b32.xlu1 %v1791_v15, %s5381_s6  ;;  %v2273_v61 = vadd.f32 %v2136_v40, %v1970_v29  ;;  %v6851_v40 = vpop.f32.mrf.mxu0 }
 0x270   : > { %2549 = vst.msk [vmem:[#allocation3 + $0x48] sm:$0xff] %vm225_vm1, %v2517_v20  ;;  %v2372_v4 = vrot.slane %v2272_v41, 7  ;;  %1892 = vrot.lane.b32.xlu0 %v1794_v42, %s5381_s6  ;;  %v1796_v41 = vsel %vm1709_vm5, %v1793_v32, %v1795_v49 }
 0x271   : > { %v1835_v44 = vpop.permute.xlu1 %1834  ;;  %v2374_v53 = vrot.slane %v2273_v61, 7 }
 0x272   : > { %v2373_v11 = vsel %vm2363_vm7, %v2370_v18, %v2372_v4  ;;  %v1837_v22 = vpop.permute.xlu0 %1836  ;;  %v1971_v5 = vadd.f32 %v6512_v57, %v1835_v44  ;;  %v1798_v57 = vsel %vm1709_vm5, %v1795_v49, %v1797_v56  ;;  %v1799_v44 = vrot.slane %v6817_v48, 1 }
 0x273   : > { %v2486_v16 = vadd.f32 %v6781_v9, %v2373_v11  ;;  %2193 = vrot.lane.b32.xlu1 %v2094_v46, %s5382_s7  ;;  %v1972_v18 = vadd.f32 %v1837_v22, %v6526_v59  ;;  %v2100_v59 = vrot.slane %v6776_v23, 2  ;;  %v2099_v11 = vsel %vm2012_vm6, %v2096_v45, %v2098_v3 }
 0x274   : > { %2195 = vrot.lane.b32.xlu0 %v2097_v58, %s5382_s7  ;;  %v1802_v22 = vrot.slane %v6840_v35, 1  ;;  %v1800_v23 = vrot.slane %v6807_v31, 1  ;;  %v6864_v58 = vpop.f32.mrf.mxu0 }
 0x275   : > { %v2518_v26 = vmax.f32 %v2486_v16, 0.0  ;;  %v2138_v63 = vpop.permute.xlu1 %2137  ;;  %v2101_v16 = vsel %vm2012_vm6, %v2098_v3, %v2100_v59 }
 0x276   : > { %v2274_v25 = vadd.f32 %v2138_v63, %v1971_v5  ;;  %v2140_v20 = vpop.permute.xlu0 %2139  ;;  %v6871_v63 = vpop.f32.mrf.mxu0 }
 0x277   : > { %2550 = vst.msk [vmem:[#allocation3 + $0x50] sm:$0xff] %vm225_vm1, %v2518_v26  ;;  %v2275_v15 = vadd.f32 %v2140_v20, %v1972_v18  ;;  %1894 = vrot.lane.b32.xlu1 %v1796_v41, %s5381_s6  ;;  %v2102_v18 = vrot.slane %v6817_v48, 2  ;;  %v1801_v41 = vsel %vm1709_vm5, %v1799_v44, %v1800_v23 }
 0x278   : > { %v2375_v42 = vrot.slane %v2274_v25, 7  ;;  %1896 = vrot.lane.b32.xlu0 %v1798_v57, %s5381_s6  ;;  %v1803_v57 = vsel %vm1709_vm5, %v1800_v23, %v1802_v22 }
 0x279   : > { %v2377_v52 = vrot.slane %v2275_v15, 7  ;;  %v1839_v4 = vpop.permute.xlu1 %1838  ;;  %v2105_v15 = vrot.slane %v6840_v35, 2 }
 0x27a   : > { %v2376_v32 = vsel %vm2363_vm7, %v2374_v53, %v2375_v42  ;;  %v1841_v29 = vpop.permute.xlu0 %1840  ;;  %v1973_v5 = vadd.f32 %v1839_v4, %v6536_v17 }
 0x27b   : > { %v2487_v49 = vadd.f32 %v6781_v9, %v2376_v32  ;;  %v2378_v46 = vsel %vm2363_vm7, %v2375_v42, %v2377_v52  ;;  %2197 = vrot.lane.b32.xlu1 %v2099_v11, %s5382_s7  ;;  %v1974_v56 = vadd.f32 %v6531_v12, %v1841_v29  ;;  %v2103_v12 = vrot.slane %v6807_v31, 2  ;;  %v6881_v52 = vpop.f32.mrf.mxu0 }
 0x27c   : > { %v2488_v61 = vadd.f32 %v6781_v9, %v2378_v46  ;;  %2199 = vrot.lane.b32.xlu0 %v2101_v16, %s5382_s7  ;;  %v1806_v32 = vrot.slane %v6864_v58, 1 }
 0x27d   : > { %v2519_v45 = vmax.f32 %v2487_v49, 0.0  ;;  %v2142_v26 = vpop.permute.xlu1 %2141  ;;  %v2104_v44 = vsel %vm2012_vm6, %v2102_v18, %v2103_v12  ;;  %v2106_v11 = vsel %vm2012_vm6, %v2103_v12, %v2105_v15  ;;  %v1804_v49 = vrot.slane %v6828_v2, 1  ;;  %v6892_v23 = vpop.f32.mrf.mxu0 }
 0x27e   : > { %v2520_v25 = vmax.f32 %v2488_v61, 0.0  ;;  %v2276_v3 = vadd.f32 %v2142_v26, %v1973_v5  ;;  %v2144_v20 = vpop.permute.xlu0 %2143  ;;  %v1807_v61 = vrot.slane %v6851_v40, 1 }
 0x27f   : > { %2551 = vst.msk [vmem:[#allocation3 + $0x68] sm:$0xff] %vm225_vm1, %v2519_v45  ;;  %v2277_v17 = vadd.f32 %v2144_v20, %v1974_v56  ;;  %1898 = vrot.lane.b32.xlu1 %v1801_v41, %s5381_s6  ;;  %v1805_v18 = vsel %vm1709_vm5, %v1802_v22, %v1804_v49  ;;  %v6902_v41 = vpop.f32.mrf.mxu0  ;;  %v1809_v22 = vrot.slane %v6881_v52, 1 }
 0x280   : > { %2552 = vst.msk [vmem:[#allocation3 + $0x70] sm:$0xff] %vm225_vm1, %v2520_v25  ;;  %v2379_v53 = vrot.slane %v2276_v3, 7  ;;  %1900 = vrot.lane.b32.xlu0 %v1803_v57, %s5381_s6  ;;  %v2109_v25 = vrot.slane %v6864_v58, 2  ;;  %v1808_v3 = vsel %vm1709_vm5, %v1806_v32, %v1807_v61 }
 0x281   : > { %v2380_v42 = vrot.slane %v2277_v17, 7  ;;  %v1843_v59 = vpop.permute.xlu1 %1842  ;;  %v2110_v17 = vrot.slane %v6851_v40, 2 }
 0x282   : > { %v1845_v4 = vpop.permute.xlu0 %1844  ;;  %v1975_v16 = vadd.f32 %v1843_v59, %v6544_v34  ;;  %v2107_v34 = vrot.slane %v6828_v2, 2  ;;  %v1811_v2 = vrot.slane %v6871_v63, 1 }
 0x283   : > { %v2381_v29 = vsel %vm2363_vm7, %v2379_v53, %v2380_v42  ;;  %2201 = vrot.lane.b32.xlu1 %v2104_v44, %s5382_s7  ;;  %v1976_v12 = vadd.f32 %v1845_v4, %v6553_v62 }
 0x284   : > { %v2489_v46 = vadd.f32 %v6781_v9, %v2381_v29  ;;  %2203 = vrot.lane.b32.xlu0 %v2106_v11, %s5382_s7  ;;  %v2108_v44 = vsel %vm2012_vm6, %v2105_v15, %v2107_v34  ;;  %v2111_v29 = vsel %vm2012_vm6, %v2109_v25, %v2110_v17  ;;  %v2112_v15 = vrot.slane %v6881_v52, 2 }
 0x285   : > { %v2146_v5 = vpop.permute.xlu1 %2145 }
 0x286   : > { %v2521_v45 = vmax.f32 %v2489_v46, 0.0  ;;  %v2278_v56 = vadd.f32 %v2146_v5, %v1975_v16  ;;  %v2148_v26 = vpop.permute.xlu0 %2147  ;;  %v6914_v46 = vpop.f32.mrf.mxu0 }
 0x287   : > { %1902 = vrot.lane.b32.xlu1 %v1805_v18, %s5381_s6  ;;  %v2279_v11 = vadd.f32 %v2148_v26, %v1976_v12  ;;  %v2113_v12 = vsel %vm2012_vm6, %v2110_v17, %v2112_v15  ;;  %v2117_v17 = vrot.slane %v6892_v23, 2 }
 0x288   : > { %2553 = vst.msk [vmem:[#allocation3 + $0x88] sm:$0xff] %vm225_vm1, %v2521_v45  ;;  %v2382_v20 = vrot.slane %v2278_v56, 7  ;;  %1904 = vrot.lane.b32.xlu0 %v1808_v3, %s5381_s6  ;;  %v1810_v45 = vsel %vm1709_vm5, %v1807_v61, %v1809_v22  ;;  %v2114_v56 = vrot.slane %v6871_v63, 2  ;;  %v6924_v3 = vpop.f32.mrf.mxu0  ;;  %v1813_v61 = vrot.slane %v6902_v41, 1 }
 0x289   : > { %v1847_v57 = vpop.permute.xlu1 %1846  ;;  %v2384_v18 = vrot.slane %v2279_v11, 7 }
 0x28a   : > { %v2383_v53 = vsel %vm2363_vm7, %v2380_v42, %v2382_v20  ;;  %v1849_v59 = vpop.permute.xlu0 %1848  ;;  %v1977_v49 = vadd.f32 %v6548_v14, %v1847_v57  ;;  %v1812_v14 = vsel %vm1709_vm5, %v1809_v22, %v1811_v2  ;;  %v1814_v20 = vrot.slane %v6892_v23, 1 }
 0x28b   : > { %v2490_v32 = vadd.f32 %v6781_v9, %v2383_v53  ;;  %2205 = vrot.lane.b32.xlu1 %v2108_v44, %s5382_s7  ;;  %v1978_v42 = vadd.f32 %v1849_v59, %v6561_v1  ;;  %v5251_v53 = vpop.f32.mrf.mxu0  ;;  %v1816_v59 = vrot.slane %v6924_v3, 1  ;;  %v2115_v2 = vsel %vm2012_vm6, %v2112_v15, %v2114_v56 }
 0x28c   : > { %2207 = vrot.lane.b32.xlu0 %v2111_v29, %s5382_s7  ;;  %v1815_v15 = vsel %vm1709_vm5, %v1813_v61, %v1814_v20  ;;  %v6957_v53 = vld [vmem:[#allocation3 + $0x20] sm:$0xff] }
 0x28d   : > { %v2522_v62 = vmax.f32 %v2490_v32, 0.0  ;;  %v2150_v4 = vpop.permute.xlu1 %2149  ;;  %v1639_v11 = vpop.f32.mrf.mxu0 }
 0x28e   : > { %v2280_v16 = vadd.f32 %v2150_v4, %v1977_v49  ;;  %v2152_v5 = vpop.permute.xlu0 %2151  ;;  %v2116_v4 = vrot.slane %v6902_v41, 2 }
 0x28f   : > { %2554 = vst.msk [vmem:[#allocation3 + $0x90] sm:$0xff] %vm225_vm1, %v2522_v62  ;;  %v2281_v26 = vadd.f32 %v2152_v5, %v1978_v42  ;;  %1906 = vrot.lane.b32.xlu1 %v1810_v45, %s5381_s6 }
 0x290   : > { %v2385_v25 = vrot.slane %v2280_v16, 7  ;;  %1908 = vrot.lane.b32.xlu0 %v1812_v14, %s5381_s6 }
 0x291   : > { %v2387_v1 = vrot.slane %v2281_v26, 7  ;;  %v1851_v34 = vpop.permute.xlu1 %1850  ;;  %v1817_v26 = vsel %vm1709_vm5, %v1814_v20, %v1816_v59 }
 0x292   : > { %v2386_v63 = vsel %vm2363_vm7, %v2384_v18, %v2385_v25  ;;  %v1853_v57 = vpop.permute.xlu0 %1852  ;;  %v1979_v29 = vadd.f32 %v1851_v34, %v6572_v38  ;;  %v2119_v38 = vrot.slane %v6924_v3, 2  ;;  %v2118_v34 = vsel %vm2012_vm6, %v2116_v4, %v2117_v17  ;;  %v3252_v4 = vld [vmem:[%s8308_s3 + $0x8] sm:$0xf] }
 0x293   : > { %v2491_v22 = vadd.f32 %v6781_v9, %v2386_v63  ;;  %v2388_v44 = vsel %vm2363_vm7, %v2385_v25, %v2387_v1  ;;  %2209 = vrot.lane.b32.xlu1 %v2113_v12, %s5382_s7  ;;  %v1980_v62 = vadd.f32 %v6566_v33, %v1853_v57  ;;  %v1818_v25 = vrot.slane %v6914_v46, 1  ;;  %5252 = vmatprep.subr.msk.mxu1 %vm1249_vm2, %v3252_v4 }
 0x294   : > { %v2492_v32 = vadd.f32 %v6781_v9, %v2388_v44  ;;  %2211 = vrot.lane.b32.xlu0 %v2115_v2, %s5382_s7  ;;  %v2120_v63 = vsel %vm2012_vm6, %v2117_v17, %v2119_v38  ;;  %v6965_v17 = vld [vmem:[#allocation3 + $0x40] sm:$0xff]  ;;  %5253 = vmatpush3.msk.msra.mxu1 %vm1249_vm2, %v3252_v4  ;;  %v7015_v4 = vld [vmem:[#allocation3 + $0x28] sm:$0xff] }
 0x295   : > { %v2523_v49 = vmax.f32 %v2491_v22, 0.0  ;;  %v2154_v42 = vpop.permute.xlu1 %2153  ;;  %v2121_v22 = vrot.slane %v6914_v46, 2 }
 0x296   : > { %v2524_v16 = vmax.f32 %v2492_v32, 0.0  ;;  %v2282_v5 = vadd.f32 %v2154_v42, %v1979_v29  ;;  %v2156_v45 = vpop.permute.xlu0 %2155  ;;  %v1819_v29 = vsel %vm1709_vm5, %v1816_v59, %v1818_v25 }
 0x297   : > { %2555 = vst.msk [vmem:[#allocation3 + $0xa8] sm:$0xff] %vm225_vm1, %v2523_v49  ;;  %v2283_v56 = vadd.f32 %v2156_v45, %v1980_v62  ;;  %1910 = vrot.lane.b32.xlu1 %v1815_v15, %s5381_s6  ;;  %v2122_v42 = vsel %vm2012_vm6, %v2119_v38, %v2121_v22  ;;  %v6980_v38 = vld [vmem:[#allocation3 + $0x60] sm:$0xff] }
 0x298   : > { %2556 = vst.msk [vmem:[#allocation3 + $0xb0] sm:$0xff] %vm225_vm1, %v2524_v16  ;;  %v2389_v33 = vrot.slane %v2282_v5, 7  ;;  %1912 = vrot.lane.b32.xlu0 %v1817_v26, %s5381_s6 }
 0x299   : > { %v2390_v14 = vrot.slane %v2283_v56, 7  ;;  %v1855_v18 = vpop.permute.xlu1 %1854 }
 0x29a   : > { %v1857_v1 = vpop.permute.xlu0 %1856  ;;  %v1981_v57 = vadd.f32 %v1855_v18, %v6582_v55  ;;  %v6991_v18 = vld [vmem:[#allocation3 + $0x38] sm:$0xff] }
 0x29b   : > { %v2391_v61 = vsel %vm2363_vm7, %v2389_v33, %v2390_v14  ;;  %2213 = vrot.lane.b32.xlu1 %v2118_v34, %s5382_s7  ;;  %v1982_v49 = vadd.f32 %v1857_v1, %v6592_v28  ;;  %v3251_v33 = vld [vmem:[%s8308_s3] sm:$0xff] }
 0x29c   : > { %v2493_v20 = vadd.f32 %v6781_v9, %v2391_v61  ;;  %2215 = vrot.lane.b32.xlu0 %v2120_v63, %s5382_s7  ;;  %5254 = vmatprep.subr.mxu1 %v3251_v33 }
 0x29d   : > { %v2158_v12 = vpop.permute.xlu1 %2157  ;;  %5255 = vmatpush3.msra.mxu1 %v3251_v33 }
 0x29e   : > { %v2525_v44 = vmax.f32 %v2493_v20, 0.0  ;;  %v2284_v2 = vadd.f32 %v2158_v12, %v1981_v57  ;;  %v2160_v32 = vpop.permute.xlu0 %2159  ;;  %v6998_v57 = vld [vmem:[#allocation3 + $0x30] sm:$0xff] }
 0x29f   : > { %1914 = vrot.lane.b32.xlu1 %v1819_v29, %s5381_s6  ;;  %v2285_v16 = vadd.f32 %v2160_v32, %v1982_v49 }
 0x2a0   : > { %2557 = vst.msk [vmem:[#allocation3 + $0xc8] sm:$0xff] %vm225_vm1, %v2525_v44  ;;  %v2392_v11 = vrot.slane %v2284_v2, 7  ;;  %2719 = vrot.lane.b32.xlu0 %v6957_v53, %s5379_s25  ;;  %v7004_v44 = vld [vmem:[#allocation3 + $0x58] sm:$0xff] }
 0x2a1   : > { %v1859_v55 = vpop.permute.xlu1 %1858 }
 0x2a2   : > { %v2393_v46 = vsel %vm2363_vm7, %v2390_v14, %v2392_v11  ;;  %v1861_v62 = vpop.permute.xlu0 %1860  ;;  %v1983_v5 = vadd.f32 %v6587_v30, %v1859_v55  ;;  %v2394_v14 = vrot.slane %v2285_v16, 7 }
 0x2a3   : > { %v2494_v59 = vadd.f32 %v6781_v9, %v2393_v46  ;;  %2217 = vrot.lane.b32.xlu1 %v2122_v42, %s5382_s7  ;;  %v1984_v45 = vadd.f32 %v1861_v62, %v6602_v19  ;;  %v7010_v62 = vld [vmem:[#allocation3 + $0x48] sm:$0xff] }
 0x2a4   : > { %2727 = vrot.lane.b32.xlu0 %v6965_v17, %s5379_s25 }
 0x2a5   : > { %v2526_v28 = vmax.f32 %v2494_v59, 0.0  ;;  %v2162_v15 = vpop.permute.xlu1 %2161 }
 0x2a6   : > { %v2286_v56 = vadd.f32 %v2162_v15, %v1983_v5  ;;  %v2164_v26 = vpop.permute.xlu0 %2163  ;;  %v7020_v5 = vld [vmem:[#allocation3 + $0x50] sm:$0xff] }
 0x2a7   : > { %2558 = vst.msk [vmem:[#allocation3 + $0xd0] sm:$0xff] %vm225_vm1, %v2526_v28  ;;  %v2287_v30 = vadd.f32 %v2164_v26, %v1984_v45  ;;  %2921 = vrot.lane.b32.xlu1 %v6965_v17, %s5380_s30 }
 0x2a8   : > { %v2395_v19 = vrot.slane %v2286_v56, 7  ;;  %2929 = vrot.lane.b32.xlu0 %v6980_v38, %s5380_s30 }
 0x2a9   : > { %v2397_v25 = vrot.slane %v2287_v30, 7  ;;  %v1863_v1 = vpop.permute.xlu1 %1862 }
 0x2aa   : > { %v2396_v34 = vsel %vm2363_vm7, %v2394_v14, %v2395_v19  ;;  %v1865_v61 = vpop.permute.xlu0 %1864  ;;  %v1985_v22 = vadd.f32 %v1863_v1, %v6611_v21 }
 0x2ab   : > { %v2495_v63 = vadd.f32 %v6781_v9, %v2396_v34  ;;  %v2398_v20 = vsel %vm2363_vm7, %v2395_v19, %v2397_v25  ;;  %2725 = vrot.lane.b32.xlu1 %v6991_v18, %s5379_s25  ;;  %v1986_v32 = vadd.f32 %v6606_v24, %v1865_v61  ;;  %v7036_v34 = vld [vmem:[#allocation3 + $0x70] sm:$0xff] }
 0x2ac   : > { %v2496_v12 = vadd.f32 %v6781_v9, %v2398_v20  ;;  %2723 = vrot.lane.b32.xlu0 %v6998_v57, %s5379_s25  ;;  %v7041_v20 = vld [vmem:[#allocation3 + $0x78] sm:$0xff] }
 0x2ad   : > { %v2527_v2 = vmax.f32 %v2495_v63, 0.0  ;;  %v2166_v29 = vpop.permute.xlu1 %2165 }
 0x2ae   : > { %v2528_v11 = vmax.f32 %v2496_v12, 0.0  ;;  %v2288_v55 = vadd.f32 %v2166_v29, %v1985_v22  ;;  %v2168_v49 = vpop.permute.xlu0 %2167 }
 0x2af   : > { %2559 = vst.msk [vmem:[#allocation3 + $0xe8] sm:$0xff] %vm225_vm1, %v2527_v2  ;;  %v2289_v46 = vadd.f32 %v2168_v49, %v1986_v32  ;;  %2927 = vrot.lane.b32.xlu1 %v7004_v44, %s5380_s30 }
 0x2b0   : > { %2560 = vst.msk [vmem:[#allocation3 + $0xf0] sm:$0xff] %vm225_vm1, %v2528_v11  ;;  %v2399_v21 = vrot.slane %v2288_v55, 7  ;;  %2923 = vrot.lane.b32.xlu0 %v7010_v62, %s5380_s30 }
 0x2b1   : > { %v2400_v42 = vrot.slane %v2289_v46, 7  ;;  %v1867_v24 = vpop.permute.xlu1 %1866  ;;  %v7049_v46 = vld [vmem:[#allocation3 + $0x80] sm:$0xff] }
 0x2b2   : > { %v1869_v59 = vpop.permute.xlu0 %1868  ;;  %v1987_v45 = vadd.f32 %v1867_v24, %v6621_v37 }
 0x2b3   : > { %v2401_v16 = vsel %vm2363_vm7, %v2399_v21, %v2400_v42  ;;  %2721 = vrot.lane.b32.xlu1 %v7015_v4, %s5379_s25  ;;  %v1988_v19 = vadd.f32 %v1869_v59, %v6632_v8 }
 0x2b4   : > { %v2497_v28 = vadd.f32 %v6781_v9, %v2401_v16  ;;  %2925 = vrot.lane.b32.xlu0 %v7020_v5, %s5380_s30 }
 0x2b5   : > { %v2170_v15 = vpop.permute.xlu1 %2169 }
 0x2b6   : > { %v2529_v56 = vmax.f32 %v2497_v28, 0.0  ;;  %v2290_v26 = vadd.f32 %v2170_v15, %v1987_v45  ;;  %v2172_v33 = vpop.permute.xlu0 %2171 }
 0x2b7   : > { %2729 = vrot.lane.b32.xlu1 %v7010_v62, %s5379_s25  ;;  %v2291_v61 = vadd.f32 %v2172_v33, %v1988_v19 }
 0x2b8   : > { %2561 = vst.msk [vmem:[#allocation3 + $0x108] sm:$0xff] %vm225_vm1, %v2529_v56  ;;  %v2402_v30 = vrot.slane %v2290_v26, 7  ;;  %2731 = vrot.lane.b32.xlu0 %v7020_v5, %s5379_s25 }
 0x2b9   : > { %v1871_v14 = vpop.permute.xlu1 %1870  ;;  %v2404_v11 = vrot.slane %v2291_v61, 7  ;;  %v7074_v61 = vld [vmem:[#allocation3 + $0x90] sm:$0xff] }
 0x2ba   : > { %v2403_v37 = vsel %vm2363_vm7, %v2400_v42, %v2402_v30  ;;  %v1873_v25 = vpop.permute.xlu0 %1872  ;;  %v1989_v63 = vadd.f32 %v6626_v51, %v1871_v14  ;;  %v7052_v42 = vld [vmem:[#allocation3 + $0x68] sm:$0xff] }
 0x2bb   : > { %v2498_v1 = vadd.f32 %v6781_v9, %v2403_v37  ;;  %2733 = vrot.lane.b32.xlu1 %v7004_v44, %s5379_s25  ;;  %v1990_v8 = vadd.f32 %v1873_v25, %v6644_v39 }
 0x2bc   : > { %2933 = vrot.lane.b32.xlu0 %v7036_v34, %s5380_s30 }
 0x2bd   : > { %v2530_v12 = vmax.f32 %v2498_v1, 0.0  ;;  %v2174_v22 = vpop.permute.xlu1 %2173 }
 0x2be   : > { %v2292_v2 = vadd.f32 %v2174_v22, %v1989_v63  ;;  %v2176_v32 = vpop.permute.xlu0 %2175 }
 0x2bf   : > { %2562 = vst.msk [vmem:[#allocation3 + $0x110] sm:$0xff] %vm225_vm1, %v2530_v12  ;;  %v2293_v29 = vadd.f32 %v2176_v32, %v1990_v8  ;;  %2935 = vrot.lane.b32.xlu1 %v7041_v20, %s5380_s30 }
 0x2c0   : > { %v2405_v55 = vrot.slane %v2292_v2, 7  ;;  %2735 = vrot.lane.b32.xlu0 %v6980_v38, %s5379_s25 }
 0x2c1   : > { %v2407_v51 = vrot.slane %v2293_v29, 7  ;;  %v1875_v49 = vpop.permute.xlu1 %1874 }
 0x2c2   : > { %v2406_v39 = vsel %vm2363_vm7, %v2404_v11, %v2405_v55  ;;  %v1877_v21 = vpop.permute.xlu0 %1876  ;;  %v1991_v28 = vadd.f32 %v1875_v49, %v6661_v27  ;;  %v7085_v11 = vld [vmem:[#allocation3 + $0x98] sm:$0xff] }
 0x2c3   : > { %v2499_v24 = vadd.f32 %v6781_v9, %v2406_v39  ;;  %v2408_v59 = vsel %vm2363_vm7, %v2405_v55, %v2407_v51  ;;  %2931 = vrot.lane.b32.xlu1 %v7052_v42, %s5380_s30  ;;  %v1992_v15 = vadd.f32 %v6653_v54, %v1877_v21  ;;  %v7069_v54 = vld [vmem:[#allocation3 + $0x88] sm:$0xff] }
 0x2c4   : > { %v2500_v16 = vadd.f32 %v6781_v9, %v2408_v59  ;;  %2937 = vrot.lane.b32.xlu0 %v7049_v46, %s5380_s30 }
 0x2c5   : > { %v2531_v45 = vmax.f32 %v2499_v24, 0.0  ;;  %v2178_v56 = vpop.permute.xlu1 %2177 }
 0x2c6   : > { %v2532_v26 = vmax.f32 %v2500_v16, 0.0  ;;  %v2294_v33 = vadd.f32 %v2178_v56, %v1991_v28  ;;  %v2180_v30 = vpop.permute.xlu0 %2179 }
 0x2c7   : > { %2563 = vst.msk [vmem:[#allocation3 + $0x128] sm:$0xff] %vm225_vm1, %v2531_v45  ;;  %v2295_v14 = vadd.f32 %v2180_v30, %v1992_v15  ;;  %2737 = vrot.lane.b32.xlu1 %v7052_v42, %s5379_s25 }
 0x2c8   : > { %2564 = vst.msk [vmem:[#allocation3 + $0x130] sm:$0xff] %vm225_vm1, %v2532_v26  ;;  %v2409_v19 = vrot.slane %v2294_v33, 7  ;;  %2739 = vrot.lane.b32.xlu0 %v7036_v34, %s5379_s25 }
 0x2c9   : > { %v2410_v27 = vrot.slane %v2295_v14, 7  ;;  %v1879_v37 = vpop.permute.xlu1 %1878 }
 0x2ca   : > { %v1881_v25 = vpop.permute.xlu0 %1880  ;;  %v1993_v12 = vadd.f32 %v1879_v37, %v6679_v60  ;;  %v7087_v60 = vld [vmem:[#allocation3 + $0xa0] sm:$0xff] }
 0x2cb   : > { %v2411_v1 = vsel %vm2363_vm7, %v2409_v19, %v2410_v27  ;;  %2939 = vrot.lane.b32.xlu1 %v7069_v54, %s5380_s30  ;;  %v1994_v51 = vadd.f32 %v1881_v25, %v6696_v0  ;;  %v7110_v25 = vld [vmem:[#allocation3 + $0xb0] sm:$0xff] }
 0x2cc   : > { %v2501_v63 = vadd.f32 %v6781_v9, %v2411_v1  ;;  %2941 = vrot.lane.b32.xlu0 %v7074_v61, %s5380_s30 }
 0x2cd   : > { %v2182_v8 = vpop.permute.xlu1 %2181 }
 0x2ce   : > { %v2533_v22 = vmax.f32 %v2501_v63, 0.0  ;;  %v2296_v2 = vadd.f32 %v2182_v8, %v1993_v12  ;;  %v2184_v32 = vpop.permute.xlu0 %2183 }
 0x2cf   : > { %2741 = vrot.lane.b32.xlu1 %v7041_v20, %s5379_s25  ;;  %v2297_v24 = vadd.f32 %v2184_v32, %v1994_v51 }
 0x2d0   : > { %2565 = vst.msk [vmem:[#allocation3 + $0x148] sm:$0xff] %vm225_vm1, %v2533_v22  ;;  %v2412_v29 = vrot.slane %v2296_v2, 7  ;;  %2743 = vrot.lane.b32.xlu0 %v7049_v46, %s5379_s25 }
 0x2d1   : > { %v1883_v55 = vpop.permute.xlu1 %1882  ;;  %v2414_v26 = vrot.slane %v2297_v24, 7 }
 0x2d2   : > { %v2413_v49 = vsel %vm2363_vm7, %v2410_v27, %v2412_v29  ;;  %v1885_v39 = vpop.permute.xlu0 %1884  ;;  %v1995_v59 = vadd.f32 %v6688_v50, %v1883_v55 }
 0x2d3   : > { %v2502_v21 = vadd.f32 %v6781_v9, %v2413_v49  ;;  %2943 = vrot.lane.b32.xlu1 %v7085_v11, %s5380_s30  ;;  %v1996_v28 = vadd.f32 %v1885_v39, %v6713_v43  ;;  %v7104_v43 = vld [vmem:[#allocation3 + $0xa8] sm:$0xff]  ;;  %v7125_v39 = vld [vmem:[#allocation3 + $0xc0] sm:$0xff] }
 0x2d4   : > { %2945 = vrot.lane.b32.xlu0 %v7087_v60, %s5380_s30 }
 0x2d5   : > { %v2534_v16 = vmax.f32 %v2502_v21, 0.0  ;;  %v2186_v45 = vpop.permute.xlu1 %2185 }
 0x2d6   : > { %v2298_v15 = vadd.f32 %v2186_v45, %v1995_v59  ;;  %v2188_v0 = vpop.permute.xlu0 %2187 }
 0x2d7   : > { %2566 = vst.msk [vmem:[#allocation3 + $0x150] sm:$0xff] %vm225_vm1, %v2534_v16  ;;  %v2299_v56 = vadd.f32 %v2188_v0, %v1996_v28  ;;  %2745 = vrot.lane.b32.xlu1 %v7069_v54, %s5379_s25 }
 0x2d8   : > { %v2415_v33 = vrot.slane %v2298_v15, 7  ;;  %2747 = vrot.lane.b32.xlu0 %v7074_v61, %s5379_s25 }
 0x2d9   : > { %v2417_v50 = vrot.slane %v2299_v56, 7  ;;  %v1887_v30 = vpop.permute.xlu1 %1886 }
 0x2da   : > { %v2416_v14 = vsel %vm2363_vm7, %v2414_v26, %v2415_v33  ;;  %v1889_v19 = vpop.permute.xlu0 %1888  ;;  %v1997_v63 = vadd.f32 %v1887_v30, %v6731_v6  ;;  %v7123_v6 = vld [vmem:[#allocation3 + $0xb8] sm:$0xff]  ;;  %v7141_v30 = vld [vmem:[#allocation3 + $0xc8] sm:$0xff] }
 0x2db   : > { %v2503_v27 = vadd.f32 %v6781_v9, %v2416_v14  ;;  %v2418_v37 = vsel %vm2363_vm7, %v2415_v33, %v2417_v50  ;;  %2947 = vrot.lane.b32.xlu1 %v7104_v43, %s5380_s30  ;;  %v1998_v8 = vadd.f32 %v6721_v7, %v1889_v19  ;;  %v7146_v19 = vld [vmem:[#allocation3 + $0xd0] sm:$0xff] }
 0x2dc   : > { %v2504_v1 = vadd.f32 %v6781_v9, %v2418_v37  ;;  %2949 = vrot.lane.b32.xlu0 %v7110_v25, %s5380_s30 }
 0x2dd   : > { %v2535_v12 = vmax.f32 %v2503_v27, 0.0  ;;  %v2190_v22 = vpop.permute.xlu1 %2189 }
 0x2de   : > { %v2536_v2 = vmax.f32 %v2504_v1, 0.0  ;;  %v2300_v32 = vadd.f32 %v2190_v22, %v1997_v63  ;;  %v2192_v29 = vpop.permute.xlu0 %2191 }
 0x2df   : > { %2567 = vst.msk [vmem:[#allocation3 + $0x168] sm:$0xff] %vm225_vm1, %v2535_v12  ;;  %v2301_v55 = vadd.f32 %v2192_v29, %v1998_v8  ;;  %2749 = vrot.lane.b32.xlu1 %v7085_v11, %s5379_s25 }
 0x2e0   : > { %2568 = vst.msk [vmem:[#allocation3 + $0x170] sm:$0xff] %vm225_vm1, %v2536_v2  ;;  %v2419_v51 = vrot.slane %v2300_v32, 7  ;;  %2751 = vrot.lane.b32.xlu0 %v7087_v60, %s5379_s25 }
 0x2e1   : > { %v2420_v49 = vrot.slane %v2301_v55, 7  ;;  %v1891_v7 = vpop.permute.xlu1 %1890 }
 0x2e2   : > { %v1893_v21 = vpop.permute.xlu0 %1892  ;;  %v1999_v16 = vadd.f32 %v1891_v7, %v6748_v10 }
 0x2e3   : > { %v2421_v24 = vsel %vm2363_vm7, %v2419_v51, %v2420_v49  ;;  %2951 = vrot.lane.b32.xlu1 %v7123_v6, %s5380_s30  ;;  %v2000_v33 = vadd.f32 %v1893_v21, %v6766_v36  ;;  %v7159_v51 = vld [vmem:[#allocation3 + $0xe0] sm:$0xff] }
 0x2e4   : > { %v2505_v59 = vadd.f32 %v6781_v9, %v2421_v24  ;;  %2953 = vrot.lane.b32.xlu0 %v7125_v39, %s5380_s30 }
 0x2e5   : > { %v2194_v28 = vpop.permute.xlu1 %2193 }
 0x2e6   : > { %v2537_v45 = vmax.f32 %v2505_v59, 0.0  ;;  %v2302_v15 = vadd.f32 %v2194_v28, %v1999_v16  ;;  %v2196_v0 = vpop.permute.xlu0 %2195 }
 0x2e7   : > { %2753 = vrot.lane.b32.xlu1 %v7104_v43, %s5379_s25  ;;  %v2303_v27 = vadd.f32 %v2196_v0, %v2000_v33 }
 0x2e8   : > { %2569 = vst.msk [vmem:[#allocation3 + $0x188] sm:$0xff] %vm225_vm1, %v2537_v45  ;;  %v2422_v56 = vrot.slane %v2302_v15, 7  ;;  %2755 = vrot.lane.b32.xlu0 %v7110_v25, %s5379_s25 }
 0x2e9   : > { %v1895_v26 = vpop.permute.xlu1 %1894  ;;  %v2424_v2 = vrot.slane %v2303_v27, 7  ;;  %v7182_v27 = vld [vmem:[#allocation3 + $0xf0] sm:$0xff] }
 0x2ea   : > { %v2423_v10 = vsel %vm2363_vm7, %v2420_v49, %v2422_v56  ;;  %v1897_v50 = vpop.permute.xlu0 %1896  ;;  %v2001_v37 = vadd.f32 %v6757_v47, %v1895_v26  ;;  %v7157_v47 = vld [vmem:[#allocation3 + $0xd8] sm:$0xff] }
 0x2eb   : > { %v2506_v14 = vadd.f32 %v6781_v9, %v2423_v10  ;;  %2955 = vrot.lane.b32.xlu1 %v7141_v30, %s5380_s30  ;;  %v2002_v36 = vadd.f32 %v1897_v50, %v6794_v13 }
 0x2ec   : > { %2957 = vrot.lane.b32.xlu0 %v7146_v19, %s5380_s30 }
 0x2ed   : > { %v2538_v1 = vmax.f32 %v2506_v14, 0.0  ;;  %v2198_v63 = vpop.permute.xlu1 %2197 }
 0x2ee   : > { %v2304_v12 = vadd.f32 %v2198_v63, %v2001_v37  ;;  %v2200_v8 = vpop.permute.xlu0 %2199 }
 0x2ef   : > { %2570 = vst.msk [vmem:[#allocation3 + $0x190] sm:$0xff] %vm225_vm1, %v2538_v1  ;;  %v2305_v22 = vadd.f32 %v2200_v8, %v2002_v36  ;;  %2757 = vrot.lane.b32.xlu1 %v7123_v6, %s5379_s25 }
 0x2f0   : > { %v2425_v32 = vrot.slane %v2304_v12, 7  ;;  %2759 = vrot.lane.b32.xlu0 %v7125_v39, %s5379_s25 }
 0x2f1   : > { %v2427_v29 = vrot.slane %v2305_v22, 7  ;;  %v1899_v55 = vpop.permute.xlu1 %1898 }
 0x2f2   : > { %v2426_v13 = vsel %vm2363_vm7, %v2424_v2, %v2425_v32  ;;  %v1901_v49 = vpop.permute.xlu0 %1900  ;;  %v2003_v59 = vadd.f32 %v1899_v55, %v6817_v48  ;;  %v7193_v2 = vld [vmem:[#allocation3 + $0xf8] sm:$0xff] }
 0x2f3   : > { %v2507_v7 = vadd.f32 %v6781_v9, %v2426_v13  ;;  %v2428_v21 = vsel %vm2363_vm7, %v2425_v32, %v2427_v29  ;;  %2959 = vrot.lane.b32.xlu1 %v7157_v47, %s5380_s30  ;;  %v2004_v28 = vadd.f32 %v6807_v31, %v1901_v49  ;;  %v7177_v31 = vld [vmem:[#allocation3 + $0xe8] sm:$0xff]  ;;  %v7202_v13 = vld [vmem:[%s8307_s2] ss:$0 sm:$0xff] }
 0x2f4   : > { %v2508_v24 = vadd.f32 %v6781_v9, %v2428_v21  ;;  %2961 = vrot.lane.b32.xlu0 %v7159_v51, %s5380_s30 }
 0x2f5   : > { %v2539_v16 = vmax.f32 %v2507_v7, 0.0  ;;  %v2202_v45 = vpop.permute.xlu1 %2201 }
 0x2f6   : > { %v2540_v15 = vmax.f32 %v2508_v24, 0.0  ;;  %v2306_v0 = vadd.f32 %v2202_v45, %v2003_v59  ;;  %v2204_v56 = vpop.permute.xlu0 %2203 }
 0x2f7   : > { %2571 = vst.msk [vmem:[#allocation3 + $0x1a8] sm:$0xff] %vm225_vm1, %v2539_v16  ;;  %v2307_v26 = vadd.f32 %v2204_v56, %v2004_v28  ;;  %2761 = vrot.lane.b32.xlu1 %v7141_v30, %s5379_s25 }
 0x2f8   : > { %2572 = vst.msk [vmem:[#allocation3 + $0x1b0] sm:$0xff] %vm225_vm1, %v2540_v15  ;;  %v2429_v33 = vrot.slane %v2306_v0, 7  ;;  %2763 = vrot.lane.b32.xlu0 %v7146_v19, %s5379_s25 }
 0x2f9   : > { %v2430_v48 = vrot.slane %v2307_v26, 7  ;;  %v1903_v10 = vpop.permute.xlu1 %1902 }
 0x2fa   : > { %v1905_v50 = vpop.permute.xlu0 %1904  ;;  %v2005_v1 = vadd.f32 %v1903_v10, %v6840_v35  ;;  %v7195_v35 = vld [vmem:[#allocation3 + $0x100] sm:$0xff] }
 0x2fb   : > { %v2431_v14 = vsel %vm2363_vm7, %v2429_v33, %v2430_v48  ;;  %2963 = vrot.lane.b32.xlu1 %v7177_v31, %s5380_s30  ;;  %v2006_v32 = vadd.f32 %v1905_v50, %v6864_v58  ;;  %v7223_v50 = vld [vmem:[#allocation3 + $0x110] sm:$0xff] }
 0x2fc   : > { %v2509_v37 = vadd.f32 %v6781_v9, %v2431_v14  ;;  %2965 = vrot.lane.b32.xlu0 %v7182_v27, %s5380_s30 }
 0x2fd   : > { %v2206_v36 = vpop.permute.xlu1 %2205 }
 0x2fe   : > { %v2541_v63 = vmax.f32 %v2509_v37, 0.0  ;;  %v2308_v12 = vadd.f32 %v2206_v36, %v2005_v1  ;;  %v2208_v8 = vpop.permute.xlu0 %2207 }
 0x2ff   : > { %2765 = vrot.lane.b32.xlu1 %v7157_v47, %s5379_s25  ;;  %v2309_v7 = vadd.f32 %v2208_v8, %v2006_v32 }
 0x300   : > { %2573 = vst.msk [vmem:[#allocation3 + $0x1c8] sm:$0xff] %vm225_vm1, %v2541_v63  ;;  %v2432_v22 = vrot.slane %v2308_v12, 7  ;;  %2767 = vrot.lane.b32.xlu0 %v7159_v51, %s5379_s25 }
 0x301   : > { %v1907_v9 = vpop.permute.xlu1 %1906  ;;  %v2434_v15 = vrot.slane %v2309_v7, 7 }
 0x302   : > { %v2433_v29 = vsel %vm2363_vm7, %v2430_v48, %v2432_v22  ;;  %v1909_v55 = vpop.permute.xlu0 %1908  ;;  %v2007_v21 = vadd.f32 %v6851_v40, %v1907_v9 }
 0x303   : > { %v2510_v49 = vadd.f32 %v7202_v13, %v2433_v29  ;;  %2967 = vrot.lane.b32.xlu1 %v7193_v2, %s5380_s30  ;;  %v2008_v24 = vadd.f32 %v1909_v55, %v6881_v52  ;;  %v7217_v52 = vld [vmem:[#allocation3 + $0x108] sm:$0xff]  ;;  %v7238_v55 = vld [vmem:[#allocation3 + $0x120] sm:$0xff] }
 0x304   : > { %2969 = vrot.lane.b32.xlu0 %v7195_v35, %s5380_s30 }
 0x305   : > { %v2542_v58 = vmax.f32 %v2510_v49, 0.0  ;;  %v2210_v59 = vpop.permute.xlu1 %2209 }
 0x306   : > { %v2310_v16 = vadd.f32 %v2210_v59, %v2007_v21  ;;  %v2212_v28 = vpop.permute.xlu0 %2211 }
 0x307   : > { %2574 = vst.msk [vmem:[#allocation3 + $0x1d0] sm:$0xff] %vm225_vm1, %v2542_v58  ;;  %v2311_v45 = vadd.f32 %v2212_v28, %v2008_v24  ;;  %2769 = vrot.lane.b32.xlu1 %v7177_v31, %s5379_s25  ;;  %v2579_v24 = vld [vmem:[#allocation3] sm:$0xff] }
 0x308   : > { %v2435_v0 = vrot.slane %v2310_v16, 7  ;;  %2771 = vrot.lane.b32.xlu0 %v7182_v27, %s5379_s25 }
 0x309   : > { %v2437_v40 = vrot.slane %v2311_v45, 7  ;;  %v1911_v56 = vpop.permute.xlu1 %1910 }
 0x30a   : > { %v2436_v26 = vsel %vm2363_vm7, %v2434_v15, %v2435_v0  ;;  %v1913_v33 = vpop.permute.xlu0 %1912  ;;  %v2009_v37 = vadd.f32 %v1911_v56, %v6902_v41  ;;  %v7236_v41 = vld [vmem:[#allocation3 + $0x118] sm:$0xff] }
 0x30b   : > { %v2511_v48 = vadd.f32 %v7202_v13, %v2436_v26  ;;  %v2438_v10 = vsel %vm2363_vm7, %v2435_v0, %v2437_v40  ;;  %2971 = vrot.lane.b32.xlu1 %v7217_v52, %s5380_s30  ;;  %v2010_v36 = vadd.f32 %v6892_v23, %v1913_v33  ;;  %v7254_v26 = vld [vmem:[#allocation3 + $0x128] sm:$0xff] }
 0x30c   : > { %v2512_v14 = vadd.f32 %v7202_v13, %v2438_v10  ;;  %2973 = vrot.lane.b32.xlu0 %v7223_v50, %s5380_s30  ;;  %v7261_v10 = vld [vmem:[#allocation3 + $0x130] sm:$0xff] }
 0x30d   : > { %v2543_v1 = vmax.f32 %v2511_v48, 0.0  ;;  %v2214_v63 = vpop.permute.xlu1 %2213 }
 0x30e   : > { %v2544_v12 = vmax.f32 %v2512_v14, 0.0  ;;  %v2312_v8 = vadd.f32 %v2214_v63, %v2009_v37  ;;  %v2216_v22 = vpop.permute.xlu0 %2215  ;;  %v7272_v63 = vld [vmem:[#allocation3 + $0x140] sm:$0xff] }
 0x30f   : > { %2575 = vst.msk [vmem:[#allocation3 + $0x1e8] sm:$0xff] %vm225_vm1, %v2543_v1  ;;  %v2313_v9 = vadd.f32 %v2216_v22, %v2010_v36  ;;  %2773 = vrot.lane.b32.xlu1 %v7193_v2, %s5379_s25  ;;  %v2580_v22 = vld [vmem:[#allocation3 + $0x8] sm:$0xff] }
 0x310   : > { %2576 = vst.msk [vmem:[#allocation3 + $0x1f0] sm:$0xff] %vm225_vm1, %v2544_v12  ;;  %v2439_v32 = vrot.slane %v2312_v8, 7  ;;  %2775 = vrot.lane.b32.xlu0 %v7195_v35, %s5379_s25  ;;  %v2581_v8 = vld [vmem:[#allocation3 + $0x10] sm:$0xff] }
 0x311   : > { %v2440_v29 = vrot.slane %v2313_v9, 7  ;;  %v1915_v23 = vpop.permute.xlu1 %1914 }
 0x312   : > { %v2720_v49 = vpop.permute.xlu0 %2719  ;;  %v2011_v58 = vadd.f32 %v1915_v23, %v6924_v3 }
 0x313   : > { %v2441_v7 = vsel %vm2363_vm7, %v2439_v32, %v2440_v29  ;;  %2975 = vrot.lane.b32.xlu1 %v7236_v41, %s5380_s30  ;;  %v3119_v15 = vsel %vm225_vm1, %v2579_v24, %v2720_v49  ;;  %v2582_v49 = vld [vmem:[#allocation3 + $0x18] sm:$0xff] }
 0x314   : > { %v2513_v21 = vadd.f32 %v7202_v13, %v2441_v7  ;;  %2977 = vrot.lane.b32.xlu0 %v7238_v55, %s5380_s30 }
 0x315   : > { %v2218_v59 = vpop.permute.xlu1 %2217 }
 0x316   : > { %v2545_v16 = vmax.f32 %v2513_v21, 0.0  ;;  %v2314_v28 = vadd.f32 %v2218_v59, %v2011_v58  ;;  %v2728_v45 = vpop.permute.xlu0 %2727 }
 0x317   : > { %2777 = vrot.lane.b32.xlu1 %v7217_v52, %s5379_s25  ;;  %v3123_v58 = vsel %vm225_vm1, %v6957_v53, %v2728_v45 }
 0x318   : > { %2577 = vst.msk [vmem:[#allocation3 + $0x208] sm:$0xff] %vm225_vm1, %v2545_v16  ;;  %v2442_v0 = vrot.slane %v2314_v28, 7  ;;  %2779 = vrot.lane.b32.xlu0 %v7223_v50, %s5379_s25  ;;  %v7291_v28 = vld [vmem:[#allocation3 + $0x148] sm:$0xff] }
 0x319   : > { %v2922_v3 = vpop.permute.xlu1 %2921 }
 0x31a   : > { %v2443_v40 = vsel %vm2363_vm7, %v2440_v29, %v2442_v0  ;;  %v2930_v56 = vpop.permute.xlu0 %2929  ;;  %v3185_v33 = vsel %vm981_vm3, %v3119_v15, %v2922_v3  ;;  %v7296_v0 = vld [vmem:[#allocation3 + $0x150] sm:$0xff] }
 0x31b   : > { %v2514_v48 = vadd.f32 %v7202_v13, %v2443_v40  ;;  %2979 = vrot.lane.b32.xlu1 %v7254_v26, %s5380_s30  ;;  %5256 = vmatprep.mubr.msk.f32.mxu1 %vm1050_vm4, %v3185_v33  ;;  %v7270_v13 = vld [vmem:[#allocation3 + $0x138] sm:$0xff]  ;;  %v3189_v3 = vsel %vm981_vm3, %v3123_v58, %v2930_v56 }
 0x31c   : > { %2981 = vrot.lane.b32.xlu0 %v7261_v10, %s5380_s30  ;;  %v7307_v40 = vld [vmem:[#allocation3 + $0x158] sm:$0xff] }
 0x31d   : > { %v2546_v14 = vmax.f32 %v2514_v48, 0.0  ;;  %v2726_v37 = vpop.permute.xlu1 %2725  ;;  %v7309_v48 = vld [vmem:[#allocation3 + $0x160] sm:$0xff] }
 0x31e   : > { %v2724_v1 = vpop.permute.xlu0 %2723  ;;  %v3122_v59 = vsel %vm225_vm1, %v2582_v49, %v2726_v37 }
 0x31f   : > { %2578 = vst.msk [vmem:[#allocation3 + $0x210] sm:$0xff] %vm225_vm1, %v2546_v14  ;;  %2781 = vrot.lane.b32.xlu1 %v7236_v41, %s5379_s25  ;;  %v3121_v32 = vsel %vm225_vm1, %v2581_v8, %v2724_v1 }
 0x320   : > { %2783 = vrot.lane.b32.xlu0 %v7238_v55, %s5379_s25 }
 0x321   : > { %v2928_v36 = vpop.permute.xlu1 %2927 }
 0x322   : > { %v2924_v12 = vpop.permute.xlu0 %2923  ;;  %v3188_v15 = vsel %vm981_vm3, %v3122_v59, %v2928_v36 }
 0x323   : > { %2983 = vrot.lane.b32.xlu1 %v7270_v13, %s5380_s30 }
 0x324   : > { %2985 = vrot.lane.b32.xlu0 %v7272_v63, %s5380_s30 }
 0x325   : > { %v2722_v9 = vpop.permute.xlu1 %2721 }
 0x326   : > { %v3120_v29 = vsel %vm225_vm1, %v2580_v22, %v2722_v9  ;;  %v2926_v23 = vpop.permute.xlu0 %2925 }
 0x327   : > { %v3187_v7 = vsel %vm981_vm3, %v3121_v32, %v2926_v23  ;;  %2785 = vrot.lane.b32.xlu1 %v7254_v26, %s5379_s25  ;;  %v3186_v21 = vsel %vm981_vm3, %v3120_v29, %v2924_v12  ;;  %v7333_v29 = vld [vmem:[#allocation3 + $0x168] sm:$0xff]  ;;  %v7338_v23 = vld [vmem:[#allocation3 + $0x170] sm:$0xff] }
 0x328   : > { %2787 = vrot.lane.b32.xlu0 %v7261_v10, %s5379_s25  ;;  %5257 = vmatmul.mubr.msk.f32.vlgmr.msra.gmra.mxu1 %vm1050_vm4, %v3186_v21 }
 0x329   : > { %v2730_v24 = vpop.permute.xlu1 %2729  ;;  %5259 = vmatprep.mubr.msk.f32.mxu1 %vm1050_vm4, %v3187_v7 }
 0x32a   : > { %v2732_v16 = vpop.permute.xlu0 %2731  ;;  %v3124_v14 = vsel %vm225_vm1, %v7015_v4, %v2730_v24 }
 0x32b   : > { %2987 = vrot.lane.b32.xlu1 %v7291_v28, %s5380_s30  ;;  %v3125_v1 = vsel %vm225_vm1, %v6998_v57, %v2732_v16  ;;  %v7357_v16 = vld [vmem:[#allocation3 + $0x180] sm:$0xff] }
 0x32c   : > { %2989 = vrot.lane.b32.xlu0 %v7296_v0, %s5380_s30  ;;  %5260 = vmatmul.mubr.msk.f32.gmra.mxu1 %vm1050_vm4, %v3188_v15 }
 0x32d   : > { %v2734_v53 = vpop.permute.xlu1 %2733  ;;  %5262 = vmatprep.mubr.msk.f32.mxu1 %vm1050_vm4, %v3189_v3 }
 0x32e   : > { %v2934_v45 = vpop.permute.xlu0 %2933  ;;  %v3126_v57 = vsel %vm225_vm1, %v6991_v18, %v2734_v53 }
 0x32f   : > { %2789 = vrot.lane.b32.xlu1 %v7270_v13, %s5379_s25  ;;  %v3191_v22 = vsel %vm981_vm3, %v3125_v1, %v2934_v45 }
 0x330   : > { %2791 = vrot.lane.b32.xlu0 %v7272_v63, %s5379_s25 }
 0x331   : > { %v2936_v33 = vpop.permute.xlu1 %2935 }
 0x332   : > { %v2736_v56 = vpop.permute.xlu0 %2735  ;;  %v3192_v9 = vsel %vm981_vm3, %v3126_v57, %v2936_v33 }
 0x333   : > { %2991 = vrot.lane.b32.xlu1 %v7307_v40, %s5380_s30  ;;  %v3127_v36 = vsel %vm225_vm1, %v6965_v17, %v2736_v56 }
 0x334   : > { %2993 = vrot.lane.b32.xlu0 %v7309_v48, %s5380_s30 }
 0x335   : > { %v2932_v37 = vpop.permute.xlu1 %2931 }
 0x336   : > { %v3190_v12 = vsel %vm981_vm3, %v3124_v14, %v2932_v37  ;;  %v2938_v8 = vpop.permute.xlu0 %2937  ;;  %v7375_v37 = vld [vmem:[#allocation3 + $0x188] sm:$0xff] }
 0x337   : > { %2793 = vrot.lane.b32.xlu1 %v7291_v28, %s5379_s25  ;;  %5263 = vmatmul.mubr.msk.f32.gmra.mxu1 %vm1050_vm4, %v3190_v12  ;;  %v3193_v17 = vsel %vm981_vm3, %v3127_v36, %v2938_v8 }
 0x338   : > { %2795 = vrot.lane.b32.xlu0 %v7296_v0, %s5379_s25  ;;  %5265 = vmatprep.mubr.msk.f32.mxu1 %vm1050_vm4, %v3191_v22 }
 0x339   : > { %v2738_v4 = vpop.permute.xlu1 %2737 }
 0x33a   : > { %v2740_v32 = vpop.permute.xlu0 %2739  ;;  %v3128_v18 = vsel %vm225_vm1, %v7010_v62, %v2738_v4  ;;  %v7355_v62 = vld [vmem:[#allocation3 + $0x178] sm:$0xff]  ;;  %v7397_v4 = vld [vmem:[#allocation3 + $0x1a0] sm:$0xff] }
 0x33b   : > { %2995 = vrot.lane.b32.xlu1 %v7333_v29, %s5380_s30  ;;  %5266 = vmatmul.mubr.msk.f32.gmra.mxu1 %vm1050_vm4, %v3192_v9  ;;  %v3129_v7 = vsel %vm225_vm1, %v7020_v5, %v2740_v32 }
 0x33c   : > { %2997 = vrot.lane.b32.xlu0 %v7338_v23, %s5380_s30  ;;  %5268 = vmatprep.mubr.msk.f32.mxu1 %vm1050_vm4, %v3193_v17 }
 0x33d   : > { %v2940_v49 = vpop.permute.xlu1 %2939 }
 0x33e   : > { %v3194_v21 = vsel %vm981_vm3, %v3128_v18, %v2940_v49  ;;  %v2942_v58 = vpop.permute.xlu0 %2941 }
 0x33f   : > { %v3195_v24 = vsel %vm981_vm3, %v3129_v7, %v2942_v58  ;;  %2797 = vrot.lane.b32.xlu1 %v7307_v40, %s5379_s25  ;;  %5269 = vmatmul.mubr.msk.f32.gmra.mxu1 %vm1050_vm4, %v3194_v21 }
 0x340   : > { %2799 = vrot.lane.b32.xlu0 %v7309_v48, %s5379_s25  ;;  %5271 = vmatprep.mubr.msk.f32.mxu1 %vm1050_vm4, %v3195_v24  ;;  %v7415_v24 = vld [vmem:[#allocation3 + $0x1a8] sm:$0xff] }
 0x341   : > { %v2742_v59 = vpop.permute.xlu1 %2741 }
 0x342   : > { %v2744_v5 = vpop.permute.xlu0 %2743  ;;  %v3130_v3 = vsel %vm225_vm1, %v7004_v44, %v2742_v59  ;;  %v7379_v44 = vld [vmem:[#allocation3 + $0x190] sm:$0xff] }
 0x343   : > { %2999 = vrot.lane.b32.xlu1 %v7355_v62, %s5380_s30  ;;  %v3131_v15 = vsel %vm225_vm1, %v6980_v38, %v2744_v5 }
 0x344   : > { %3001 = vrot.lane.b32.xlu0 %v7357_v16, %s5380_s30 }
 0x345   : > { %v2944_v53 = vpop.permute.xlu1 %2943 }
 0x346   : > { %v3196_v45 = vsel %vm981_vm3, %v3130_v3, %v2944_v53  ;;  %v2946_v33 = vpop.permute.xlu0 %2945 }
 0x347   : > { %v3197_v56 = vsel %vm981_vm3, %v3131_v15, %v2946_v33  ;;  %2801 = vrot.lane.b32.xlu1 %v7333_v29, %s5379_s25  ;;  %5272 = vmatmul.mubr.msk.f32.gmra.mxu1 %vm1050_vm4, %v3196_v45 }
 0x348   : > { %2803 = vrot.lane.b32.xlu0 %v7338_v23, %s5379_s25  ;;  %5274 = vmatprep.mubr.msk.f32.mxu1 %vm1050_vm4, %v3197_v56  ;;  %v7437_v56 = vld [vmem:[#allocation3 + $0x1c0] sm:$0xff] }
 0x349   : > { %v2746_v38 = vpop.permute.xlu1 %2745 }
 0x34a   : > { %v2748_v14 = vpop.permute.xlu0 %2747  ;;  %v3132_v1 = vsel %vm225_vm1, %v7052_v42, %v2746_v38  ;;  %v7395_v42 = vld [vmem:[#allocation3 + $0x198] sm:$0xff] }
 0x34b   : > { %3003 = vrot.lane.b32.xlu1 %v7375_v37, %s5380_s30  ;;  %v3133_v12 = vsel %vm225_vm1, %v7036_v34, %v2748_v14 }
 0x34c   : > { %3005 = vrot.lane.b32.xlu0 %v7379_v44, %s5380_s30 }
 0x34d   : > { %v2948_v36 = vpop.permute.xlu1 %2947 }
 0x34e   : > { %v3198_v8 = vsel %vm981_vm3, %v3132_v1, %v2948_v36  ;;  %v2950_v22 = vpop.permute.xlu0 %2949 }
 0x34f   : > { %v3199_v57 = vsel %vm981_vm3, %v3133_v12, %v2950_v22  ;;  %2805 = vrot.lane.b32.xlu1 %v7355_v62, %s5379_s25  ;;  %5275 = vmatmul.mubr.msk.f32.gmra.mxu1 %vm1050_vm4, %v3198_v8 }
 0x350   : > { %2807 = vrot.lane.b32.xlu0 %v7357_v16, %s5379_s25  ;;  %5277 = vmatprep.mubr.msk.f32.mxu1 %vm1050_vm4, %v3199_v57  ;;  %v7455_v57 = vld [vmem:[#allocation3 + $0x1c8] sm:$0xff] }
 0x351   : > { %v2750_v17 = vpop.permute.xlu1 %2749 }
 0x352   : > { %v2752_v34 = vpop.permute.xlu0 %2751  ;;  %v3134_v32 = vsel %vm225_vm1, %v7041_v20, %v2750_v17  ;;  %v7419_v20 = vld [vmem:[#allocation3 + $0x1b0] sm:$0xff] }
 0x353   : > { %3007 = vrot.lane.b32.xlu1 %v7395_v42, %s5380_s30  ;;  %v3135_v9 = vsel %vm225_vm1, %v7049_v46, %v2752_v34 }
 0x354   : > { %3009 = vrot.lane.b32.xlu0 %v7397_v4, %s5380_s30 }
 0x355   : > { %v2952_v18 = vpop.permute.xlu1 %2951 }
 0x356   : > { %v3200_v49 = vsel %vm981_vm3, %v3134_v32, %v2952_v18  ;;  %v2954_v7 = vpop.permute.xlu0 %2953 }
 0x357   : > { %v3201_v21 = vsel %vm981_vm3, %v3135_v9, %v2954_v7  ;;  %2809 = vrot.lane.b32.xlu1 %v7375_v37, %s5379_s25  ;;  %5278 = vmatmul.mubr.msk.f32.gmra.mxu1 %vm1050_vm4, %v3200_v49 }
 0x358   : > { %2811 = vrot.lane.b32.xlu0 %v7379_v44, %s5379_s25  ;;  %5280 = vmatprep.mubr.msk.f32.mxu1 %vm1050_vm4, %v3201_v21  ;;  %v7477_v21 = vld [vmem:[#allocation3 + $0x1e0] sm:$0xff] }
 0x359   : > { %v2754_v46 = vpop.permute.xlu1 %2753 }
 0x35a   : > { %v2756_v58 = vpop.permute.xlu0 %2755  ;;  %v3136_v59 = vsel %vm225_vm1, %v7069_v54, %v2754_v46  ;;  %v7435_v54 = vld [vmem:[#allocation3 + $0x1b8] sm:$0xff] }
 0x35b   : > { %3011 = vrot.lane.b32.xlu1 %v7415_v24, %s5380_s30  ;;  %v3137_v15 = vsel %vm225_vm1, %v7074_v61, %v2756_v58 }
 0x35c   : > { %3013 = vrot.lane.b32.xlu0 %v7419_v20, %s5380_s30 }
 0x35d   : > { %v2956_v5 = vpop.permute.xlu1 %2955 }
 0x35e   : > { %v3202_v3 = vsel %vm981_vm3, %v3136_v59, %v2956_v5  ;;  %v2958_v53 = vpop.permute.xlu0 %2957 }
 0x35f   : > { %v3203_v45 = vsel %vm981_vm3, %v3137_v15, %v2958_v53  ;;  %2813 = vrot.lane.b32.xlu1 %v7395_v42, %s5379_s25  ;;  %5281 = vmatmul.mubr.msk.f32.gmra.mxu1 %vm1050_vm4, %v3202_v3 }
 0x360   : > { %2815 = vrot.lane.b32.xlu0 %v7397_v4, %s5379_s25  ;;  %5283 = vmatprep.mubr.msk.f32.mxu1 %vm1050_vm4, %v3203_v45  ;;  %v7495_v45 = vld [vmem:[#allocation3 + $0x1e8] sm:$0xff] }
 0x361   : > { %v2758_v33 = vpop.permute.xlu1 %2757 }
 0x362   : > { %v2760_v61 = vpop.permute.xlu0 %2759  ;;  %v3138_v14 = vsel %vm225_vm1, %v7085_v11, %v2758_v33  ;;  %v7459_v11 = vld [vmem:[#allocation3 + $0x1d0] sm:$0xff] }
 0x363   : > { %3015 = vrot.lane.b32.xlu1 %v7435_v54, %s5380_s30  ;;  %v3139_v38 = vsel %vm225_vm1, %v7087_v60, %v2760_v61 }
 0x364   : > { %3017 = vrot.lane.b32.xlu0 %v7437_v56, %s5380_s30 }
 0x365   : > { %v2960_v1 = vpop.permute.xlu1 %2959 }
 0x366   : > { %v3204_v36 = vsel %vm981_vm3, %v3138_v14, %v2960_v1  ;;  %v2962_v12 = vpop.permute.xlu0 %2961 }
 0x367   : > { %v3205_v8 = vsel %vm981_vm3, %v3139_v38, %v2962_v12  ;;  %2817 = vrot.lane.b32.xlu1 %v7415_v24, %s5379_s25  ;;  %5284 = vmatmul.mubr.msk.f32.gmra.mxu1 %vm1050_vm4, %v3204_v36 }
 0x368   : > { %2819 = vrot.lane.b32.xlu0 %v7419_v20, %s5379_s25  ;;  %5286 = vmatprep.mubr.msk.f32.mxu1 %vm1050_vm4, %v3205_v8  ;;  %v7517_v8 = vld [vmem:[#allocation3 + $0x200] sm:$0xff] }
 0x369   : > { %v2762_v60 = vpop.permute.xlu1 %2761 }
 0x36a   : > { %v2764_v22 = vpop.permute.xlu0 %2763  ;;  %v3140_v17 = vsel %vm225_vm1, %v7104_v43, %v2762_v60  ;;  %v7475_v43 = vld [vmem:[#allocation3 + $0x1d8] sm:$0xff] }
 0x36b   : > { %3019 = vrot.lane.b32.xlu1 %v7455_v57, %s5380_s30  ;;  %v3141_v9 = vsel %vm225_vm1, %v7110_v25, %v2764_v22 }
 0x36c   : > { %3021 = vrot.lane.b32.xlu0 %v7459_v11, %s5380_s30 }
 0x36d   : > { %v2964_v34 = vpop.permute.xlu1 %2963 }
 0x36e   : > { %v3206_v32 = vsel %vm981_vm3, %v3140_v17, %v2964_v34  ;;  %v2966_v18 = vpop.permute.xlu0 %2965 }
 0x36f   : > { %v3207_v49 = vsel %vm981_vm3, %v3141_v9, %v2966_v18  ;;  %2821 = vrot.lane.b32.xlu1 %v7435_v54, %s5379_s25  ;;  %5287 = vmatmul.mubr.msk.f32.gmra.mxu1 %vm1050_vm4, %v3206_v32 }
 0x370   : > { %2823 = vrot.lane.b32.xlu0 %v7437_v56, %s5379_s25  ;;  %5289 = vmatprep.mubr.msk.f32.mxu1 %vm1050_vm4, %v3207_v49  ;;  %v7535_v49 = vld [vmem:[#allocation3 + $0x208] sm:$0xff] }
 0x371   : > { %v2766_v7 = vpop.permute.xlu1 %2765 }
 0x372   : > { %v2768_v25 = vpop.permute.xlu0 %2767  ;;  %v3142_v58 = vsel %vm225_vm1, %v7123_v6, %v2766_v7  ;;  %v7499_v6 = vld [vmem:[#allocation3 + $0x1f0] sm:$0xff] }
 0x373   : > { %3023 = vrot.lane.b32.xlu1 %v7475_v43, %s5380_s30  ;;  %v3143_v46 = vsel %vm225_vm1, %v7125_v39, %v2768_v25 }
 0x374   : > { %3025 = vrot.lane.b32.xlu0 %v7477_v21, %s5380_s30 }
 0x375   : > { %v2968_v59 = vpop.permute.xlu1 %2967 }
 0x376   : > { %v3208_v5 = vsel %vm981_vm3, %v3142_v58, %v2968_v59  ;;  %v2970_v15 = vpop.permute.xlu0 %2969 }
 0x377   : > { %v3209_v3 = vsel %vm981_vm3, %v3143_v46, %v2970_v15  ;;  %2825 = vrot.lane.b32.xlu1 %v7455_v57, %s5379_s25  ;;  %5290 = vmatmul.mubr.msk.f32.gmra.mxu1 %vm1050_vm4, %v3208_v5 }
 0x378   : > { %2827 = vrot.lane.b32.xlu0 %v7459_v11, %s5379_s25  ;;  %5292 = vmatprep.mubr.msk.f32.mxu1 %vm1050_vm4, %v3209_v3  ;;  %v2647_v3 = vld [vmem:[#allocation3 + $0x220] sm:$0xff] }
 0x379   : > { %v2770_v39 = vpop.permute.xlu1 %2769 }
 0x37a   : > { %v2772_v53 = vpop.permute.xlu0 %2771  ;;  %v3144_v33 = vsel %vm225_vm1, %v7141_v30, %v2770_v39  ;;  %v7515_v30 = vld [vmem:[#allocation3 + $0x1f8] sm:$0xff] }
 0x37b   : > { %3027 = vrot.lane.b32.xlu1 %v7495_v45, %s5380_s30  ;;  %v3145_v38 = vsel %vm225_vm1, %v7146_v19, %v2772_v53 }
 0x37c   : > { %3029 = vrot.lane.b32.xlu0 %v7499_v6, %s5380_s30 }
 0x37d   : > { %v2972_v61 = vpop.permute.xlu1 %2971 }
 0x37e   : > { %v3210_v14 = vsel %vm981_vm3, %v3144_v33, %v2972_v61  ;;  %v2974_v1 = vpop.permute.xlu0 %2973 }
 0x37f   : > { %v3211_v36 = vsel %vm981_vm3, %v3145_v38, %v2974_v1  ;;  %2829 = vrot.lane.b32.xlu1 %v7475_v43, %s5379_s25  ;;  %5293 = vmatmul.mubr.msk.f32.gmra.mxu1 %vm1050_vm4, %v3210_v14  ;;  %v2648_v1 = vld [vmem:[#allocation3 + $0x228] sm:$0xff] }
 0x380   : > { %2831 = vrot.lane.b32.xlu0 %v7477_v21, %s5379_s25  ;;  %5295 = vmatprep.mubr.msk.f32.mxu1 %vm1050_vm4, %v3211_v36  ;;  %v2649_v36 = vld [vmem:[#allocation3 + $0x230] sm:$0xff] }
 0x381   : > { %v2774_v12 = vpop.permute.xlu1 %2773 }
 0x382   : > { %v2776_v19 = vpop.permute.xlu0 %2775  ;;  %v3146_v22 = vsel %vm225_vm1, %v7157_v47, %v2774_v12  ;;  %v2645_v47 = vld [vmem:[#allocation3 + $0x210] sm:$0xff] }
 0x383   : > { %3031 = vrot.lane.b32.xlu1 %v7515_v30, %s5380_s30  ;;  %v3147_v60 = vsel %vm225_vm1, %v7159_v51, %v2776_v19 }
 0x384   : > { %3033 = vrot.lane.b32.xlu0 %v7517_v8, %s5380_s30 }
 0x385   : > { %v2976_v17 = vpop.permute.xlu1 %2975 }
 0x386   : > { %v3212_v34 = vsel %vm981_vm3, %v3146_v22, %v2976_v17  ;;  %v2978_v9 = vpop.permute.xlu0 %2977 }
 0x387   : > { %v3213_v32 = vsel %vm981_vm3, %v3147_v60, %v2978_v9  ;;  %2833 = vrot.lane.b32.xlu1 %v7495_v45, %s5379_s25  ;;  %5296 = vmatmul.mubr.msk.f32.gmra.mxu1 %vm1050_vm4, %v3212_v34  ;;  %v2650_v9 = vld [vmem:[#allocation3 + $0x238] sm:$0xff] }
 0x388   : > { %2835 = vrot.lane.b32.xlu0 %v7499_v6, %s5379_s25  ;;  %5298 = vmatprep.mubr.msk.f32.mxu1 %vm1050_vm4, %v3213_v32 }
 0x389   : > { %v2778_v51 = vpop.permute.xlu1 %2777 }
 0x38a   : > { %v2780_v18 = vpop.permute.xlu0 %2779  ;;  %v3148_v7 = vsel %vm225_vm1, %v7177_v31, %v2778_v51  ;;  %v2646_v31 = vld [vmem:[#allocation3 + $0x218] sm:$0xff] }
 0x38b   : > { %3035 = vrot.lane.b32.xlu1 %v7535_v49, %s5380_s30  ;;  %v3149_v46 = vsel %vm225_vm1, %v7182_v27, %v2780_v18 }
 0x38c   : > { %3037 = vrot.lane.b32.xlu0 %v2645_v47, %s5380_s30 }
 0x38d   : > { %v2980_v25 = vpop.permute.xlu1 %2979 }
 0x38e   : > { %v3214_v58 = vsel %vm981_vm3, %v3148_v7, %v2980_v25  ;;  %v2982_v59 = vpop.permute.xlu0 %2981 }
 0x38f   : > { %v3215_v5 = vsel %vm981_vm3, %v3149_v46, %v2982_v59  ;;  %2837 = vrot.lane.b32.xlu1 %v7515_v30, %s5379_s25  ;;  %5299 = vmatmul.mubr.msk.f32.gmra.mxu1 %vm1050_vm4, %v3214_v58  ;;  %v2652_v58 = vld [vmem:[#allocation3 + $0x248] sm:$0xff] }
 0x390   : > { %2839 = vrot.lane.b32.xlu0 %v7517_v8, %s5379_s25  ;;  %5301 = vmatprep.mubr.msk.f32.mxu1 %vm1050_vm4, %v3215_v5 }
 0x391   : > { %v2782_v15 = vpop.permute.xlu1 %2781 }
 0x392   : > { %v2784_v39 = vpop.permute.xlu0 %2783  ;;  %v3150_v53 = vsel %vm225_vm1, %v7193_v2, %v2782_v15 }
 0x393   : > { %3039 = vrot.lane.b32.xlu1 %v2646_v31, %s5380_s30  ;;  %v3151_v27 = vsel %vm225_vm1, %v7195_v35, %v2784_v39 }
 0x394   : > { %3041 = vrot.lane.b32.xlu0 %v2647_v3, %s5380_s30 }
 0x395   : > { %v2984_v33 = vpop.permute.xlu1 %2983 }
 0x396   : > { %v3216_v61 = vsel %vm981_vm3, %v3150_v53, %v2984_v33  ;;  %v2986_v38 = vpop.permute.xlu0 %2985 }
 0x397   : > { %v3217_v14 = vsel %vm981_vm3, %v3151_v27, %v2986_v38  ;;  %2841 = vrot.lane.b32.xlu1 %v7535_v49, %s5379_s25  ;;  %5302 = vmatmul.mubr.msk.f32.gmra.mxu1 %vm1050_vm4, %v3216_v61 }
 0x398   : > { %2843 = vrot.lane.b32.xlu0 %v2645_v47, %s5379_s25  ;;  %5304 = vmatprep.mubr.msk.f32.mxu1 %vm1050_vm4, %v3217_v14 }
 0x399   : > { %v2786_v35 = vpop.permute.xlu1 %2785 }
 0x39a   : > { %v2788_v12 = vpop.permute.xlu0 %2787  ;;  %v3152_v2 = vsel %vm225_vm1, %v7217_v52, %v2786_v35  ;;  %v2651_v52 = vld [vmem:[#allocation3 + $0x240] sm:$0xff] }
 0x39b   : > { %3043 = vrot.lane.b32.xlu1 %v2648_v1, %s5380_s30  ;;  %v3153_v60 = vsel %vm225_vm1, %v7223_v50, %v2788_v12 }
 0x39c   : > { %3045 = vrot.lane.b32.xlu0 %v2649_v36, %s5380_s30 }
 0x39d   : > { %v2988_v19 = vpop.permute.xlu1 %2987 }
 0x39e   : > { %v3218_v22 = vsel %vm981_vm3, %v3152_v2, %v2988_v19  ;;  %v2990_v17 = vpop.permute.xlu0 %2989 }
 0x39f   : > { %v3219_v34 = vsel %vm981_vm3, %v3153_v60, %v2990_v17  ;;  %2845 = vrot.lane.b32.xlu1 %v2646_v31, %s5379_s25  ;;  %5305 = vmatmul.mubr.msk.f32.gmra.mxu1 %vm1050_vm4, %v3218_v22 }
 0x3a0   : > { %5307 = vmatprep.mubr.msk.f32.mxu1 %vm1050_vm4, %v3219_v34  ;;  %2847 = vrot.lane.b32.xlu0 %v2647_v3, %s5379_s25 }
 0x3a1   : > { %v2790_v32 = vpop.permute.xlu1 %2789 }
 0x3a2   : > { %v2792_v51 = vpop.permute.xlu0 %2791  ;;  %v3154_v18 = vsel %vm225_vm1, %v7236_v41, %v2790_v32 }
 0x3a3   : > { %3047 = vrot.lane.b32.xlu1 %v2650_v9, %s5380_s30  ;;  %v3155_v50 = vsel %vm225_vm1, %v7238_v55, %v2792_v51 }
 0x3a4   : > { %3049 = vrot.lane.b32.xlu0 %v2651_v52, %s5380_s30 }
 0x3a5   : > { %v2992_v47 = vpop.permute.xlu1 %2991 }
 0x3a6   : > { %v3220_v7 = vsel %vm981_vm3, %v3154_v18, %v2992_v47  ;;  %v2994_v25 = vpop.permute.xlu0 %2993 }
 0x3a7   : > { %v3221_v46 = vsel %vm981_vm3, %v3155_v50, %v2994_v25  ;;  %2849 = vrot.lane.b32.xlu1 %v2648_v1, %s5379_s25  ;;  %5308 = vmatmul.mubr.msk.f32.gmra.mxu1 %vm1050_vm4, %v3220_v7 }
 0x3a8   : > { %5310 = vmatprep.mubr.msk.f32.mxu1 %vm1050_vm4, %v3221_v46 }
 0x3a9   : > { %v2794_v59 = vpop.permute.xlu1 %2793 }
 0x3aa   : > { %v2796_v55 = vpop.permute.xlu0 %2795  ;;  %v3156_v41 = vsel %vm225_vm1, %v7254_v26, %v2794_v59 }
 0x3ab   : > { %3051 = vrot.lane.b32.xlu1 %v2652_v58, %s5380_s30  ;;  %v3157_v31 = vsel %vm225_vm1, %v7261_v10, %v2796_v55 }
 0x3ad   : > { %v2996_v5 = vpop.permute.xlu1 %2995 }
 0x3ae   : > { %v3222_v15 = vsel %vm981_vm3, %v3156_v41, %v2996_v5  ;;  %v2998_v3 = vpop.permute.xlu0 %2997 }
 0x3af   : > { %v3223_v39 = vsel %vm981_vm3, %v3157_v31, %v2998_v3  ;;  %5311 = vmatmul.mubr.msk.f32.gmra.mxu1 %vm1050_vm4, %v3222_v15 }
 0x3b0   : > { %5313 = vmatprep.mubr.msk.f32.mxu1 %vm1050_vm4, %v3223_v39 }
 0x3b1   : > { %v2798_v27 = vpop.permute.xlu1 %2797 }
 0x3b2   : > { %v2800_v53 = vpop.permute.xlu0 %2799  ;;  %v3158_v26 = vsel %vm225_vm1, %v7270_v13, %v2798_v27 }
 0x3b3   : > { %v3159_v33 = vsel %vm225_vm1, %v7272_v63, %v2800_v53 }
 0x3b5   : > { %v3000_v61 = vpop.permute.xlu1 %2999 }
 0x3b6   : > { %v3224_v10 = vsel %vm981_vm3, %v3158_v26, %v3000_v61  ;;  %v3002_v38 = vpop.permute.xlu0 %3001 }
 0x3b7   : > { %v3225_v14 = vsel %vm981_vm3, %v3159_v33, %v3002_v38  ;;  %5314 = vmatmul.mubr.msk.f32.gmra.mxu1 %vm1050_vm4, %v3224_v10 }
 0x3b8   : > { %5316 = vmatprep.mubr.msk.f32.mxu1 %vm1050_vm4, %v3225_v14 }
 0x3b9   : > { %v2802_v1 = vpop.permute.xlu1 %2801 }
 0x3ba   : > { %v2804_v35 = vpop.permute.xlu0 %2803  ;;  %v3160_v36 = vsel %vm225_vm1, %v7291_v28, %v2802_v1 }
 0x3bb   : > { %v3161_v63 = vsel %vm225_vm1, %v7296_v0, %v2804_v35 }
 0x3bd   : > { %v3004_v12 = vpop.permute.xlu1 %3003 }
 0x3be   : > { %v3226_v13 = vsel %vm981_vm3, %v3160_v36, %v3004_v12  ;;  %v3006_v2 = vpop.permute.xlu0 %3005 }
 0x3bf   : > { %v3227_v19 = vsel %vm981_vm3, %v3161_v63, %v3006_v2  ;;  %5317 = vmatmul.mubr.msk.f32.gmra.mxu1 %vm1050_vm4, %v3226_v13 }
 0x3c0   : > { %5319 = vmatprep.mubr.msk.f32.mxu1 %vm1050_vm4, %v3227_v19 }
 0x3c1   : > { %v2806_v60 = vpop.permute.xlu1 %2805 }
 0x3c2   : > { %v2808_v22 = vpop.permute.xlu0 %2807  ;;  %v3162_v28 = vsel %vm225_vm1, %v7307_v40, %v2806_v60 }
 0x3c3   : > { %v3163_v17 = vsel %vm225_vm1, %v7309_v48, %v2808_v22 }
 0x3c5   : > { %v3008_v34 = vpop.permute.xlu1 %3007 }
 0x3c6   : > { %v3228_v0 = vsel %vm981_vm3, %v3162_v28, %v3008_v34  ;;  %v3010_v9 = vpop.permute.xlu0 %3009 }
 0x3c7   : > { %v3229_v32 = vsel %vm981_vm3, %v3163_v17, %v3010_v9  ;;  %5320 = vmatmul.mubr.msk.f32.gmra.mxu1 %vm1050_vm4, %v3228_v0 }
 0x3c8   : > { %5322 = vmatprep.mubr.msk.f32.mxu1 %vm1050_vm4, %v3229_v32 }
 0x3c9   : > { %v2810_v52 = vpop.permute.xlu1 %2809 }
 0x3ca   : > { %v2812_v51 = vpop.permute.xlu0 %2811  ;;  %v3164_v50 = vsel %vm225_vm1, %v7333_v29, %v2810_v52 }
 0x3cb   : > { %v3165_v48 = vsel %vm225_vm1, %v7338_v23, %v2812_v51 }
 0x3cd   : > { %v3012_v18 = vpop.permute.xlu1 %3011 }
 0x3ce   : > { %v3230_v40 = vsel %vm981_vm3, %v3164_v50, %v3012_v18  ;;  %v3014_v47 = vpop.permute.xlu0 %3013 }
 0x3cf   : > { %v3231_v7 = vsel %vm981_vm3, %v3165_v48, %v3014_v47  ;;  %5323 = vmatmul.mubr.msk.f32.gmra.mxu1 %vm1050_vm4, %v3230_v40 }
 0x3d0   : > { %5325 = vmatprep.mubr.msk.f32.mxu1 %vm1050_vm4, %v3231_v7 }
 0x3d1   : > { %v2814_v25 = vpop.permute.xlu1 %2813 }
 0x3d2   : > { %v2816_v46 = vpop.permute.xlu0 %2815  ;;  %v3166_v29 = vsel %vm225_vm1, %v7355_v62, %v2814_v25 }
 0x3d3   : > { %v3167_v58 = vsel %vm225_vm1, %v7357_v16, %v2816_v46 }
 0x3d5   : > { %v3016_v59 = vpop.permute.xlu1 %3015 }
 0x3d6   : > { %v3232_v23 = vsel %vm981_vm3, %v3166_v29, %v3016_v59  ;;  %v3018_v55 = vpop.permute.xlu0 %3017 }
 0x3d7   : > { %v3233_v41 = vsel %vm981_vm3, %v3167_v58, %v3018_v55  ;;  %5326 = vmatmul.mubr.msk.f32.gmra.mxu1 %vm1050_vm4, %v3232_v23 }
 0x3d8   : > { %5328 = vmatprep.mubr.msk.f32.mxu1 %vm1050_vm4, %v3233_v41 }
 0x3d9   : > { %v2818_v5 = vpop.permute.xlu1 %2817 }
 0x3da   : > { %v2820_v31 = vpop.permute.xlu0 %2819  ;;  %v3168_v15 = vsel %vm225_vm1, %v7375_v37, %v2818_v5 }
 0x3db   : > { %v3169_v16 = vsel %vm225_vm1, %v7379_v44, %v2820_v31 }
 0x3dd   : > { %v3020_v3 = vpop.permute.xlu1 %3019 }
 0x3de   : > { %v3234_v62 = vsel %vm981_vm3, %v3168_v15, %v3020_v3  ;;  %v3022_v39 = vpop.permute.xlu0 %3021 }
 0x3df   : > { %v3235_v27 = vsel %vm981_vm3, %v3169_v16, %v3022_v39  ;;  %5329 = vmatmul.mubr.msk.f32.gmra.mxu1 %vm1050_vm4, %v3234_v62 }
 0x3e0   : > { %5331 = vmatprep.mubr.msk.f32.mxu1 %vm1050_vm4, %v3235_v27 }
 0x3e1   : > { %v2822_v53 = vpop.permute.xlu1 %2821 }
 0x3e2   : > { %v2824_v33 = vpop.permute.xlu0 %2823  ;;  %v3170_v37 = vsel %vm225_vm1, %v7395_v42, %v2822_v53 }
 0x3e3   : > { %v3171_v26 = vsel %vm225_vm1, %v7397_v4, %v2824_v33 }
 0x3e5   : > { %v3024_v61 = vpop.permute.xlu1 %3023 }
 0x3e6   : > { %v3236_v44 = vsel %vm981_vm3, %v3170_v37, %v3024_v61  ;;  %v3026_v10 = vpop.permute.xlu0 %3025 }
 0x3e7   : > { %v3237_v38 = vsel %vm981_vm3, %v3171_v26, %v3026_v10  ;;  %5332 = vmatmul.mubr.msk.f32.gmra.mxu1 %vm1050_vm4, %v3236_v44 }
 0x3e8   : > { %v7652_v14 = vpop.f32.mrf.mxu1  ;;  %5334 = vmatprep.mubr.msk.f32.mxu1 %vm1050_vm4, %v3237_v38 }
 0x3e9   : > { %v3910_v1 = vrot.slane %v7652_v14, 1  ;;  %v2826_v35 = vpop.permute.xlu1 %2825  ;;  %v4212_v12 = vrot.slane %v7652_v14, 2 }
 0x3ea   : > { %v7656_v36 = vpop.f32.mrf.mxu1  ;;  %v2828_v4 = vpop.permute.xlu0 %2827  ;;  %v3172_v63 = vsel %vm225_vm1, %v7415_v24, %v2826_v35 }
 0x3eb   : > { %4020 = vrot.lane.b32.xlu0 %v3910_v1, %s5381_s6  ;;  %v3173_v2 = vsel %vm225_vm1, %v7419_v20, %v2828_v4 }
 0x3ec   : > { %v5261_v42 = vpop.f32.mrf.mxu1 }
 0x3ed   : > { %v3028_v13 = vpop.permute.xlu1 %3027  ;;  %v3913_v17 = vrot.slane %v5261_v42, 1  ;;  %v4215_v52 = vrot.slane %v5261_v42, 2 }
 0x3ee   : > { %v3238_v19 = vsel %vm981_vm3, %v3172_v63, %v3028_v13  ;;  %v7665_v60 = vpop.f32.mrf.mxu1  ;;  %v3030_v22 = vpop.permute.xlu0 %3029 }
 0x3ef   : > { %v3911_v28 = vrot.slane %v7665_v60, 1  ;;  %v3239_v34 = vsel %vm981_vm3, %v3173_v2, %v3030_v22  ;;  %4322 = vrot.lane.b32.xlu0 %v4212_v12, %s5382_s7  ;;  %5335 = vmatmul.mubr.msk.f32.gmra.mxu1 %vm1050_vm4, %v3238_v19  ;;  %v4213_v24 = vrot.slane %v7665_v60, 2 }
 0x3f0   : > { %5337 = vmatprep.mubr.msk.f32.mxu1 %vm1050_vm4, %v3239_v34 }
 0x3f1   : > { %v2830_v0 = vpop.permute.xlu1 %2829  ;;  %v3912_v20 = vsel %vm1709_vm5, %v3910_v1, %v3911_v28  ;;  %v3914_v9 = vsel %vm1709_vm5, %v3911_v28, %v3913_v17  ;;  %v4214_v48 = vsel %vm2012_vm6, %v4212_v12, %v4213_v24  ;;  %v4216_v7 = vsel %vm2012_vm6, %v4213_v24, %v4215_v52 }
 0x3f2   : > { %4022 = vrot.lane.b32.xlu1 %v3912_v20, %s5381_s6  ;;  %v2832_v32 = vpop.permute.xlu0 %2831  ;;  %v3174_v50 = vsel %vm225_vm1, %v7435_v54, %v2830_v0 }
 0x3f3   : > { %4024 = vrot.lane.b32.xlu0 %v3914_v9, %s5381_s6  ;;  %v3175_v51 = vsel %vm225_vm1, %v7437_v56, %v2832_v32 }
 0x3f5   : > { %v3032_v18 = vpop.permute.xlu1 %3031 }
 0x3f6   : > { %v3240_v40 = vsel %vm981_vm3, %v3174_v50, %v3032_v18  ;;  %4324 = vrot.lane.b32.xlu1 %v4214_v48, %s5382_s7  ;;  %v3034_v47 = vpop.permute.xlu0 %3033 }
 0x3f7   : > { %v3241_v25 = vsel %vm981_vm3, %v3175_v51, %v3034_v47  ;;  %v7686_v46 = vpop.f32.mrf.mxu1  ;;  %4326 = vrot.lane.b32.xlu0 %v4216_v7, %s5382_s7  ;;  %5338 = vmatmul.mubr.msk.f32.gmra.mxu1 %vm1050_vm4, %v3240_v40 }
 0x3f8   : > { %5340 = vmatprep.mubr.msk.f32.mxu1 %vm1050_vm4, %v3241_v25  ;;  %v3916_v58 = vrot.slane %v7686_v46, 1  ;;  %v4218_v3 = vrot.slane %v7686_v46, 2 }
 0x3f9   : > { %v2834_v54 = vpop.permute.xlu1 %2833  ;;  %v7691_v56 = vpop.f32.mrf.mxu1 }
 0x3fa   : > { %v3915_v29 = vrot.slane %v7691_v56, 1  ;;  %v2836_v59 = vpop.permute.xlu0 %2835  ;;  %v4217_v55 = vrot.slane %v7691_v56, 2  ;;  %v3176_v5 = vsel %vm225_vm1, %v7455_v57, %v2834_v54 }
 0x3fb   : > { %v5267_v23 = vpop.f32.mrf.mxu1  ;;  %v3177_v16 = vsel %vm225_vm1, %v7459_v11, %v2836_v59 }
 0x3fc   : > { %v3917_v41 = vsel %vm1709_vm5, %v3915_v29, %v3916_v58  ;;  %v4219_v26 = vsel %vm2012_vm6, %v4217_v55, %v4218_v3  ;;  %v3920_v44 = vrot.slane %v5267_v23, 1  ;;  %v4222_v63 = vrot.slane %v5267_v23, 2 }
 0x3fd   : > { %v3036_v31 = vpop.permute.xlu1 %3035  ;;  %4026 = vrot.lane.b32.xlu1 %v3917_v41, %s5381_s6  ;;  %v7700_v15 = vpop.f32.mrf.mxu1 }
 0x3fe   : > { %v3242_v62 = vsel %vm981_vm3, %v3176_v5, %v3036_v31  ;;  %v3918_v39 = vrot.slane %v7700_v15, 1  ;;  %v3038_v27 = vpop.permute.xlu0 %3037  ;;  %v4220_v57 = vrot.slane %v7700_v15, 2 }
 0x3ff   : > { %v3243_v53 = vsel %vm981_vm3, %v3177_v16, %v3038_v27  ;;  %v7708_v33 = vpop.f32.mrf.mxu1  ;;  %5341 = vmatmul.mubr.msk.f32.gmra.mxu1 %vm1050_vm4, %v3242_v62 }
 0x400   : > { %5343 = vmatprep.mubr.msk.f32.mxu1 %vm1050_vm4, %v3243_v53  ;;  %v3919_v37 = vsel %vm1709_vm5, %v3916_v58, %v3918_v39  ;;  %v3921_v35 = vsel %vm1709_vm5, %v3918_v39, %v3920_v44  ;;  %v4221_v4 = vsel %vm2012_vm6, %v4218_v3, %v4220_v57  ;;  %v3923_v13 = vrot.slane %v7708_v33, 1 }
 0x401   : > { %v2838_v11 = vpop.permute.xlu1 %2837  ;;  %4328 = vrot.lane.b32.xlu1 %v4219_v26, %s5382_s7  ;;  %v7716_v61 = vpop.f32.mrf.mxu1  ;;  %4028 = vrot.lane.b32.xlu0 %v3919_v37, %s5381_s6  ;;  %v4225_v0 = vrot.slane %v7708_v33, 2 }
 0x402   : > { %v2840_v10 = vpop.permute.xlu0 %2839  ;;  %v3922_v38 = vrot.slane %v7716_v61, 1  ;;  %v3178_v42 = vsel %vm225_vm1, %v7475_v43, %v2838_v11  ;;  %v4224_v17 = vrot.slane %v7716_v61, 2  ;;  %v4223_v43 = vsel %vm2012_vm6, %v4220_v57, %v4222_v63 }
 0x403   : > { %v3179_v1 = vsel %vm225_vm1, %v7477_v21, %v2840_v10 }
 0x404   : > { %v3924_v28 = vsel %vm1709_vm5, %v3922_v38, %v3923_v13  ;;  %v4226_v51 = vsel %vm2012_vm6, %v4224_v17, %v4225_v0 }
 0x405   : > { %v3040_v12 = vpop.permute.xlu1 %3039  ;;  %4030 = vrot.lane.b32.xlu1 %v3921_v35, %s5381_s6  ;;  %4330 = vrot.lane.b32.xlu0 %v4221_v4, %s5382_s7 }
 0x406   : > { %v3244_v2 = vsel %vm981_vm3, %v3178_v42, %v3040_v12  ;;  %v3042_v19 = vpop.permute.xlu0 %3041 }
 0x407   : > { %v3245_v21 = vsel %vm981_vm3, %v3179_v1, %v3042_v19  ;;  %v5273_v22 = vpop.f32.mrf.mxu1  ;;  %5344 = vmatmul.mubr.msk.f32.gmra.mxu1 %vm1050_vm4, %v3244_v2 }
 0x408   : > { %5346 = vmatprep.mubr.msk.f32.mxu1 %vm1050_vm4, %v3245_v21  ;;  %v3927_v48 = vrot.slane %v5273_v22, 1 }
 0x409   : > { %v2842_v34 = vpop.permute.xlu1 %2841  ;;  %4332 = vrot.lane.b32.xlu1 %v4223_v43, %s5382_s7  ;;  %v7737_v24 = vpop.f32.mrf.mxu1  ;;  %4032 = vrot.lane.b32.xlu0 %v3924_v28, %s5381_s6 }
 0x40a   : > { %v3925_v20 = vrot.slane %v7737_v24, 1  ;;  %v2844_v9 = vpop.permute.xlu0 %2843  ;;  %v4227_v32 = vrot.slane %v7737_v24, 2  ;;  %v3180_v50 = vsel %vm225_vm1, %v7495_v45, %v2842_v34 }
 0x40b   : > { %v3181_v40 = vsel %vm225_vm1, %v7499_v6, %v2844_v9  ;;  %v4229_v6 = vrot.slane %v5273_v22, 2 }
 0x40c   : > { %v3926_v52 = vsel %vm1709_vm5, %v3923_v13, %v3925_v20  ;;  %v4228_v45 = vsel %vm2012_vm6, %v4225_v0, %v4227_v32  ;;  %v3928_v58 = vsel %vm1709_vm5, %v3925_v20, %v3927_v48 }
 0x40d   : > { %v3044_v18 = vpop.permute.xlu1 %3043  ;;  %4034 = vrot.lane.b32.xlu1 %v3926_v52, %s5381_s6  ;;  %4334 = vrot.lane.b32.xlu0 %v4226_v51, %s5382_s7  ;;  %v4230_v3 = vsel %vm2012_vm6, %v4227_v32, %v4229_v6 }
 0x40e   : > { %v3246_v47 = vsel %vm981_vm3, %v3180_v50, %v3044_v18  ;;  %v3046_v7 = vpop.permute.xlu0 %3045 }
 0x40f   : > { %v3247_v25 = vsel %vm981_vm3, %v3181_v40, %v3046_v7  ;;  %v7753_v54 = vpop.f32.mrf.mxu1  ;;  %5347 = vmatmul.mubr.msk.f32.gmra.mxu1 %vm1050_vm4, %v3246_v47 }
 0x410   : > { %5349 = vmatprep.mubr.msk.f32.mxu1 %vm1050_vm4, %v3247_v25  ;;  %v3930_v23 = vrot.slane %v7753_v54, 1  ;;  %v4232_v27 = vrot.slane %v7753_v54, 2 }
 0x411   : > { %v2846_v29 = vpop.permute.xlu1 %2845  ;;  %4336 = vrot.lane.b32.xlu1 %v4228_v45, %s5382_s7  ;;  %v7760_v59 = vpop.f32.mrf.mxu1  ;;  %4036 = vrot.lane.b32.xlu0 %v3928_v58, %s5381_s6 }
 0x412   : > { %v3929_v55 = vrot.slane %v7760_v59, 1  ;;  %v2848_v41 = vpop.permute.xlu0 %2847  ;;  %v4231_v5 = vrot.slane %v7760_v59, 2  ;;  %v3182_v62 = vsel %vm225_vm1, %v7515_v30, %v2846_v29 }
 0x413   : > { %v3183_v16 = vsel %vm225_vm1, %v7517_v8, %v2848_v41 }
 0x414   : > { %v3931_v31 = vsel %vm1709_vm5, %v3929_v55, %v3930_v23  ;;  %v4233_v8 = vsel %vm2012_vm6, %v4231_v5, %v4232_v27 }
 0x415   : > { %v3048_v39 = vpop.permute.xlu1 %3047  ;;  %4038 = vrot.lane.b32.xlu1 %v3931_v31, %s5381_s6  ;;  %4338 = vrot.lane.b32.xlu0 %v4230_v3, %s5382_s7 }
 0x416   : > { %v3248_v53 = vsel %vm981_vm3, %v3182_v62, %v3048_v39  ;;  %v3050_v57 = vpop.permute.xlu0 %3049 }
 0x417   : > { %v5279_v26 = vpop.f32.mrf.mxu1  ;;  %5350 = vmatmul.mubr.msk.f32.gmra.mxu1 %vm1050_vm4, %v3248_v53  ;;  %v3249_v37 = vsel %vm981_vm3, %v3183_v16, %v3050_v57 }
 0x418   : > { %5352 = vmatprep.mubr.msk.f32.mxu1 %vm1050_vm4, %v3249_v37  ;;  %v3934_v44 = vrot.slane %v5279_v26, 1  ;;  %v4236_v12 = vrot.slane %v5279_v26, 2 }
 0x419   : > { %v2850_v30 = vpop.permute.xlu1 %2849  ;;  %4340 = vrot.lane.b32.xlu1 %v4233_v8, %s5382_s7  ;;  %v7781_v11 = vpop.f32.mrf.mxu1 }
 0x41a   : > { %v3932_v10 = vrot.slane %v7781_v11, 1  ;;  %v4234_v38 = vrot.slane %v7781_v11, 2  ;;  %v3184_v4 = vsel %vm225_vm1, %v7535_v49, %v2850_v30 }
 0x41c   : > { %v3935_v1 = vsel %vm1709_vm5, %v3932_v10, %v3934_v44  ;;  %v3933_v35 = vsel %vm1709_vm5, %v3930_v23, %v3932_v10  ;;  %v4237_v2 = vsel %vm2012_vm6, %v4234_v38, %v4236_v12  ;;  %v4235_v19 = vsel %vm2012_vm6, %v4232_v27, %v4234_v38 }
 0x41d   : > { %v3052_v42 = vpop.permute.xlu1 %3051  ;;  %4042 = vrot.lane.b32.xlu1 %v3935_v1, %s5381_s6  ;;  %4040 = vrot.lane.b32.xlu0 %v3933_v35, %s5381_s6 }
 0x41e   : > { %v3250_v63 = vsel %vm981_vm3, %v3184_v4, %v3052_v42 }
 0x41f   : > { %v7792_v13 = vpop.f32.mrf.mxu1  ;;  %5353 = vmatmul.mubr.msk.f32.gmra.mxu1 %vm1050_vm4, %v3250_v63 }
 0x420   : > { %v3937_v49 = vrot.slane %v7792_v13, 1  ;;  %v4239_v28 = vrot.slane %v7792_v13, 2 }
 0x421   : > { %4344 = vrot.lane.b32.xlu1 %v4237_v2, %s5382_s7  ;;  %v7798_v21 = vpop.f32.mrf.mxu1  ;;  %4342 = vrot.lane.b32.xlu0 %v4235_v19, %s5382_s7 }
 0x422   : > { %v3936_v22 = vrot.slane %v7798_v21, 1  ;;  %v4238_v17 = vrot.slane %v7798_v21, 2 }
 0x424   : > { %v3938_v43 = vsel %vm1709_vm5, %v3936_v22, %v3937_v49  ;;  %v4240_v0 = vsel %vm2012_vm6, %v4238_v17, %v4239_v28 }
 0x425   : > { %4044 = vrot.lane.b32.xlu0 %v3938_v43, %s5381_s6 }
 0x427   : > { %v5285_v34 = vpop.f32.mrf.mxu1 }
 0x428   : > { %v3941_v9 = vrot.slane %v5285_v34, 1  ;;  %v4243_v18 = vrot.slane %v5285_v34, 2 }
 0x429   : > { %v7808_v20 = vpop.f32.mrf.mxu1  ;;  %4346 = vrot.lane.b32.xlu0 %v4240_v0, %s5382_s7 }
 0x42a   : > { %v3939_v32 = vrot.slane %v7808_v20, 1  ;;  %v4241_v52 = vrot.slane %v7808_v20, 2 }
 0x42c   : > { %v3940_v51 = vsel %vm1709_vm5, %v3937_v49, %v3939_v32  ;;  %v3942_v50 = vsel %vm1709_vm5, %v3939_v32, %v3941_v9  ;;  %v4242_v40 = vsel %vm2012_vm6, %v4239_v28, %v4241_v52  ;;  %v4244_v47 = vsel %vm2012_vm6, %v4241_v52, %v4243_v18 }
 0x42d   : > { %4046 = vrot.lane.b32.xlu1 %v3940_v51, %s5381_s6  ;;  %4048 = vrot.lane.b32.xlu0 %v3942_v50, %s5381_s6 }
 0x42f   : > { %v7817_v48 = vpop.f32.mrf.mxu1 }
 0x430   : > { %v3944_v25 = vrot.slane %v7817_v48, 1  ;;  %v4246_v6 = vrot.slane %v7817_v48, 2 }
 0x431   : > { %4348 = vrot.lane.b32.xlu1 %v4242_v40, %s5382_s7  ;;  %v7822_v7 = vpop.f32.mrf.mxu1  ;;  %4350 = vrot.lane.b32.xlu0 %v4244_v47, %s5382_s7 }
 0x432   : > { %v3943_v45 = vrot.slane %v7822_v7, 1  ;;  %v4245_v58 = vrot.slane %v7822_v7, 2 }
 0x434   : > { %v3945_v29 = vsel %vm1709_vm5, %v3943_v45, %v3944_v25  ;;  %v4247_v55 = vsel %vm2012_vm6, %v4245_v58, %v4246_v6 }
 0x435   : > { %4050 = vrot.lane.b32.xlu1 %v3945_v29, %s5381_s6 }
 0x437   : > { %v5291_v23 = vpop.f32.mrf.mxu1 }
 0x438   : > { %v3948_v5 = vrot.slane %v5291_v23, 1  ;;  %v4250_v39 = vrot.slane %v5291_v23, 2 }
 0x439   : > { %4352 = vrot.lane.b32.xlu1 %v4247_v55, %s5382_s7  ;;  %v7833_v41 = vpop.f32.mrf.mxu1 }
 0x43a   : > { %v3946_v31 = vrot.slane %v7833_v41, 1  ;;  %v4248_v3 = vrot.slane %v7833_v41, 2 }
 0x43c   : > { %v3949_v16 = vsel %vm1709_vm5, %v3946_v31, %v3948_v5  ;;  %v3947_v62 = vsel %vm1709_vm5, %v3944_v25, %v3946_v31  ;;  %v4251_v53 = vsel %vm2012_vm6, %v4248_v3, %v4250_v39  ;;  %v4249_v57 = vsel %vm2012_vm6, %v4246_v6, %v4248_v3 }
 0x43d   : > { %4054 = vrot.lane.b32.xlu1 %v3949_v16, %s5381_s6  ;;  %4052 = vrot.lane.b32.xlu0 %v3947_v62, %s5381_s6 }
 0x43f   : > { %v7841_v27 = vpop.f32.mrf.mxu1 }
 0x440   : > { %v3951_v37 = vrot.slane %v7841_v27, 1  ;;  %v4253_v10 = vrot.slane %v7841_v27, 2 }
 0x441   : > { %4356 = vrot.lane.b32.xlu1 %v4251_v53, %s5382_s7  ;;  %v7846_v26 = vpop.f32.mrf.mxu1  ;;  %4354 = vrot.lane.b32.xlu0 %v4249_v57, %s5382_s7 }
 0x442   : > { %v3950_v8 = vrot.slane %v7846_v26, 1  ;;  %v4252_v30 = vrot.slane %v7846_v26, 2 }
 0x444   : > { %v3952_v44 = vsel %vm1709_vm5, %v3950_v8, %v3951_v37  ;;  %v4254_v1 = vsel %vm2012_vm6, %v4252_v30, %v4253_v10 }
 0x445   : > { %4056 = vrot.lane.b32.xlu0 %v3952_v44, %s5381_s6 }
 0x447   : > { %v5297_v38 = vpop.f32.mrf.mxu1 }
 0x448   : > { %v3955_v4 = vrot.slane %v5297_v38, 1  ;;  %v4257_v19 = vrot.slane %v5297_v38, 2 }
 0x449   : > { %v7856_v35 = vpop.f32.mrf.mxu1  ;;  %4358 = vrot.lane.b32.xlu0 %v4254_v1, %s5382_s7 }
 0x44a   : > { %v3953_v42 = vrot.slane %v7856_v35, 1  ;;  %v4255_v12 = vrot.slane %v7856_v35, 2 }
 0x44c   : > { %v3954_v63 = vsel %vm1709_vm5, %v3951_v37, %v3953_v42  ;;  %v3956_v2 = vsel %vm1709_vm5, %v3953_v42, %v3955_v4  ;;  %v4256_v22 = vsel %vm2012_vm6, %v4253_v10, %v4255_v12  ;;  %v4258_v17 = vsel %vm2012_vm6, %v4255_v12, %v4257_v19 }
 0x44d   : > { %4058 = vrot.lane.b32.xlu1 %v3954_v63, %s5381_s6  ;;  %4060 = vrot.lane.b32.xlu0 %v3956_v2, %s5381_s6 }
 0x44f   : > { %v7865_v49 = vpop.f32.mrf.mxu1 }
 0x450   : > { %v3958_v28 = vrot.slane %v7865_v49, 1  ;;  %v4260_v32 = vrot.slane %v7865_v49, 2 }
 0x451   : > { %4360 = vrot.lane.b32.xlu1 %v4256_v22, %s5382_s7  ;;  %v7870_v43 = vpop.f32.mrf.mxu1  ;;  %4362 = vrot.lane.b32.xlu0 %v4258_v17, %s5382_s7 }
 0x452   : > { %v3957_v34 = vrot.slane %v7870_v43, 1  ;;  %v4259_v0 = vrot.slane %v7870_v43, 2 }
 0x454   : > { %v3959_v9 = vsel %vm1709_vm5, %v3957_v34, %v3958_v28  ;;  %v4261_v51 = vsel %vm2012_vm6, %v4259_v0, %v4260_v32 }
 0x455   : > { %4062 = vrot.lane.b32.xlu1 %v3959_v9, %s5381_s6  ;;  %v4713_v9 = vld [vmem:[%s5599_s24] sm:$0xff] }
 0x457   : > { %v5303_v52 = vpop.f32.mrf.mxu1 }
 0x458   : > { %v3962_v18 = vrot.slane %v5303_v52, 1  ;;  %v4264_v29 = vrot.slane %v5303_v52, 2 }
 0x459   : > { %4364 = vrot.lane.b32.xlu1 %v4261_v51, %s5382_s7  ;;  %v7881_v50 = vpop.f32.mrf.mxu1 }
 0x45a   : > { %v3960_v40 = vrot.slane %v7881_v50, 1  ;;  %v4262_v47 = vrot.slane %v7881_v50, 2 }
 0x45c   : > { %v3963_v25 = vsel %vm1709_vm5, %v3960_v40, %v3962_v18  ;;  %v3961_v45 = vsel %vm1709_vm5, %v3958_v28, %v3960_v40  ;;  %v4265_v23 = vsel %vm2012_vm6, %v4262_v47, %v4264_v29  ;;  %v4263_v55 = vsel %vm2012_vm6, %v4260_v32, %v4262_v47  ;;  %v4714_v18 = vld [vmem:[%s5599_s24 + $0x8] sm:$0xff] }
 0x45d   : > { %4066 = vrot.lane.b32.xlu1 %v3963_v25, %s5381_s6  ;;  %4064 = vrot.lane.b32.xlu0 %v3961_v45, %s5381_s6  ;;  %v4021_v58 = vpop.permute.xlu0 %4020 }
 0x45e   : > { %v4164_v57 = vadd.f32 %v4021_v58, %v7656_v36 }
 0x45f   : > { %v7889_v6 = vpop.f32.mrf.mxu1 }
 0x460   : > { %v3965_v3 = vrot.slane %v7889_v6, 1  ;;  %v4267_v8 = vrot.slane %v7889_v6, 2 }
 0x461   : > { %4368 = vrot.lane.b32.xlu1 %v4265_v23, %s5382_s7  ;;  %v7894_v5 = vpop.f32.mrf.mxu1  ;;  %4366 = vrot.lane.b32.xlu0 %v4263_v55, %s5382_s7  ;;  %v4323_v31 = vpop.permute.xlu0 %4322 }
 0x462   : > { %v3964_v16 = vrot.slane %v7894_v5, 1  ;;  %v4266_v62 = vrot.slane %v7894_v5, 2  ;;  %v4466_v30 = vadd.f32 %v4323_v31, %v4164_v57 }
 0x464   : > { %v4023_v39 = vpop.permute.xlu1 %4022  ;;  %v3966_v53 = vsel %vm1709_vm5, %v3964_v16, %v3965_v3  ;;  %v4268_v4 = vsel %vm2012_vm6, %v4266_v62, %v4267_v8 }
 0x465   : > { %4068 = vrot.lane.b32.xlu0 %v3966_v53, %s5381_s6  ;;  %v4025_v37 = vpop.permute.xlu0 %4024  ;;  %v4165_v44 = vadd.f32 %v7652_v14, %v4023_v39  ;;  %v4562_v14 = vrot.slane %v4466_v30, 7 }
 0x466   : > { %v4166_v38 = vadd.f32 %v4025_v37, %v7665_v60  ;;  %v7914_v60 = vld [vmem:[%s8309_s4] ss:$0 sm:$0xff] }
 0x467   : > { %v5309_v10 = vpop.f32.mrf.mxu1 }
 0x468   : > { %v4325_v1 = vpop.permute.xlu1 %4324  ;;  %v3969_v63 = vrot.slane %v5309_v10, 1  ;;  %v4271_v52 = vrot.slane %v5309_v10, 2 }
 0x469   : > { %v4467_v42 = vadd.f32 %v4325_v1, %v4165_v44  ;;  %v7907_v12 = vpop.f32.mrf.mxu1  ;;  %4370 = vrot.lane.b32.xlu0 %v4268_v4, %s5382_s7  ;;  %v4327_v36 = vpop.permute.xlu0 %4326 }
 0x46a   : > { %v3967_v2 = vrot.slane %v7907_v12, 1  ;;  %v4468_v19 = vadd.f32 %v4327_v36, %v4166_v38  ;;  %v4269_v17 = vrot.slane %v7907_v12, 2 }
 0x46b   : > { %v4563_v22 = vrot.slane %v4467_v42, 7 }
 0x46c   : > { %v4565_v28 = vrot.slane %v4468_v19, 7  ;;  %v3968_v34 = vsel %vm1709_vm5, %v3965_v3, %v3967_v2  ;;  %v3970_v0 = vsel %vm1709_vm5, %v3967_v2, %v3969_v63  ;;  %v4270_v29 = vsel %vm2012_vm6, %v4267_v8, %v4269_v17 }
 0x46d   : > { %v4564_v32 = vsel %vm2363_vm7, %v4562_v14, %v4563_v22  ;;  %4070 = vrot.lane.b32.xlu1 %v3968_v34, %s5381_s6  ;;  %4072 = vrot.lane.b32.xlu0 %v3970_v0, %s5381_s6  ;;  %v4272_v23 = vsel %vm2012_vm6, %v4269_v17, %v4271_v52 }
 0x46e   : > { %v4681_v51 = vadd.f32 %v7914_v60, %v4564_v32  ;;  %v4566_v40 = vsel %vm2363_vm7, %v4563_v22, %v4565_v28  ;;  %v4715_v32 = vld [vmem:[%s5599_s24 + $0x10] sm:$0xff] }
 0x46f   : > { %v4682_v47 = vadd.f32 %v7914_v60, %v4566_v40  ;;  %v4027_v25 = vpop.permute.xlu1 %4026  ;;  %v7934_v45 = vpop.f32.mrf.mxu1 }
 0x470   : > { %v4745_v58 = vadd.f32 %v4713_v9, %v4681_v51  ;;  %v3972_v3 = vrot.slane %v7934_v45, 1  ;;  %v4167_v37 = vadd.f32 %v4027_v25, %v7691_v56  ;;  %v4274_v8 = vrot.slane %v7934_v45, 2 }
 0x471   : > { %v4746_v55 = vadd.f32 %v4714_v18, %v4682_v47  ;;  %4372 = vrot.lane.b32.xlu1 %v4270_v29, %s5382_s7  ;;  %v7939_v31 = vpop.f32.mrf.mxu1  ;;  %4374 = vrot.lane.b32.xlu0 %v4272_v23, %s5382_s7 }
 0x472   : > { %4777 = vst.msk [vmem:[%s7931_s23] sm:$0xff] %vm225_vm1, %v4745_v58  ;;  %v3971_v16 = vrot.slane %v7939_v31, 1  ;;  %v4273_v53 = vrot.slane %v7939_v31, 2  ;;  %v4716_v58 = vld [vmem:[%s5599_s24 + $0x18] sm:$0xff] }
 0x473   : > { %4778 = vst.msk [vmem:[%s7931_s23 + $0x8] sm:$0xff] %vm225_vm1, %v4746_v55  ;;  %v4329_v62 = vpop.permute.xlu1 %4328  ;;  %v4029_v39 = vpop.permute.xlu0 %4028 }
 0x474   : > { %v3973_v57 = vsel %vm1709_vm5, %v3971_v16, %v3972_v3  ;;  %v4469_v30 = vadd.f32 %v4329_v62, %v4167_v37  ;;  %v4168_v44 = vadd.f32 %v7686_v46, %v4029_v39  ;;  %v4275_v4 = vsel %vm2012_vm6, %v4273_v53, %v4274_v8 }
 0x475   : > { %4074 = vrot.lane.b32.xlu1 %v3973_v57, %s5381_s6 }
 0x476   : > { %v4567_v19 = vrot.slane %v4469_v30, 7 }
 0x477   : > { %v4031_v10 = vpop.permute.xlu1 %4030  ;;  %v5315_v38 = vpop.f32.mrf.mxu1 }
 0x478   : > { %v4331_v1 = vpop.permute.xlu0 %4330  ;;  %v4169_v56 = vadd.f32 %v4031_v10, %v7700_v15  ;;  %v3976_v63 = vrot.slane %v5315_v38, 1  ;;  %v4278_v9 = vrot.slane %v5315_v38, 2 }
 0x479   : > { %v4470_v42 = vadd.f32 %v4331_v1, %v4168_v44  ;;  %4376 = vrot.lane.b32.xlu1 %v4275_v4, %s5382_s7  ;;  %v7956_v36 = vpop.f32.mrf.mxu1 }
 0x47a   : > { %v3974_v2 = vrot.slane %v7956_v36, 1  ;;  %v4276_v46 = vrot.slane %v7956_v36, 2 }
 0x47b   : > { %v4568_v14 = vrot.slane %v4470_v42, 7  ;;  %v4333_v22 = vpop.permute.xlu1 %4332 }
 0x47c   : > { %v4471_v17 = vadd.f32 %v4333_v22, %v4169_v56  ;;  %v4033_v28 = vpop.permute.xlu0 %4032  ;;  %v3977_v34 = vsel %vm1709_vm5, %v3974_v2, %v3976_v63  ;;  %v3975_v0 = vsel %vm1709_vm5, %v3972_v3, %v3974_v2  ;;  %v4279_v47 = vsel %vm2012_vm6, %v4276_v46, %v4278_v9  ;;  %v4717_v2 = vld [vmem:[%s5599_s24 + $0x20] sm:$0xff] }
 0x47d   : > { %v4569_v52 = vsel %vm2363_vm7, %v4567_v19, %v4568_v14  ;;  %4078 = vrot.lane.b32.xlu1 %v3977_v34, %s5381_s6  ;;  %4076 = vrot.lane.b32.xlu0 %v3975_v0, %s5381_s6  ;;  %v4170_v23 = vadd.f32 %v4033_v28, %v7716_v61  ;;  %v4277_v3 = vsel %vm2012_vm6, %v4274_v8, %v4276_v46 }
 0x47e   : > { %v4683_v15 = vadd.f32 %v7914_v60, %v4569_v52  ;;  %v4570_v51 = vrot.slane %v4471_v17, 7 }
 0x47f   : > { %v4035_v18 = vpop.permute.xlu1 %4034  ;;  %v7968_v40 = vpop.f32.mrf.mxu1 }
 0x480   : > { %v4747_v25 = vadd.f32 %v4715_v32, %v4683_v15  ;;  %v4571_v29 = vsel %vm2363_vm7, %v4568_v14, %v4570_v51  ;;  %v4335_v55 = vpop.permute.xlu0 %4334  ;;  %v4171_v39 = vadd.f32 %v7708_v33, %v4035_v18  ;;  %v3979_v53 = vrot.slane %v7968_v40, 1  ;;  %v4718_v18 = vld [vmem:[%s5599_s24 + $0x28] sm:$0xff] }
 0x481   : > { %v4684_v16 = vadd.f32 %v7914_v60, %v4571_v29  ;;  %4380 = vrot.lane.b32.xlu1 %v4279_v47, %s5382_s7  ;;  %v7977_v62 = vpop.f32.mrf.mxu1  ;;  %4378 = vrot.lane.b32.xlu0 %v4277_v3, %s5382_s7  ;;  %v4472_v57 = vadd.f32 %v4335_v55, %v4170_v23  ;;  %v4281_v33 = vrot.slane %v7968_v40, 2 }
 0x482   : > { %4779 = vst.msk [vmem:[%s7931_s23 + $0x10] sm:$0xff] %vm225_vm1, %v4747_v25  ;;  %v3978_v61 = vrot.slane %v7977_v62, 1  ;;  %v4280_v30 = vrot.slane %v7977_v62, 2 }
 0x483   : > { %v4748_v37 = vadd.f32 %v4716_v58, %v4684_v16  ;;  %v4337_v8 = vpop.permute.xlu1 %4336  ;;  %v4572_v1 = vrot.slane %v4472_v57, 7 }
 0x484   : > { %v4473_v44 = vadd.f32 %v4337_v8, %v4171_v39  ;;  %v4037_v10 = vpop.permute.xlu0 %4036  ;;  %v3980_v38 = vsel %vm1709_vm5, %v3978_v61, %v3979_v53  ;;  %v4282_v46 = vsel %vm2012_vm6, %v4280_v30, %v4281_v33 }
 0x485   : > { %4780 = vst.msk [vmem:[%s7931_s23 + $0x18] sm:$0xff] %vm225_vm1, %v4748_v37  ;;  %4080 = vrot.lane.b32.xlu0 %v3980_v38, %s5381_s6  ;;  %v4172_v42 = vadd.f32 %v4037_v10, %v7737_v24 }
 0x486   : > { %v4573_v4 = vrot.slane %v4473_v44, 7 }
 0x487   : > { %v4039_v56 = vpop.permute.xlu1 %4038  ;;  %v5321_v63 = vpop.f32.mrf.mxu1 }
 0x488   : > { %v4574_v19 = vsel %vm2363_vm7, %v4572_v1, %v4573_v4  ;;  %v4339_v14 = vpop.permute.xlu0 %4338  ;;  %v3983_v34 = vrot.slane %v5321_v63, 1  ;;  %v4285_v25 = vrot.slane %v5321_v63, 2 }
 0x489   : > { %v4685_v22 = vadd.f32 %v7914_v60, %v4574_v19  ;;  %v4474_v17 = vadd.f32 %v4339_v14, %v4172_v42  ;;  %v7996_v28 = vpop.f32.mrf.mxu1  ;;  %4382 = vrot.lane.b32.xlu0 %v4282_v46, %s5382_s7  ;;  %v4719_v14 = vld [vmem:[%s5599_s24 + $0x30] sm:$0xff]  ;;  %v4720_v46 = vld [vmem:[%s5599_s24 + $0x38] sm:$0xff] }
 0x48a   : > { %v3981_v24 = vrot.slane %v7996_v28, 1  ;;  %v4283_v52 = vrot.slane %v7996_v28, 2 }
 0x48b   : > { %v4749_v0 = vadd.f32 %v4717_v2, %v4685_v22  ;;  %v4575_v9 = vrot.slane %v4474_v17, 7  ;;  %v4341_v32 = vpop.permute.xlu1 %4340 }
 0x48c   : > { %v3982_v15 = vsel %vm1709_vm5, %v3979_v53, %v3981_v24  ;;  %v3984_v51 = vsel %vm1709_vm5, %v3981_v24, %v3983_v34  ;;  %v4284_v16 = vsel %vm2012_vm6, %v4281_v33, %v4283_v52  ;;  %v4286_v39 = vsel %vm2012_vm6, %v4283_v52, %v4285_v25 }
 0x48d   : > { %4781 = vst.msk [vmem:[%s7931_s23 + $0x20] sm:$0xff] %vm225_vm1, %v4749_v0  ;;  %v4576_v47 = vsel %vm2363_vm7, %v4573_v4, %v4575_v9  ;;  %4082 = vrot.lane.b32.xlu1 %v3982_v15, %s5381_s6  ;;  %4084 = vrot.lane.b32.xlu0 %v3984_v51, %s5381_s6  ;;  %v4173_v53 = vadd.f32 %v4039_v56, %v7760_v59 }
 0x48e   : > { %v4686_v58 = vadd.f32 %v7914_v60, %v4576_v47 }
 0x48f   : > { %v4043_v29 = vpop.permute.xlu1 %4042  ;;  %v8010_v23 = vpop.f32.mrf.mxu1  ;;  %v4475_v30 = vadd.f32 %v4341_v32, %v4173_v53 }
 0x490   : > { %v4750_v55 = vadd.f32 %v4718_v18, %v4686_v58  ;;  %v4041_v3 = vpop.permute.xlu0 %4040  ;;  %v4175_v61 = vadd.f32 %v4043_v29, %v7781_v11  ;;  %v3986_v37 = vrot.slane %v8010_v23, 1  ;;  %v4288_v11 = vrot.slane %v8010_v23, 2 }
 0x491   : > { %4384 = vrot.lane.b32.xlu1 %v4284_v16, %s5382_s7  ;;  %v8016_v57 = vpop.f32.mrf.mxu1  ;;  %4386 = vrot.lane.b32.xlu0 %v4286_v39, %s5382_s7  ;;  %v4174_v44 = vadd.f32 %v7753_v54, %v4041_v3  ;;  %v4577_v56 = vrot.slane %v4475_v30, 7 }
 0x492   : > { %4782 = vst.msk [vmem:[%s7931_s23 + $0x28] sm:$0xff] %vm225_vm1, %v4750_v55  ;;  %v3985_v8 = vrot.slane %v8016_v57, 1  ;;  %v4287_v10 = vrot.slane %v8016_v57, 2 }
 0x493   : > { %v4345_v59 = vpop.permute.xlu1 %4344 }
 0x494   : > { %v4477_v38 = vadd.f32 %v4345_v59, %v4175_v61  ;;  %v4343_v33 = vpop.permute.xlu0 %4342  ;;  %v3987_v1 = vsel %vm1709_vm5, %v3985_v8, %v3986_v37  ;;  %v4289_v54 = vsel %vm2012_vm6, %v4287_v10, %v4288_v11 }
 0x495   : > { %v4476_v4 = vadd.f32 %v4343_v33, %v4174_v44  ;;  %4086 = vrot.lane.b32.xlu1 %v3987_v1, %s5381_s6 }
 0x496   : > { %v4580_v42 = vrot.slane %v4477_v38, 7 }
 0x497   : > { %v4578_v63 = vrot.slane %v4476_v4, 7  ;;  %v5327_v2 = vpop.f32.mrf.mxu1 }
 0x498   : > { %v4045_v19 = vpop.permute.xlu0 %4044  ;;  %v3990_v9 = vrot.slane %v5327_v2, 1  ;;  %v4292_v58 = vrot.slane %v5327_v2, 2 }
 0x499   : > { %v4579_v22 = vsel %vm2363_vm7, %v4577_v56, %v4578_v63  ;;  %v4581_v17 = vsel %vm2363_vm7, %v4578_v63, %v4580_v42  ;;  %4388 = vrot.lane.b32.xlu1 %v4289_v54, %s5382_s7  ;;  %v8035_v34 = vpop.f32.mrf.mxu1  ;;  %v4176_v3 = vadd.f32 %v4045_v19, %v7798_v21  ;;  %v4721_v19 = vld [vmem:[%s5599_s24 + $0x40] sm:$0xff] }
 0x49a   : > { %v4687_v24 = vadd.f32 %v7914_v60, %v4579_v22  ;;  %v4688_v0 = vadd.f32 %v7914_v60, %v4581_v17  ;;  %v3988_v32 = vrot.slane %v8035_v34, 1  ;;  %v4290_v52 = vrot.slane %v8035_v34, 2 }
 0x49c   : > { %v4751_v15 = vadd.f32 %v4719_v14, %v4687_v24  ;;  %v4752_v51 = vadd.f32 %v4720_v46, %v4688_v0  ;;  %v4347_v18 = vpop.permute.xlu0 %4346  ;;  %v3991_v47 = vsel %vm1709_vm5, %v3988_v32, %v3990_v9  ;;  %v3989_v25 = vsel %vm1709_vm5, %v3986_v37, %v3988_v32  ;;  %v4722_v46 = vld [vmem:[%s5599_s24 + $0x48] sm:$0xff] }
 0x49d   : > { %4090 = vrot.lane.b32.xlu1 %v3991_v47, %s5381_s6  ;;  %4088 = vrot.lane.b32.xlu0 %v3989_v25, %s5381_s6  ;;  %v4293_v39 = vsel %vm2012_vm6, %v4290_v52, %v4292_v58  ;;  %v4291_v53 = vsel %vm2012_vm6, %v4288_v11, %v4290_v52  ;;  %v4478_v37 = vadd.f32 %v4347_v18, %v4176_v3 }
 0x49e   : > { %4783 = vst.msk [vmem:[%s7931_s23 + $0x30] sm:$0xff] %vm225_vm1, %v4751_v15  ;;  %4784 = vst.msk [vmem:[%s7931_s23 + $0x38] sm:$0xff] %vm225_vm1, %v4752_v51 }
 0x49f   : > { %v4047_v29 = vpop.permute.xlu1 %4046  ;;  %v8049_v55 = vpop.f32.mrf.mxu1  ;;  %v4582_v11 = vrot.slane %v4478_v37, 7 }
 0x4a0   : > { %v4049_v16 = vpop.permute.xlu0 %4048  ;;  %v4177_v8 = vadd.f32 %v7792_v13, %v4047_v29  ;;  %v3993_v30 = vrot.slane %v8049_v55, 1  ;;  %v4295_v13 = vrot.slane %v8049_v55, 2 }
 0x4a1   : > { %4392 = vrot.lane.b32.xlu1 %v4293_v39, %s5382_s7  ;;  %v8055_v61 = vpop.f32.mrf.mxu1  ;;  %4390 = vrot.lane.b32.xlu0 %v4291_v53, %s5382_s7  ;;  %v4178_v21 = vadd.f32 %v4049_v16, %v7808_v20 }
 0x4a2   : > { %v3992_v44 = vrot.slane %v8055_v61, 1  ;;  %v4294_v10 = vrot.slane %v8055_v61, 2 }
 0x4a3   : > { %v4349_v59 = vpop.permute.xlu1 %4348 }
 0x4a4   : > { %v4479_v38 = vadd.f32 %v4349_v59, %v4177_v8  ;;  %v4351_v33 = vpop.permute.xlu0 %4350  ;;  %v3994_v1 = vsel %vm1709_vm5, %v3992_v44, %v3993_v30  ;;  %v4296_v54 = vsel %vm2012_vm6, %v4294_v10, %v4295_v13 }
 0x4a5   : > { %v4480_v4 = vadd.f32 %v4351_v33, %v4178_v21  ;;  %4092 = vrot.lane.b32.xlu0 %v3994_v1, %s5381_s6 }
 0x4a6   : > { %v4583_v42 = vrot.slane %v4479_v38, 7 }
 0x4a7   : > { %v4585_v56 = vrot.slane %v4480_v4, 7  ;;  %v4051_v63 = vpop.permute.xlu1 %4050  ;;  %v5333_v2 = vpop.f32.mrf.mxu1 }
 0x4a8   : > { %v4584_v20 = vsel %vm2363_vm7, %v4582_v11, %v4583_v42  ;;  %v3997_v0 = vrot.slane %v5333_v2, 1  ;;  %v4299_v25 = vrot.slane %v5333_v2, 2  ;;  %v4179_v53 = vadd.f32 %v4051_v63, %v7822_v7  ;;  %v4723_v2 = vld [vmem:[%s5599_s24 + $0x50] sm:$0xff] }
 0x4a9   : > { %v4689_v14 = vadd.f32 %v7914_v60, %v4584_v20  ;;  %v4586_v22 = vsel %vm2363_vm7, %v4583_v42, %v4585_v56  ;;  %v8072_v17 = vpop.f32.mrf.mxu1  ;;  %4394 = vrot.lane.b32.xlu0 %v4296_v54, %s5382_s7 }
 0x4aa   : > { %v4690_v24 = vadd.f32 %v7914_v60, %v4586_v22  ;;  %v3995_v9 = vrot.slane %v8072_v17, 1  ;;  %v4297_v51 = vrot.slane %v8072_v17, 2 }
 0x4ab   : > { %v4753_v32 = vadd.f32 %v4721_v19, %v4689_v14  ;;  %v4353_v52 = vpop.permute.xlu1 %4352  ;;  %v4724_v19 = vld [vmem:[%s5599_s24 + $0x58] sm:$0xff] }
 0x4ac   : > { %v4754_v15 = vadd.f32 %v4722_v46, %v4690_v24  ;;  %v3996_v18 = vsel %vm1709_vm5, %v3993_v30, %v3995_v9  ;;  %v3998_v47 = vsel %vm1709_vm5, %v3995_v9, %v3997_v0  ;;  %v4298_v16 = vsel %vm2012_vm6, %v4295_v13, %v4297_v51 }
 0x4ad   : > { %4785 = vst.msk [vmem:[%s7931_s23 + $0x40] sm:$0xff] %vm225_vm1, %v4753_v32  ;;  %4094 = vrot.lane.b32.xlu1 %v3996_v18, %s5381_s6  ;;  %4096 = vrot.lane.b32.xlu0 %v3998_v47, %s5381_s6  ;;  %v4300_v39 = vsel %vm2012_vm6, %v4297_v51, %v4299_v25  ;;  %v4481_v21 = vadd.f32 %v4353_v52, %v4179_v53 }
 0x4ae   : > { %4786 = vst.msk [vmem:[%s7931_s23 + $0x48] sm:$0xff] %vm225_vm1, %v4754_v15 }
 0x4af   : > { %v4055_v58 = vpop.permute.xlu1 %4054  ;;  %v8086_v29 = vpop.f32.mrf.mxu1  ;;  %v4587_v13 = vrot.slane %v4481_v21, 7 }
 0x4b0   : > { %v4053_v3 = vpop.permute.xlu0 %4052  ;;  %v4181_v8 = vadd.f32 %v4055_v58, %v7833_v41  ;;  %v4000_v30 = vrot.slane %v8086_v29, 1  ;;  %v4302_v41 = vrot.slane %v8086_v29, 2 }
 0x4b1   : > { %4396 = vrot.lane.b32.xlu1 %v4298_v16, %s5382_s7  ;;  %v8092_v37 = vpop.f32.mrf.mxu1  ;;  %4398 = vrot.lane.b32.xlu0 %v4300_v39, %s5382_s7  ;;  %v4180_v59 = vadd.f32 %v7817_v48, %v4053_v3 }
 0x4b2   : > { %v3999_v44 = vrot.slane %v8092_v37, 1  ;;  %v4301_v7 = vrot.slane %v8092_v37, 2 }
 0x4b3   : > { %v4357_v10 = vpop.permute.xlu1 %4356 }
 0x4b4   : > { %v4483_v38 = vadd.f32 %v4357_v10, %v4181_v8  ;;  %v4355_v33 = vpop.permute.xlu0 %4354  ;;  %v4001_v1 = vsel %vm1709_vm5, %v3999_v44, %v4000_v30  ;;  %v4303_v48 = vsel %vm2012_vm6, %v4301_v7, %v4302_v41 }
 0x4b5   : > { %v4482_v4 = vadd.f32 %v4355_v33, %v4180_v59  ;;  %4098 = vrot.lane.b32.xlu1 %v4001_v1, %s5381_s6 }
 0x4b6   : > { %v4590_v11 = vrot.slane %v4483_v38, 7 }
 0x4b7   : > { %v4588_v42 = vrot.slane %v4482_v4, 7  ;;  %v5339_v56 = vpop.f32.mrf.mxu1 }
 0x4b8   : > { %v4057_v63 = vpop.permute.xlu0 %4056  ;;  %v4004_v24 = vrot.slane %v5339_v56, 1  ;;  %v4306_v47 = vrot.slane %v5339_v56, 2 }
 0x4b9   : > { %v4589_v20 = vsel %vm2363_vm7, %v4587_v13, %v4588_v42  ;;  %v4591_v54 = vsel %vm2363_vm7, %v4588_v42, %v4590_v11  ;;  %4400 = vrot.lane.b32.xlu1 %v4303_v48, %s5382_s7  ;;  %v8109_v14 = vpop.f32.mrf.mxu1  ;;  %v4182_v3 = vadd.f32 %v4057_v63, %v7846_v26  ;;  %v4725_v63 = vld [vmem:[%s5599_s24 + $0x60] sm:$0xff] }
 0x4ba   : > { %v4691_v46 = vadd.f32 %v7914_v60, %v4589_v20  ;;  %v4692_v22 = vadd.f32 %v7914_v60, %v4591_v54  ;;  %v4002_v0 = vrot.slane %v8109_v14, 1  ;;  %v4304_v9 = vrot.slane %v8109_v14, 2 }
 0x4bc   : > { %v4755_v32 = vadd.f32 %v4723_v2, %v4691_v46  ;;  %v4756_v52 = vadd.f32 %v4724_v19, %v4692_v22  ;;  %v4359_v15 = vpop.permute.xlu0 %4358  ;;  %v4005_v51 = vsel %vm1709_vm5, %v4002_v0, %v4004_v24  ;;  %v4003_v18 = vsel %vm1709_vm5, %v4000_v30, %v4002_v0  ;;  %v4726_v19 = vld [vmem:[%s5599_s24 + $0x68] sm:$0xff] }
 0x4bd   : > { %4102 = vrot.lane.b32.xlu1 %v4005_v51, %s5381_s6  ;;  %4100 = vrot.lane.b32.xlu0 %v4003_v18, %s5381_s6  ;;  %v4307_v39 = vsel %vm2012_vm6, %v4304_v9, %v4306_v47  ;;  %v4305_v53 = vsel %vm2012_vm6, %v4302_v41, %v4304_v9  ;;  %v4484_v30 = vadd.f32 %v4359_v15, %v4182_v3 }
 0x4be   : > { %4787 = vst.msk [vmem:[%s7931_s23 + $0x50] sm:$0xff] %vm225_vm1, %v4755_v32  ;;  %4788 = vst.msk [vmem:[%s7931_s23 + $0x58] sm:$0xff] %vm225_vm1, %v4756_v52 }
 0x4bf   : > { %v4059_v25 = vpop.permute.xlu1 %4058  ;;  %v8123_v58 = vpop.f32.mrf.mxu1  ;;  %v4592_v41 = vrot.slane %v4484_v30, 7 }
 0x4c0   : > { %v4061_v16 = vpop.permute.xlu0 %4060  ;;  %v4183_v44 = vadd.f32 %v7841_v27, %v4059_v25  ;;  %v4007_v21 = vrot.slane %v8123_v58, 1  ;;  %v4309_v27 = vrot.slane %v8123_v58, 2 }
 0x4c1   : > { %4404 = vrot.lane.b32.xlu1 %v4307_v39, %s5382_s7  ;;  %v8129_v8 = vpop.f32.mrf.mxu1  ;;  %4402 = vrot.lane.b32.xlu0 %v4305_v53, %s5382_s7  ;;  %v4184_v26 = vadd.f32 %v4061_v16, %v7856_v35 }
 0x4c2   : > { %v4006_v59 = vrot.slane %v8129_v8, 1  ;;  %v4308_v7 = vrot.slane %v8129_v8, 2 }
 0x4c3   : > { %v4361_v10 = vpop.permute.xlu1 %4360 }
 0x4c4   : > { %v4485_v38 = vadd.f32 %v4361_v10, %v4183_v44  ;;  %v4363_v33 = vpop.permute.xlu0 %4362  ;;  %v4008_v1 = vsel %vm1709_vm5, %v4006_v59, %v4007_v21  ;;  %v4310_v48 = vsel %vm2012_vm6, %v4308_v7, %v4309_v27 }
 0x4c5   : > { %v4486_v4 = vadd.f32 %v4363_v33, %v4184_v26  ;;  %4104 = vrot.lane.b32.xlu0 %v4008_v1, %s5381_s6 }
 0x4c6   : > { %v4593_v11 = vrot.slane %v4485_v38, 7 }
 0x4c7   : > { %v4595_v13 = vrot.slane %v4486_v4, 7  ;;  %v4063_v42 = vpop.permute.xlu1 %4062  ;;  %v5345_v56 = vpop.f32.mrf.mxu1 }
 0x4c8   : > { %v4594_v35 = vsel %vm2363_vm7, %v4592_v41, %v4593_v11  ;;  %v4011_v22 = vrot.slane %v5345_v56, 1  ;;  %v4313_v18 = vrot.slane %v5345_v56, 2  ;;  %v4185_v53 = vadd.f32 %v4063_v42, %v7870_v43  ;;  %v4727_v56 = vld [vmem:[%s5599_s24 + $0x70] sm:$0xff] }
 0x4c9   : > { %v4693_v2 = vadd.f32 %v7914_v60, %v4594_v35  ;;  %v4596_v20 = vsel %vm2363_vm7, %v4593_v11, %v4595_v13  ;;  %v8146_v54 = vpop.f32.mrf.mxu1  ;;  %4406 = vrot.lane.b32.xlu0 %v4310_v48, %s5382_s7 }
 0x4ca   : > { %v4694_v46 = vadd.f32 %v7914_v60, %v4596_v20  ;;  %v4009_v24 = vrot.slane %v8146_v54, 1  ;;  %v4311_v52 = vrot.slane %v8146_v54, 2 }
 0x4cb   : > { %v4757_v0 = vadd.f32 %v4725_v63, %v4693_v2  ;;  %v4365_v9 = vpop.permute.xlu1 %4364  ;;  %v4728_v63 = vld [vmem:[%s5599_s24 + $0x78] sm:$0xff] }
 0x4cc   : > { %v4758_v32 = vadd.f32 %v4726_v19, %v4694_v46  ;;  %v4010_v15 = vsel %vm1709_vm5, %v4007_v21, %v4009_v24  ;;  %v4012_v51 = vsel %vm1709_vm5, %v4009_v24, %v4011_v22  ;;  %v4312_v16 = vsel %vm2012_vm6, %v4309_v27, %v4311_v52 }
 0x4cd   : > { %4789 = vst.msk [vmem:[%s7931_s23 + $0x60] sm:$0xff] %vm225_vm1, %v4757_v0  ;;  %4106 = vrot.lane.b32.xlu1 %v4010_v15, %s5381_s6  ;;  %4108 = vrot.lane.b32.xlu0 %v4012_v51, %s5381_s6  ;;  %v4314_v39 = vsel %vm2012_vm6, %v4311_v52, %v4313_v18  ;;  %v4487_v26 = vadd.f32 %v4365_v9, %v4185_v53 }
 0x4ce   : > { %4790 = vst.msk [vmem:[%s7931_s23 + $0x68] sm:$0xff] %vm225_vm1, %v4758_v32 }
 0x4cf   : > { %v4067_v47 = vpop.permute.xlu1 %4066  ;;  %v8160_v25 = vpop.f32.mrf.mxu1  ;;  %v4597_v27 = vrot.slane %v4487_v26, 7 }
 0x4d0   : > { %v4065_v3 = vpop.permute.xlu0 %4064  ;;  %v4187_v44 = vadd.f32 %v4067_v47, %v7881_v50  ;;  %v4014_v21 = vrot.slane %v8160_v25, 1  ;;  %v4316_v50 = vrot.slane %v8160_v25, 2 }
 0x4d1   : > { %4408 = vrot.lane.b32.xlu1 %v4312_v16, %s5382_s7  ;;  %v8166_v30 = vpop.f32.mrf.mxu1  ;;  %4410 = vrot.lane.b32.xlu0 %v4314_v39, %s5382_s7  ;;  %v4186_v10 = vadd.f32 %v7865_v49, %v4065_v3 }
 0x4d2   : > { %v4013_v59 = vrot.slane %v8166_v30, 1  ;;  %v4315_v43 = vrot.slane %v8166_v30, 2 }
 0x4d3   : > { %v4369_v7 = vpop.permute.xlu1 %4368 }
 0x4d4   : > { %v4489_v38 = vadd.f32 %v4369_v7, %v4187_v44  ;;  %v4367_v33 = vpop.permute.xlu0 %4366  ;;  %v4015_v1 = vsel %vm1709_vm5, %v4013_v59, %v4014_v21  ;;  %v4317_v49 = vsel %vm2012_vm6, %v4315_v43, %v4316_v50 }
 0x4d5   : > { %v4488_v4 = vadd.f32 %v4367_v33, %v4186_v10  ;;  %4110 = vrot.lane.b32.xlu1 %v4015_v1, %s5381_s6 }
 0x4d6   : > { %v4600_v41 = vrot.slane %v4489_v38, 7 }
 0x4d7   : > { %v4598_v11 = vrot.slane %v4488_v4, 7  ;;  %v5351_v13 = vpop.f32.mrf.mxu1 }
 0x4d8   : > { %v4069_v42 = vpop.permute.xlu0 %4068  ;;  %v4018_v46 = vrot.slane %v5351_v13, 1  ;;  %v4320_v51 = vrot.slane %v5351_v13, 2 }
 0x4d9   : > { %v4599_v35 = vsel %vm2363_vm7, %v4597_v27, %v4598_v11  ;;  %v4601_v48 = vsel %vm2363_vm7, %v4598_v11, %v4600_v41  ;;  %4412 = vrot.lane.b32.xlu1 %v4317_v49, %s5382_s7  ;;  %v8183_v2 = vpop.f32.mrf.mxu1  ;;  %v4188_v3 = vadd.f32 %v4069_v42, %v7894_v5  ;;  %v4730_v11 = vld [vmem:[%s5599_s24 + $0x88] sm:$0xff] }
 0x4da   : > { %v4695_v19 = vadd.f32 %v7914_v60, %v4599_v35  ;;  %v4696_v20 = vadd.f32 %v7914_v60, %v4601_v48  ;;  %v4016_v22 = vrot.slane %v8183_v2, 1  ;;  %v4318_v24 = vrot.slane %v8183_v2, 2 }
 0x4dc   : > { %v4759_v0 = vadd.f32 %v4727_v56, %v4695_v19  ;;  %v4760_v9 = vadd.f32 %v4728_v63, %v4696_v20  ;;  %v4371_v32 = vpop.permute.xlu0 %4370  ;;  %v4019_v52 = vsel %vm1709_vm5, %v4016_v22, %v4018_v46  ;;  %v4017_v15 = vsel %vm1709_vm5, %v4014_v21, %v4016_v22 }
 0x4dd   : > { %4114 = vrot.lane.b32.xlu1 %v4019_v52, %s5381_s6  ;;  %4112 = vrot.lane.b32.xlu0 %v4017_v15, %s5381_s6  ;;  %v4321_v39 = vsel %vm2012_vm6, %v4318_v24, %v4320_v51  ;;  %v4319_v53 = vsel %vm2012_vm6, %v4316_v50, %v4318_v24  ;;  %v4490_v21 = vadd.f32 %v4371_v32, %v4188_v3  ;;  %v4729_v50 = vld [vmem:[%s5599_s24 + $0x80] sm:$0xff]  ;;  %v4731_v51 = vld [vmem:[%s5599_s24 + $0x90] sm:$0xff] }
 0x4de   : > { %4791 = vst.msk [vmem:[%s7931_s23 + $0x70] sm:$0xff] %vm225_vm1, %v4759_v0  ;;  %4792 = vst.msk [vmem:[%s7931_s23 + $0x78] sm:$0xff] %vm225_vm1, %v4760_v9 }
 0x4df   : > { %v4071_v18 = vpop.permute.xlu1 %4070  ;;  %v5354_v47 = vpop.f32.mrf.mxu1  ;;  %v4602_v38 = vrot.slane %v4490_v21, 7 }
 0x4e0   : > { %v4073_v16 = vpop.permute.xlu0 %4072  ;;  %v4189_v59 = vadd.f32 %v7889_v6, %v4071_v18  ;;  %v4732_v18 = vld [vmem:[%s5599_s24 + $0x98] sm:$0xff] }
 0x4e1   : > { %4416 = vrot.lane.b32.xlu1 %v4321_v39, %s5382_s7  ;;  %4414 = vrot.lane.b32.xlu0 %v4319_v53, %s5382_s7  ;;  %v3840_v44 = vpop.f32.mrf.mxu1  ;;  %v4190_v26 = vadd.f32 %v4073_v16, %v7907_v12 }
 0x4e3   : > { %v4373_v10 = vpop.permute.xlu1 %4372 }
 0x4e4   : > { %v4491_v7 = vadd.f32 %v4373_v10, %v4189_v59  ;;  %v4375_v5 = vpop.permute.xlu0 %4374 }
 0x4e5   : > { %v4492_v43 = vadd.f32 %v4375_v5, %v4190_v26 }
 0x4e6   : > { %v4603_v33 = vrot.slane %v4491_v7, 7 }
 0x4e7   : > { %v4605_v1 = vrot.slane %v4492_v43, 7  ;;  %v4075_v4 = vpop.permute.xlu1 %4074 }
 0x4e8   : > { %v4604_v41 = vsel %vm2363_vm7, %v4602_v38, %v4603_v33  ;;  %v4191_v35 = vadd.f32 %v4075_v4, %v7939_v31 }
 0x4e9   : > { %v4697_v27 = vadd.f32 %v7914_v60, %v4604_v41  ;;  %v4606_v6 = vsel %vm2363_vm7, %v4603_v33, %v4605_v1  ;;  %v4733_v41 = vld [vmem:[%s5599_s24 + $0xa0] sm:$0xff] }
 0x4ea   : > { %v4698_v12 = vadd.f32 %v7914_v60, %v4606_v6 }
 0x4eb   : > { %v4761_v13 = vadd.f32 %v4729_v50, %v4697_v27  ;;  %v4377_v42 = vpop.permute.xlu1 %4376 }
 0x4ec   : > { %v4762_v49 = vadd.f32 %v4730_v11, %v4698_v12  ;;  %v4493_v48 = vadd.f32 %v4377_v42, %v4191_v35  ;;  %v4734_v11 = vld [vmem:[%s5599_s24 + $0xa8] sm:$0xff] }
 0x4ed   : > { %4793 = vst.msk [vmem:[%s7931_s23 + $0x80] sm:$0xff] %vm225_vm1, %v4761_v13 }
 0x4ee   : > { %4794 = vst.msk [vmem:[%s7931_s23 + $0x88] sm:$0xff] %vm225_vm1, %v4762_v49  ;;  %v4607_v9 = vrot.slane %v4493_v48, 7 }
 0x4ef   : > { %v4079_v56 = vpop.permute.xlu1 %4078  ;;  %v4077_v63 = vpop.permute.xlu0 %4076 }
 0x4f0   : > { %v4193_v19 = vadd.f32 %v4079_v56, %v7956_v36  ;;  %v4192_v20 = vadd.f32 %v7934_v45, %v4077_v63 }
 0x4f3   : > { %v4381_v46 = vpop.permute.xlu1 %4380  ;;  %v4379_v22 = vpop.permute.xlu0 %4378 }
 0x4f4   : > { %v4495_v24 = vadd.f32 %v4381_v46, %v4193_v19  ;;  %v4494_v0 = vadd.f32 %v4379_v22, %v4192_v20 }
 0x4f6   : > { %v4610_v32 = vrot.slane %v4495_v24, 7  ;;  %v4608_v52 = vrot.slane %v4494_v0, 7 }
 0x4f7   : > { %v4081_v15 = vpop.permute.xlu0 %4080 }
 0x4f8   : > { %v4609_v47 = vsel %vm2363_vm7, %v4607_v9, %v4608_v52  ;;  %v4611_v31 = vsel %vm2363_vm7, %v4608_v52, %v4610_v32  ;;  %v4194_v21 = vadd.f32 %v4081_v15, %v7977_v62  ;;  %v4735_v52 = vld [vmem:[%s5599_s24 + $0xb0] sm:$0xff]  ;;  %v4736_v15 = vld [vmem:[%s5599_s24 + $0xb8] sm:$0xff] }
 0x4f9   : > { %v4699_v36 = vadd.f32 %v7914_v60, %v4609_v47  ;;  %v4700_v45 = vadd.f32 %v7914_v60, %v4611_v31 }
 0x4fb   : > { %v4763_v3 = vadd.f32 %v4731_v51, %v4699_v36  ;;  %v4764_v16 = vadd.f32 %v4732_v18, %v4700_v45  ;;  %v4383_v39 = vpop.permute.xlu0 %4382 }
 0x4fc   : > { %v4496_v59 = vadd.f32 %v4383_v39, %v4194_v21 }
 0x4fd   : > { %4795 = vst.msk [vmem:[%s7931_s23 + $0x90] sm:$0xff] %vm225_vm1, %v4763_v3  ;;  %4796 = vst.msk [vmem:[%s7931_s23 + $0x98] sm:$0xff] %vm225_vm1, %v4764_v16 }
 0x4fe   : > { %v4612_v33 = vrot.slane %v4496_v59, 7 }
 0x4ff   : > { %v4083_v53 = vpop.permute.xlu1 %4082  ;;  %v4085_v44 = vpop.permute.xlu0 %4084 }
 0x500   : > { %v4195_v26 = vadd.f32 %v7968_v40, %v4083_v53  ;;  %v4196_v10 = vadd.f32 %v4085_v44, %v7996_v28 }
 0x503   : > { %v4385_v7 = vpop.permute.xlu1 %4384  ;;  %v4387_v5 = vpop.permute.xlu0 %4386 }
 0x504   : > { %v4497_v43 = vadd.f32 %v4385_v7, %v4195_v26  ;;  %v4498_v38 = vadd.f32 %v4387_v5, %v4196_v10 }
 0x506   : > { %v4613_v1 = vrot.slane %v4497_v43, 7  ;;  %v4615_v4 = vrot.slane %v4498_v38, 7  ;;  %v4737_v38 = vld [vmem:[%s5599_s24 + $0xc0] sm:$0xff] }
 0x507   : > { %v4087_v50 = vpop.permute.xlu1 %4086 }
 0x508   : > { %v4614_v27 = vsel %vm2363_vm7, %v4612_v33, %v4613_v1  ;;  %v4616_v62 = vsel %vm2363_vm7, %v4613_v1, %v4615_v4  ;;  %v4197_v56 = vadd.f32 %v4087_v50, %v8016_v57  ;;  %v4738_v1 = vld [vmem:[%s5599_s24 + $0xc8] sm:$0xff] }
 0x509   : > { %v4701_v40 = vadd.f32 %v7914_v60, %v4614_v27  ;;  %v4702_v28 = vadd.f32 %v7914_v60, %v4616_v62 }
 0x50b   : > { %v4765_v6 = vadd.f32 %v4733_v41, %v4701_v40  ;;  %v4766_v12 = vadd.f32 %v4734_v11, %v4702_v28  ;;  %v4389_v13 = vpop.permute.xlu1 %4388 }
 0x50c   : > { %v4499_v63 = vadd.f32 %v4389_v13, %v4197_v56 }
 0x50d   : > { %4797 = vst.msk [vmem:[%s7931_s23 + $0xa0] sm:$0xff] %vm225_vm1, %v4765_v6  ;;  %4798 = vst.msk [vmem:[%s7931_s23 + $0xa8] sm:$0xff] %vm225_vm1, %v4766_v12 }
 0x50e   : > { %v4617_v24 = vrot.slane %v4499_v63, 7 }
 0x50f   : > { %v4091_v42 = vpop.permute.xlu1 %4090  ;;  %v4089_v49 = vpop.permute.xlu0 %4088 }
 0x510   : > { %v4199_v35 = vadd.f32 %v4091_v42, %v8035_v34  ;;  %v4198_v48 = vadd.f32 %v8010_v23, %v4089_v49 }
 0x513   : > { %v4393_v19 = vpop.permute.xlu1 %4392  ;;  %v4391_v20 = vpop.permute.xlu0 %4390 }
 0x514   : > { %v4501_v46 = vadd.f32 %v4393_v19, %v4199_v35  ;;  %v4500_v22 = vadd.f32 %v4391_v20, %v4198_v48  ;;  %v4739_v48 = vld [vmem:[%s5599_s24 + $0xd0] sm:$0xff]  ;;  %v4740_v19 = vld [vmem:[%s5599_s24 + $0xd8] sm:$0xff] }
 0x516   : > { %v4620_v0 = vrot.slane %v4501_v46, 7  ;;  %v4618_v9 = vrot.slane %v4500_v22, 7 }
 0x517   : > { %v4093_v32 = vpop.permute.xlu0 %4092 }
 0x518   : > { %v4619_v51 = vsel %vm2363_vm7, %v4617_v24, %v4618_v9  ;;  %v4621_v57 = vsel %vm2363_vm7, %v4618_v9, %v4620_v0  ;;  %v4200_v3 = vadd.f32 %v4093_v32, %v8055_v61 }
 0x519   : > { %v4703_v34 = vadd.f32 %v7914_v60, %v4619_v51  ;;  %v4704_v23 = vadd.f32 %v7914_v60, %v4621_v57 }
 0x51b   : > { %v4767_v18 = vadd.f32 %v4735_v52, %v4703_v34  ;;  %v4768_v47 = vadd.f32 %v4736_v15, %v4704_v23  ;;  %v4395_v31 = vpop.permute.xlu0 %4394 }
 0x51c   : > { %v4502_v16 = vadd.f32 %v4395_v31, %v4200_v3 }
 0x51d   : > { %4799 = vst.msk [vmem:[%s7931_s23 + $0xb0] sm:$0xff] %vm225_vm1, %v4767_v18  ;;  %4800 = vst.msk [vmem:[%s7931_s23 + $0xb8] sm:$0xff] %vm225_vm1, %v4768_v47 }
 0x51e   : > { %v4622_v10 = vrot.slane %v4502_v16, 7  ;;  %v4741_v16 = vld [vmem:[%s5599_s24 + $0xe0] sm:$0xff] }
 0x51f   : > { %v4095_v36 = vpop.permute.xlu1 %4094  ;;  %v4097_v45 = vpop.permute.xlu0 %4096 }
 0x520   : > { %v4201_v39 = vadd.f32 %v8049_v55, %v4095_v36  ;;  %v4202_v53 = vadd.f32 %v4097_v45, %v8072_v17 }
 0x523   : > { %v4397_v44 = vpop.permute.xlu1 %4396  ;;  %v4399_v21 = vpop.permute.xlu0 %4398 }
 0x524   : > { %v4503_v59 = vadd.f32 %v4397_v44, %v4201_v39  ;;  %v4504_v26 = vadd.f32 %v4399_v21, %v4202_v53  ;;  %v4742_v53 = vld [vmem:[%s5599_s24 + $0xe8] sm:$0xff] }
 0x526   : > { %v4623_v7 = vrot.slane %v4503_v59, 7  ;;  %v4625_v5 = vrot.slane %v4504_v26, 7 }
 0x527   : > { %v4099_v43 = vpop.permute.xlu1 %4098 }
 0x528   : > { %v4624_v33 = vsel %vm2363_vm7, %v4622_v10, %v4623_v7  ;;  %v4626_v61 = vsel %vm2363_vm7, %v4623_v7, %v4625_v5  ;;  %v4203_v62 = vadd.f32 %v4099_v43, %v8092_v37 }
 0x529   : > { %v4705_v55 = vadd.f32 %v7914_v60, %v4624_v33  ;;  %v4706_v17 = vadd.f32 %v7914_v60, %v4626_v61 }
 0x52b   : > { %v4769_v4 = vadd.f32 %v4737_v38, %v4705_v55  ;;  %v4770_v50 = vadd.f32 %v4738_v1, %v4706_v17  ;;  %v4401_v41 = vpop.permute.xlu1 %4400 }
 0x52c   : > { %v4505_v40 = vadd.f32 %v4401_v41, %v4203_v62  ;;  %v4743_v41 = vld [vmem:[%s5599_s24 + $0xf0] sm:$0xff] }
 0x52d   : > { %4801 = vst.msk [vmem:[%s7931_s23 + $0xc0] sm:$0xff] %vm225_vm1, %v4769_v4  ;;  %4802 = vst.msk [vmem:[%s7931_s23 + $0xc8] sm:$0xff] %vm225_vm1, %v4770_v50 }
 0x52e   : > { %v4627_v49 = vrot.slane %v4505_v40, 7 }
 0x52f   : > { %v4103_v27 = vpop.permute.xlu1 %4102  ;;  %v4101_v11 = vpop.permute.xlu0 %4100 }
 0x530   : > { %v4205_v28 = vadd.f32 %v4103_v27, %v8109_v14  ;;  %v4204_v6 = vadd.f32 %v8086_v29, %v4101_v11  ;;  %v5369_v29 = vld [vmem:[%s8309_s4] ss:$0 sm:$0xff]  ;;  %v4744_v27 = vld [vmem:[%s5599_s24 + $0xf8] sm:$0xff] }
 0x533   : > { %v4405_v12 = vpop.permute.xlu1 %4404  ;;  %v4403_v60 = vpop.permute.xlu0 %4402 }
 0x534   : > { %v4507_v13 = vadd.f32 %v4405_v12, %v4205_v28  ;;  %v4506_v42 = vadd.f32 %v4403_v60, %v4204_v6 }
 0x536   : > { %v4630_v56 = vrot.slane %v4507_v13, 7  ;;  %v4628_v63 = vrot.slane %v4506_v42, 7 }
 0x537   : > { %v4105_v35 = vpop.permute.xlu0 %4104 }
 0x538   : > { %v4629_v20 = vsel %vm2363_vm7, %v4627_v49, %v4628_v63  ;;  %v4631_v37 = vsel %vm2363_vm7, %v4628_v63, %v4630_v56  ;;  %v4206_v52 = vadd.f32 %v4105_v35, %v8129_v8 }
 0x539   : > { %v4707_v14 = vadd.f32 %v5369_v29, %v4629_v20  ;;  %v4708_v46 = vadd.f32 %v5369_v29, %v4631_v37 }
 0x53b   : > { %v4771_v22 = vadd.f32 %v4739_v48, %v4707_v14  ;;  %v4772_v24 = vadd.f32 %v4740_v19, %v4708_v46  ;;  %v4407_v0 = vpop.permute.xlu0 %4406 }
 0x53c   : > { %v4508_v15 = vadd.f32 %v4407_v0, %v4206_v52 }
 0x53d   : > { %4803 = vst.msk [vmem:[%s7931_s23 + $0xd0] sm:$0xff] %vm225_vm1, %v4771_v22  ;;  %4804 = vst.msk [vmem:[%s7931_s23 + $0xd8] sm:$0xff] %vm225_vm1, %v4772_v24 }
 0x53e   : > { %v4632_v31 = vrot.slane %v4508_v15, 7 }
 0x53f   : > { %v4107_v9 = vpop.permute.xlu1 %4106  ;;  %v4109_v32 = vpop.permute.xlu0 %4108 }
 0x540   : > { %v4207_v51 = vadd.f32 %v8123_v58, %v4107_v9  ;;  %v4208_v57 = vadd.f32 %v4109_v32, %v8146_v54 }
 0x543   : > { %v4409_v34 = vpop.permute.xlu1 %4408  ;;  %v4411_v23 = vpop.permute.xlu0 %4410 }
 0x544   : > { %v4509_v18 = vadd.f32 %v4409_v34, %v4207_v51  ;;  %v4510_v47 = vadd.f32 %v4411_v23, %v4208_v57 }
 0x546   : > { %v4633_v36 = vrot.slane %v4509_v18, 7  ;;  %v4635_v45 = vrot.slane %v4510_v47, 7 }
 0x547   : > { %v4111_v3 = vpop.permute.xlu1 %4110 }
 0x548   : > { %v4634_v39 = vsel %vm2363_vm7, %v4632_v31, %v4633_v36  ;;  %v4636_v8 = vsel %vm2363_vm7, %v4633_v36, %v4635_v45  ;;  %v4209_v7 = vadd.f32 %v4111_v3, %v8166_v30 }
 0x549   : > { %v4709_v44 = vadd.f32 %v5369_v29, %v4634_v39  ;;  %v4710_v58 = vadd.f32 %v5369_v29, %v4636_v8 }
 0x54b   : > { %v4773_v21 = vadd.f32 %v4741_v16, %v4709_v44  ;;  %v4774_v54 = vadd.f32 %v4742_v53, %v4710_v58  ;;  %v4413_v59 = vpop.permute.xlu1 %4412 }
 0x54c   : > { %v4511_v5 = vadd.f32 %v4413_v59, %v4209_v7 }
 0x54d   : > { %4805 = vst.msk [vmem:[%s7931_s23 + $0xe0] sm:$0xff] %vm225_vm1, %v4773_v21  ;;  %4806 = vst.msk [vmem:[%s7931_s23 + $0xe8] sm:$0xff] %vm225_vm1, %v4774_v54 }
 0x54e   : > { %v4637_v17 = vrot.slane %v4511_v5, 7 }
 0x54f   : > { %v4115_v26 = vpop.permute.xlu1 %4114  ;;  %v4113_v10 = vpop.permute.xlu0 %4112 }
 0x550   : > { %v4211_v43 = vadd.f32 %v4115_v26, %v8183_v2  ;;  %v4210_v38 = vadd.f32 %v8160_v25, %v4113_v10 }
 0x553   : > { %v4417_v33 = vpop.permute.xlu1 %4416  ;;  %v4415_v1 = vpop.permute.xlu0 %4414 }
 0x554   : > { %v4513_v61 = vadd.f32 %v4417_v33, %v4211_v43  ;;  %v4512_v55 = vadd.f32 %v4415_v1, %v4210_v38 }
 0x556   : > { %v4640_v4 = vrot.slane %v4513_v61, 7  ;;  %v4638_v50 = vrot.slane %v4512_v55, 7 }
 0x558   : > { %v4639_v11 = vsel %vm2363_vm7, %v4637_v17, %v4638_v50  ;;  %v4641_v30 = vsel %vm2363_vm7, %v4638_v50, %v4640_v4 }
 0x559   : > { %v4711_v62 = vadd.f32 %v5369_v29, %v4639_v11  ;;  %v4712_v40 = vadd.f32 %v5369_v29, %v4641_v30 }
 0x55b   : > { %v4775_v2 = vadd.f32 %v4743_v41, %v4711_v62  ;;  %v4776_v28 = vadd.f32 %v4744_v27, %v4712_v40 }
 0x55d   : > { %4807 = vst.msk [vmem:[%s7931_s23 + $0xf0] sm:$0xff] %vm225_vm1, %v4775_v2  ;;  %4808 = vst.msk [vmem:[%s7931_s23 + $0xf8] sm:$0xff] %vm225_vm1, %v4776_v28 }
 0x55e PF: > { %s15_s18 = sadd.s32 1, %s5376_s18  }
 0x55f   : > { %p12_p4 = scmp.ge.s32.totalorder %s15_s18, 4  }
 0x561   :  { %14 = sbr.rel (!%p12_p4) target bundleno = 1 (0x1), region = 74 }

</bundles_post_ra>
